<compile_context>
chip_gen: v5e
topology: v5e:2x2
jax: 0.10.0
libtpu: 0.0.40
codegen_flags: <defaults>
</compile_context>

<pallas_src>
import functools

import jax
import jax.numpy as jnp
from jax.experimental import pallas as pl
from jax.experimental.pallas import tpu as pltpu


# ---------------------------------------------------------------------------
# Fused kernel: pooler + input projection + LSTM recurrence + classifier
# ---------------------------------------------------------------------------
def document_bert_lstm_kernel(x_ref, wp_ref, bp_ref, wih_ref, whh_ref, bl_ref,
                              wc_ref, bc_ref, out_ref, gx_ref, *, hidden, seqs):
    H = hidden
    S = seqs
    td = x_ref.shape[0]          # docs in this tile
    bf16 = jnp.bfloat16

    # ---- BERT pooler + time-invariant LSTM input projection (one big matmul) ----
    # x_ref is (td, S, H): token 0 of every chunk, gathered by the BlockSpec DMA.
    x0 = x_ref[...]
    # time-major rows so the recurrence below can index gx_ref[t] on the leading dim
    x0_tm = jnp.swapaxes(x0, 0, 1).reshape(S * td, H)
    pooled = jnp.tanh(
        jnp.dot(x0_tm.astype(bf16), wp_ref[...],
                preferred_element_type=jnp.float32) + bp_ref[...])
    # Dropout(p=hidden_dropout_prob) in eval mode is the identity.
    gates_x = jnp.dot(pooled.astype(bf16), wih_ref[...],
                      preferred_element_type=jnp.float32) + bl_ref[...]
    gx_ref[...] = gates_x.reshape(S, td, 4 * H)      # (time, doc, 4H) in VMEM

    # ---- LSTM recurrence: only h @ W_hh^T per step; h/c carried as values ----
    def step(t, carry):
        h, c = carry
        gates = gx_ref[t] + jnp.dot(h.astype(bf16), whh_ref[...],
                                    preferred_element_type=jnp.float32)
        i_g = jax.nn.sigmoid(gates[:, 0 * H:1 * H])   # PyTorch gate order i,f,g,o
        f_g = jax.nn.sigmoid(gates[:, 1 * H:2 * H])
        g_g = jnp.tanh(gates[:, 2 * H:3 * H])
        o_g = jax.nn.sigmoid(gates[:, 3 * H:4 * H])
        c = f_g * c + i_g * g_g
        h = o_g * jnp.tanh(c)
        return h, c

    h0 = jnp.zeros((td, H), jnp.float32)
    h, _ = jax.lax.fori_loop(0, S, step, (h0, h0), unroll=True)

    # ---- classifier: Dropout (identity) -> Linear(H, 2 padded to 128) -> Sigmoid ----
    logits = jnp.dot(h, wc_ref[...], preferred_element_type=jnp.float32) + bc_ref[...]
    out_ref[...] = jax.nn.sigmoid(logits)


def _pick_doc_tile(num_docs):
    # Doc-tile rows must be a multiple of 8 or equal to D (TPU sublane tiling of
    # the (D, 128) output).  Tiling docs also exposes "parallel" grid work.
    for cand in (32, 16, 8):
        if num_docs % cand == 0:
            return cand
    return num_docs


# ---------------------------------------------------------------------------
# Wrapper
# ---------------------------------------------------------------------------
def document_bert_lstm_forward(last_hidden_state, params):
    D, S, TOK, H = last_hidden_state.shape
    f32, bf16 = jnp.float32, jnp.bfloat16
    n_cls = params["cls_w"].shape[0]
    CLS_PAD = 128

    # Weight prep: transpose once, bf16 MXU operands; biases / classifier in f32.
    wp_t = params["pooler_w"].T.astype(bf16)                               # (H, H)
    bp = params["pooler_b"].reshape(1, H).astype(f32)
    wih_t = params["lstm_w_ih"].T.astype(bf16)                             # (H, 4H)
    whh_t = params["lstm_w_hh"].T.astype(bf16)                             # (H, 4H)
    b_lstm = (params["lstm_b_ih"] + params["lstm_b_hh"]).reshape(1, 4 * H).astype(f32)
    wc_pad = jnp.zeros((H, CLS_PAD), f32).at[:, :n_cls].set(params["cls_w"].T.astype(f32))
    bc_pad = jnp.zeros((1, CLS_PAD), f32).at[:, :n_cls].set(
        params["cls_b"].reshape(1, n_cls).astype(f32))

    # No-copy view: token 0 of each chunk is columns [0, H) of the last dim,
    # so the pooler input gather happens inside the BlockSpec DMA.
    x = last_hidden_state.reshape(D, S, TOK * H)

    td = _pick_doc_tile(D)
    grid = (D // td,)

    out = pl.pallas_call(
        functools.partial(document_bert_lstm_kernel, hidden=H, seqs=S),
        out_shape=jax.ShapeDtypeStruct((D, CLS_PAD), f32),
        grid=grid,
        in_specs=[
            pl.BlockSpec((td, S, H), lambda dt: (dt, 0, 0)),   # token-0 slab per doc tile
            pl.BlockSpec((H, H), lambda dt: (0, 0)),           # W_pooler^T (bf16)
            pl.BlockSpec((1, H), lambda dt: (0, 0)),           # b_pooler
            pl.BlockSpec((H, 4 * H), lambda dt: (0, 0)),       # W_ih^T (bf16)
            pl.BlockSpec((H, 4 * H), lambda dt: (0, 0)),       # W_hh^T (bf16)
            pl.BlockSpec((1, 4 * H), lambda dt: (0, 0)),       # b_ih + b_hh
            pl.BlockSpec((H, CLS_PAD), lambda dt: (0, 0)),     # W_cls^T padded to 128 lanes
            pl.BlockSpec((1, CLS_PAD), lambda dt: (0, 0)),     # b_cls padded
        ],
        out_specs=pl.BlockSpec((td, CLS_PAD), lambda dt: (dt, 0)),
        scratch_shapes=[pltpu.VMEM((S, td, 4 * H), f32)],      # time-major gates_x
        compiler_params=pltpu.CompilerParams(
            dimension_semantics=("parallel",),
            vmem_limit_bytes=32 * 1024 * 1024),
    )(x, wp_t, bp, wih_t, whh_t, b_lstm, wc_pad, bc_pad)

    # TODO(synk): training-mode dropout (random masks) intentionally omitted (eval mode).
    return out[:, :n_cls]   # (docs, 2)


# ---------------------------------------------------------------------------
# Pure-JAX reference (for correctness check)
# ---------------------------------------------------------------------------
def reference_forward(last_hidden_state, params, matmul_dtype=jnp.float32):
    """matmul_dtype=bf16 mirrors the kernel's mixed-precision policy exactly."""
    D, S, TOK, H = last_hidden_state.shape
    md = matmul_dtype

    def mm(a, b):
        return jnp.dot(a.astype(md), b.astype(md), preferred_element_type=jnp.float32)

    x0 = last_hidden_state[:, :, 0, :]                                   # (D, S, H)
    pooled = jnp.tanh(mm(x0, params["pooler_w"].T) + params["pooler_b"])
    seq = pooled.transpose(1, 0, 2)                                      # (S, D, H)
    b = params["lstm_b_ih"] + params["lstm_b_hh"]

    def step(carry, x_t):
        h, c = carry
        gates = mm(x_t, params["lstm_w_ih"].T) + mm(h, params["lstm_w_hh"].T) + b
        i_g = jax.nn.sigmoid(gates[:, 0 * H:1 * H])
        f_g = jax.nn.sigmoid(gates[:, 1 * H:2 * H])
        g_g = jnp.tanh(gates[:, 2 * H:3 * H])
        o_g = jax.nn.sigmoid(gates[:, 3 * H:4 * H])
        c = f_g * c + i_g * g_g
        h = o_g * jnp.tanh(c)
        return (h, c), None

    h0 = jnp.zeros((D, H), jnp.float32)
    (h, _), _ = jax.lax.scan(step, (h0, h0), seq)
    logits = h @ params["cls_w"].T + params["cls_b"]                     # classifier in f32
    return jax.nn.sigmoid(logits)


# ---------------------------------------------------------------------------
if __name__ == "__main__":
    # docs, seq-chunks per doc (module uses bert_seq_num=13), tokens, hidden
    D, S, TOK, H = 2, 13, 8, 128

    key = jax.random.PRNGKey(0)
    ks = jax.random.split(key, 8)
    scale = 1.0 / jnp.sqrt(H)

    last_hidden_state = jax.random.normal(ks[0], (D, S, TOK, H), jnp.float32)

    params = {
        "pooler_w": jax.random.normal(ks[1], (H, H), jnp.float32) * scale,
        "pooler_b": jax.random.normal(ks[2], (H,), jnp.float32) * scale,
        "lstm_w_ih": jax.random.normal(ks[3], (4 * H, H), jnp.float32) * scale,
        "lstm_w_hh": jax.random.normal(ks[4], (4 * H, H), jnp.float32) * scale,
        "lstm_b_ih": jax.random.normal(ks[5], (4 * H,), jnp.float32) * scale,
        "lstm_b_hh": jax.random.normal(ks[6], (4 * H,), jnp.float32) * scale,
        "cls_w": jax.random.normal(ks[7], (2, H), jnp.float32) * scale,
        "cls_b": jnp.zeros((2,), jnp.float32),
    }

    out = document_bert_lstm_forward(last_hidden_state, params)
    out = jax.block_until_ready(out)
    assert out.shape == (D, 2)

    # Matched-precision reference (bf16 MXU operands, f32 accumulation) — tight check.
    ref_matched = reference_forward(last_hidden_state, params, matmul_dtype=jnp.bfloat16)
    assert jnp.allclose(out, ref_matched, rtol=5e-3, atol=5e-3), (out, ref_matched)

    # Full-f32 reference (faithful to the PyTorch module) — loose check covering
    # the bf16-operand rounding.
    ref_f32 = reference_forward(last_hidden_state, params, matmul_dtype=jnp.float32)
    assert jnp.allclose(out, ref_f32, rtol=2e-2, atol=2e-2), (out, ref_f32)

    print("KERNEL_OK")
</pallas_src>

<mosaic_0001>
module attributes {stable_mosaic.version = 11 : i64} {
  func.func @document_bert_lstm_kernel(%arg0: i32, %arg1: memref<2x13x128xf32, #tpu.memory_space<vmem>>, %arg2: memref<128x128xbf16, #tpu.memory_space<vmem>>, %arg3: memref<1x128xf32, #tpu.memory_space<vmem>>, %arg4: memref<128x512xbf16, #tpu.memory_space<vmem>>, %arg5: memref<128x512xbf16, #tpu.memory_space<vmem>>, %arg6: memref<1x512xf32, #tpu.memory_space<vmem>>, %arg7: memref<128x128xf32, #tpu.memory_space<vmem>>, %arg8: memref<1x128xf32, #tpu.memory_space<vmem>>, %arg9: memref<2x128xf32, #tpu.memory_space<vmem>>, %arg10: memref<13x2x512xf32, #tpu.memory_space<vmem>>) attributes {dimension_semantics = [#tpu.dimension_semantics<parallel>], iteration_bounds = array<i64: 1>, scalar_prefetch = 0 : i64, scratch_operands = 1 : i64, tpu.core_type = #tpu.core_type<tc>, window_params = [{transform_indices = @transform_0, window_bounds = array<i64: 2, 13, 128>}, {pipeline_mode = #tpu.pipeline_mode<synchronous>, transform_indices = @transform_1, window_bounds = array<i64: 128, 128>}, {pipeline_mode = #tpu.pipeline_mode<synchronous>, transform_indices = @transform_2, window_bounds = array<i64: 1, 128>}, {pipeline_mode = #tpu.pipeline_mode<synchronous>, transform_indices = @transform_3, window_bounds = array<i64: 128, 512>}, {pipeline_mode = #tpu.pipeline_mode<synchronous>, transform_indices = @transform_4, window_bounds = array<i64: 128, 512>}, {pipeline_mode = #tpu.pipeline_mode<synchronous>, transform_indices = @transform_5, window_bounds = array<i64: 1, 512>}, {pipeline_mode = #tpu.pipeline_mode<synchronous>, transform_indices = @transform_6, window_bounds = array<i64: 128, 128>}, {pipeline_mode = #tpu.pipeline_mode<synchronous>, transform_indices = @transform_7, window_bounds = array<i64: 1, 128>}, {transform_indices = @transform_8, window_bounds = array<i64: 2, 128>}]} {
    %c0 = arith.constant 0 : index
    %c0_0 = arith.constant 0 : index
    %c0_1 = arith.constant 0 : index
    %0 = vector.load %arg1[%c0, %c0_0, %c0_1] : memref<2x13x128xf32, #tpu.memory_space<vmem>>, vector<2x13x128xf32>
    %1 = tpu.transpose %0, [1, 0, 2] : vector<2x13x128xf32> -> vector<13x2x128xf32>
    %2 = vector.shape_cast %1 : vector<13x2x128xf32> to vector<26x128xf32>
    %3 = arith.truncf %2 : vector<26x128xf32> to vector<26x128xbf16>
    %c0_2 = arith.constant 0 : index
    %c0_3 = arith.constant 0 : index
    %4 = vector.load %arg2[%c0_2, %c0_3] : memref<128x128xbf16, #tpu.memory_space<vmem>>, vector<128x128xbf16>
    %cst = arith.constant dense<0.000000e+00> : vector<26x128xf32>
    %5 = tpu.matmul %3, %4, %cst {dimension_numbers = #tpu.dot_dimension_numbers<[1], [0], [0], [1], [0, 0, 1, 1], [], []>} : vector<26x128xbf16>, vector<128x128xbf16>, vector<26x128xf32> -> vector<26x128xf32>
    %c0_4 = arith.constant 0 : index
    %c0_5 = arith.constant 0 : index
    %6 = vector.load %arg3[%c0_4, %c0_5] : memref<1x128xf32, #tpu.memory_space<vmem>>, vector<1x128xf32>
    %7 = vector.broadcast %6 : vector<1x128xf32> to vector<26x128xf32>
    %8 = arith.addf %5, %7 : vector<26x128xf32>
    %9 = math.tanh %8 : vector<26x128xf32>
    %10 = arith.truncf %9 : vector<26x128xf32> to vector<26x128xbf16>
    %c0_6 = arith.constant 0 : index
    %c0_7 = arith.constant 0 : index
    %11 = vector.load %arg4[%c0_6, %c0_7] : memref<128x512xbf16, #tpu.memory_space<vmem>>, vector<128x512xbf16>
    %cst_8 = arith.constant dense<0.000000e+00> : vector<26x512xf32>
    %12 = tpu.matmul %10, %11, %cst_8 {dimension_numbers = #tpu.dot_dimension_numbers<[1], [0], [0], [1], [0, 0, 1, 1], [], []>} : vector<26x128xbf16>, vector<128x512xbf16>, vector<26x512xf32> -> vector<26x512xf32>
    %c0_9 = arith.constant 0 : index
    %c0_10 = arith.constant 0 : index
    %13 = vector.load %arg6[%c0_9, %c0_10] : memref<1x512xf32, #tpu.memory_space<vmem>>, vector<1x512xf32>
    %14 = vector.broadcast %13 : vector<1x512xf32> to vector<26x512xf32>
    %15 = arith.addf %12, %14 : vector<26x512xf32>
    %16 = vector.shape_cast %15 : vector<26x512xf32> to vector<13x2x512xf32>
    %c0_11 = arith.constant 0 : index
    %c0_12 = arith.constant 0 : index
    %c0_13 = arith.constant 0 : index
    %17 = vector.load %arg10[%c0_11, %c0_12, %c0_13] : memref<13x2x512xf32, #tpu.memory_space<vmem>>, vector<13x2x512xf32>
    tpu.vector_store %arg10[%c0_11, %c0_12, %c0_13], %16 {strides = array<i32>} : memref<13x2x512xf32, #tpu.memory_space<vmem>>, vector<13x2x512xf32>,
    %cst_14 = arith.constant 0.000000e+00 : f32
    %18 = vector.broadcast %cst_14 : f32 to vector<2x128xf32>
    %c0_i32 = arith.constant 0 : i32
    %19 = arith.index_cast %c0_i32 : i32 to index
    %c0_15 = arith.constant 0 : index
    %c0_16 = arith.constant 0 : index
    %20 = vector.load %arg10[%19, %c0_15, %c0_16] : memref<13x2x512xf32, #tpu.memory_space<vmem>>, vector<1x2x512xf32>
    %21 = vector.shape_cast %20 : vector<1x2x512xf32> to vector<2x512xf32>
    %22 = arith.truncf %18 : vector<2x128xf32> to vector<2x128xbf16>
    %c0_17 = arith.constant 0 : index
    %c0_18 = arith.constant 0 : index
    %23 = vector.load %arg5[%c0_17, %c0_18] : memref<128x512xbf16, #tpu.memory_space<vmem>>, vector<128x512xbf16>
    %cst_19 = arith.constant dense<0.000000e+00> : vector<2x512xf32>
    %24 = tpu.matmul %22, %23, %cst_19 {dimension_numbers = #tpu.dot_dimension_numbers<[1], [0], [0], [1], [0, 0, 1, 1], [], []>} : vector<2x128xbf16>, vector<128x512xbf16>, vector<2x512xf32> -> vector<2x512xf32>
    %25 = arith.addf %21, %24 : vector<2x512xf32>
    %26 = vector.extract_strided_slice %25 {offsets = [0, 0], sizes = [2, 128], strides = [1, 1]} : vector<2x512xf32> to vector<2x128xf32>
    %27 = arith.negf %26 : vector<2x128xf32>
    %28 = math.exp %27 : vector<2x128xf32>
    %cst_20 = arith.constant 1.000000e+00 : f32
    %29 = vector.broadcast %cst_20 : f32 to vector<2x128xf32>
    %30 = arith.addf %29, %28 : vector<2x128xf32>
    %31 = arith.divf %29, %30 : vector<2x128xf32>
    %32 = vector.extract_strided_slice %25 {offsets = [0, 128], sizes = [2, 128], strides = [1, 1]} : vector<2x512xf32> to vector<2x128xf32>
    %33 = arith.negf %32 : vector<2x128xf32>
    %34 = math.exp %33 : vector<2x128xf32>
    %cst_21 = arith.constant 1.000000e+00 : f32
    %35 = vector.broadcast %cst_21 : f32 to vector<2x128xf32>
    %36 = arith.addf %35, %34 : vector<2x128xf32>
    %37 = arith.divf %35, %36 : vector<2x128xf32>
    %38 = vector.extract_strided_slice %25 {offsets = [0, 256], sizes = [2, 128], strides = [1, 1]} : vector<2x512xf32> to vector<2x128xf32>
    %39 = math.tanh %38 : vector<2x128xf32>
    %40 = vector.extract_strided_slice %25 {offsets = [0, 384], sizes = [2, 128], strides = [1, 1]} : vector<2x512xf32> to vector<2x128xf32>
    %41 = arith.negf %40 : vector<2x128xf32>
    %42 = math.exp %41 : vector<2x128xf32>
    %cst_22 = arith.constant 1.000000e+00 : f32
    %43 = vector.broadcast %cst_22 : f32 to vector<2x128xf32>
    %44 = arith.addf %43, %42 : vector<2x128xf32>
    %45 = arith.divf %43, %44 : vector<2x128xf32>
    %46 = arith.mulf %37, %18 : vector<2x128xf32>
    %47 = arith.mulf %31, %39 : vector<2x128xf32>
    %48 = arith.addf %46, %47 : vector<2x128xf32>
    %49 = math.tanh %48 : vector<2x128xf32>
    %50 = arith.mulf %45, %49 : vector<2x128xf32>
    %c1_i32 = arith.constant 1 : i32
    %51 = arith.index_cast %c1_i32 : i32 to index
    %c0_23 = arith.constant 0 : index
    %c0_24 = arith.constant 0 : index
    %52 = vector.load %arg10[%51, %c0_23, %c0_24] : memref<13x2x512xf32, #tpu.memory_space<vmem>>, vector<1x2x512xf32>
    %53 = vector.shape_cast %52 : vector<1x2x512xf32> to vector<2x512xf32>
    %54 = arith.truncf %50 : vector<2x128xf32> to vector<2x128xbf16>
    %c0_25 = arith.constant 0 : index
    %c0_26 = arith.constant 0 : index
    %55 = vector.load %arg5[%c0_25, %c0_26] : memref<128x512xbf16, #tpu.memory_space<vmem>>, vector<128x512xbf16>
    %cst_27 = arith.constant dense<0.000000e+00> : vector<2x512xf32>
    %56 = tpu.matmul %54, %55, %cst_27 {dimension_numbers = #tpu.dot_dimension_numbers<[1], [0], [0], [1], [0, 0, 1, 1], [], []>} : vector<2x128xbf16>, vector<128x512xbf16>, vector<2x512xf32> -> vector<2x512xf32>
    %57 = arith.addf %53, %56 : vector<2x512xf32>
    %58 = vector.extract_strided_slice %57 {offsets = [0, 0], sizes = [2, 128], strides = [1, 1]} : vector<2x512xf32> to vector<2x128xf32>
    %59 = arith.negf %58 : vector<2x128xf32>
    %60 = math.exp %59 : vector<2x128xf32>
    %cst_28 = arith.constant 1.000000e+00 : f32
    %61 = vector.broadcast %cst_28 : f32 to vector<2x128xf32>
    %62 = arith.addf %61, %60 : vector<2x128xf32>
    %63 = arith.divf %61, %62 : vector<2x128xf32>
    %64 = vector.extract_strided_slice %57 {offsets = [0, 128], sizes = [2, 128], strides = [1, 1]} : vector<2x512xf32> to vector<2x128xf32>
    %65 = arith.negf %64 : vector<2x128xf32>
    %66 = math.exp %65 : vector<2x128xf32>
    %cst_29 = arith.constant 1.000000e+00 : f32
    %67 = vector.broadcast %cst_29 : f32 to vector<2x128xf32>
    %68 = arith.addf %67, %66 : vector<2x128xf32>
    %69 = arith.divf %67, %68 : vector<2x128xf32>
    %70 = vector.extract_strided_slice %57 {offsets = [0, 256], sizes = [2, 128], strides = [1, 1]} : vector<2x512xf32> to vector<2x128xf32>
    %71 = math.tanh %70 : vector<2x128xf32>
    %72 = vector.extract_strided_slice %57 {offsets = [0, 384], sizes = [2, 128], strides = [1, 1]} : vector<2x512xf32> to vector<2x128xf32>
    %73 = arith.negf %72 : vector<2x128xf32>
    %74 = math.exp %73 : vector<2x128xf32>
    %cst_30 = arith.constant 1.000000e+00 : f32
    %75 = vector.broadcast %cst_30 : f32 to vector<2x128xf32>
    %76 = arith.addf %75, %74 : vector<2x128xf32>
    %77 = arith.divf %75, %76 : vector<2x128xf32>
    %78 = arith.mulf %69, %48 : vector<2x128xf32>
    %79 = arith.mulf %63, %71 : vector<2x128xf32>
    %80 = arith.addf %78, %79 : vector<2x128xf32>
    %81 = math.tanh %80 : vector<2x128xf32>
    %82 = arith.mulf %77, %81 : vector<2x128xf32>
    %c2_i32 = arith.constant 2 : i32
    %83 = arith.index_cast %c2_i32 : i32 to index
    %c0_31 = arith.constant 0 : index
    %c0_32 = arith.constant 0 : index
    %84 = vector.load %arg10[%83, %c0_31, %c0_32] : memref<13x2x512xf32, #tpu.memory_space<vmem>>, vector<1x2x512xf32>
    %85 = vector.shape_cast %84 : vector<1x2x512xf32> to vector<2x512xf32>
    %86 = arith.truncf %82 : vector<2x128xf32> to vector<2x128xbf16>
    %c0_33 = arith.constant 0 : index
    %c0_34 = arith.constant 0 : index
    %87 = vector.load %arg5[%c0_33, %c0_34] : memref<128x512xbf16, #tpu.memory_space<vmem>>, vector<128x512xbf16>
    %cst_35 = arith.constant dense<0.000000e+00> : vector<2x512xf32>
    %88 = tpu.matmul %86, %87, %cst_35 {dimension_numbers = #tpu.dot_dimension_numbers<[1], [0], [0], [1], [0, 0, 1, 1], [], []>} : vector<2x128xbf16>, vector<128x512xbf16>, vector<2x512xf32> -> vector<2x512xf32>
    %89 = arith.addf %85, %88 : vector<2x512xf32>
    %90 = vector.extract_strided_slice %89 {offsets = [0, 0], sizes = [2, 128], strides = [1, 1]} : vector<2x512xf32> to vector<2x128xf32>
    %91 = arith.negf %90 : vector<2x128xf32>
    %92 = math.exp %91 : vector<2x128xf32>
    %cst_36 = arith.constant 1.000000e+00 : f32
    %93 = vector.broadcast %cst_36 : f32 to vector<2x128xf32>
    %94 = arith.addf %93, %92 : vector<2x128xf32>
    %95 = arith.divf %93, %94 : vector<2x128xf32>
    %96 = vector.extract_strided_slice %89 {offsets = [0, 128], sizes = [2, 128], strides = [1, 1]} : vector<2x512xf32> to vector<2x128xf32>
    %97 = arith.negf %96 : vector<2x128xf32>
    %98 = math.exp %97 : vector<2x128xf32>
    %cst_37 = arith.constant 1.000000e+00 : f32
    %99 = vector.broadcast %cst_37 : f32 to vector<2x128xf32>
    %100 = arith.addf %99, %98 : vector<2x128xf32>
    %101 = arith.divf %99, %100 : vector<2x128xf32>
    %102 = vector.extract_strided_slice %89 {offsets = [0, 256], sizes = [2, 128], strides = [1, 1]} : vector<2x512xf32> to vector<2x128xf32>
    %103 = math.tanh %102 : vector<2x128xf32>
    %104 = vector.extract_strided_slice %89 {offsets = [0, 384], sizes = [2, 128], strides = [1, 1]} : vector<2x512xf32> to vector<2x128xf32>
    %105 = arith.negf %104 : vector<2x128xf32>
    %106 = math.exp %105 : vector<2x128xf32>
    %cst_38 = arith.constant 1.000000e+00 : f32
    %107 = vector.broadcast %cst_38 : f32 to vector<2x128xf32>
    %108 = arith.addf %107, %106 : vector<2x128xf32>
    %109 = arith.divf %107, %108 : vector<2x128xf32>
    %110 = arith.mulf %101, %80 : vector<2x128xf32>
    %111 = arith.mulf %95, %103 : vector<2x128xf32>
    %112 = arith.addf %110, %111 : vector<2x128xf32>
    %113 = math.tanh %112 : vector<2x128xf32>
    %114 = arith.mulf %109, %113 : vector<2x128xf32>
    %c3_i32 = arith.constant 3 : i32
    %115 = arith.index_cast %c3_i32 : i32 to index
    %c0_39 = arith.constant 0 : index
    %c0_40 = arith.constant 0 : index
    %116 = vector.load %arg10[%115, %c0_39, %c0_40] : memref<13x2x512xf32, #tpu.memory_space<vmem>>, vector<1x2x512xf32>
    %117 = vector.shape_cast %116 : vector<1x2x512xf32> to vector<2x512xf32>
    %118 = arith.truncf %114 : vector<2x128xf32> to vector<2x128xbf16>
    %c0_41 = arith.constant 0 : index
    %c0_42 = arith.constant 0 : index
    %119 = vector.load %arg5[%c0_41, %c0_42] : memref<128x512xbf16, #tpu.memory_space<vmem>>, vector<128x512xbf16>
    %cst_43 = arith.constant dense<0.000000e+00> : vector<2x512xf32>
    %120 = tpu.matmul %118, %119, %cst_43 {dimension_numbers = #tpu.dot_dimension_numbers<[1], [0], [0], [1], [0, 0, 1, 1], [], []>} : vector<2x128xbf16>, vector<128x512xbf16>, vector<2x512xf32> -> vector<2x512xf32>
    %121 = arith.addf %117, %120 : vector<2x512xf32>
    %122 = vector.extract_strided_slice %121 {offsets = [0, 0], sizes = [2, 128], strides = [1, 1]} : vector<2x512xf32> to vector<2x128xf32>
    %123 = arith.negf %122 : vector<2x128xf32>
    %124 = math.exp %123 : vector<2x128xf32>
    %cst_44 = arith.constant 1.000000e+00 : f32
    %125 = vector.broadcast %cst_44 : f32 to vector<2x128xf32>
    %126 = arith.addf %125, %124 : vector<2x128xf32>
    %127 = arith.divf %125, %126 : vector<2x128xf32>
    %128 = vector.extract_strided_slice %121 {offsets = [0, 128], sizes = [2, 128], strides = [1, 1]} : vector<2x512xf32> to vector<2x128xf32>
    %129 = arith.negf %128 : vector<2x128xf32>
    %130 = math.exp %129 : vector<2x128xf32>
    %cst_45 = arith.constant 1.000000e+00 : f32
    %131 = vector.broadcast %cst_45 : f32 to vector<2x128xf32>
    %132 = arith.addf %131, %130 : vector<2x128xf32>
    %133 = arith.divf %131, %132 : vector<2x128xf32>
    %134 = vector.extract_strided_slice %121 {offsets = [0, 256], sizes = [2, 128], strides = [1, 1]} : vector<2x512xf32> to vector<2x128xf32>
    %135 = math.tanh %134 : vector<2x128xf32>
    %136 = vector.extract_strided_slice %121 {offsets = [0, 384], sizes = [2, 128], strides = [1, 1]} : vector<2x512xf32> to vector<2x128xf32>
    %137 = arith.negf %136 : vector<2x128xf32>
    %138 = math.exp %137 : vector<2x128xf32>
    %cst_46 = arith.constant 1.000000e+00 : f32
    %139 = vector.broadcast %cst_46 : f32 to vector<2x128xf32>
    %140 = arith.addf %139, %138 : vector<2x128xf32>
    %141 = arith.divf %139, %140 : vector<2x128xf32>
    %142 = arith.mulf %133, %112 : vector<2x128xf32>
    %143 = arith.mulf %127, %135 : vector<2x128xf32>
    %144 = arith.addf %142, %143 : vector<2x128xf32>
    %145 = math.tanh %144 : vector<2x128xf32>
    %146 = arith.mulf %141, %145 : vector<2x128xf32>
    %c4_i32 = arith.constant 4 : i32
    %147 = arith.index_cast %c4_i32 : i32 to index
    %c0_47 = arith.constant 0 : index
    %c0_48 = arith.constant 0 : index
    %148 = vector.load %arg10[%147, %c0_47, %c0_48] : memref<13x2x512xf32, #tpu.memory_space<vmem>>, vector<1x2x512xf32>
    %149 = vector.shape_cast %148 : vector<1x2x512xf32> to vector<2x512xf32>
    %150 = arith.truncf %146 : vector<2x128xf32> to vector<2x128xbf16>
    %c0_49 = arith.constant 0 : index
    %c0_50 = arith.constant 0 : index
    %151 = vector.load %arg5[%c0_49, %c0_50] : memref<128x512xbf16, #tpu.memory_space<vmem>>, vector<128x512xbf16>
    %cst_51 = arith.constant dense<0.000000e+00> : vector<2x512xf32>
    %152 = tpu.matmul %150, %151, %cst_51 {dimension_numbers = #tpu.dot_dimension_numbers<[1], [0], [0], [1], [0, 0, 1, 1], [], []>} : vector<2x128xbf16>, vector<128x512xbf16>, vector<2x512xf32> -> vector<2x512xf32>
    %153 = arith.addf %149, %152 : vector<2x512xf32>
    %154 = vector.extract_strided_slice %153 {offsets = [0, 0], sizes = [2, 128], strides = [1, 1]} : vector<2x512xf32> to vector<2x128xf32>
    %155 = arith.negf %154 : vector<2x128xf32>
    %156 = math.exp %155 : vector<2x128xf32>
    %cst_52 = arith.constant 1.000000e+00 : f32
    %157 = vector.broadcast %cst_52 : f32 to vector<2x128xf32>
    %158 = arith.addf %157, %156 : vector<2x128xf32>
    %159 = arith.divf %157, %158 : vector<2x128xf32>
    %160 = vector.extract_strided_slice %153 {offsets = [0, 128], sizes = [2, 128], strides = [1, 1]} : vector<2x512xf32> to vector<2x128xf32>
    %161 = arith.negf %160 : vector<2x128xf32>
    %162 = math.exp %161 : vector<2x128xf32>
    %cst_53 = arith.constant 1.000000e+00 : f32
    %163 = vector.broadcast %cst_53 : f32 to vector<2x128xf32>
    %164 = arith.addf %163, %162 : vector<2x128xf32>
    %165 = arith.divf %163, %164 : vector<2x128xf32>
    %166 = vector.extract_strided_slice %153 {offsets = [0, 256], sizes = [2, 128], strides = [1, 1]} : vector<2x512xf32> to vector<2x128xf32>
    %167 = math.tanh %166 : vector<2x128xf32>
    %168 = vector.extract_strided_slice %153 {offsets = [0, 384], sizes = [2, 128], strides = [1, 1]} : vector<2x512xf32> to vector<2x128xf32>
    %169 = arith.negf %168 : vector<2x128xf32>
    %170 = math.exp %169 : vector<2x128xf32>
    %cst_54 = arith.constant 1.000000e+00 : f32
    %171 = vector.broadcast %cst_54 : f32 to vector<2x128xf32>
    %172 = arith.addf %171, %170 : vector<2x128xf32>
    %173 = arith.divf %171, %172 : vector<2x128xf32>
    %174 = arith.mulf %165, %144 : vector<2x128xf32>
    %175 = arith.mulf %159, %167 : vector<2x128xf32>
    %176 = arith.addf %174, %175 : vector<2x128xf32>
    %177 = math.tanh %176 : vector<2x128xf32>
    %178 = arith.mulf %173, %177 : vector<2x128xf32>
    %c5_i32 = arith.constant 5 : i32
    %179 = arith.index_cast %c5_i32 : i32 to index
    %c0_55 = arith.constant 0 : index
    %c0_56 = arith.constant 0 : index
    %180 = vector.load %arg10[%179, %c0_55, %c0_56] : memref<13x2x512xf32, #tpu.memory_space<vmem>>, vector<1x2x512xf32>
    %181 = vector.shape_cast %180 : vector<1x2x512xf32> to vector<2x512xf32>
    %182 = arith.truncf %178 : vector<2x128xf32> to vector<2x128xbf16>
    %c0_57 = arith.constant 0 : index
    %c0_58 = arith.constant 0 : index
    %183 = vector.load %arg5[%c0_57, %c0_58] : memref<128x512xbf16, #tpu.memory_space<vmem>>, vector<128x512xbf16>
    %cst_59 = arith.constant dense<0.000000e+00> : vector<2x512xf32>
    %184 = tpu.matmul %182, %183, %cst_59 {dimension_numbers = #tpu.dot_dimension_numbers<[1], [0], [0], [1], [0, 0, 1, 1], [], []>} : vector<2x128xbf16>, vector<128x512xbf16>, vector<2x512xf32> -> vector<2x512xf32>
    %185 = arith.addf %181, %184 : vector<2x512xf32>
    %186 = vector.extract_strided_slice %185 {offsets = [0, 0], sizes = [2, 128], strides = [1, 1]} : vector<2x512xf32> to vector<2x128xf32>
    %187 = arith.negf %186 : vector<2x128xf32>
    %188 = math.exp %187 : vector<2x128xf32>
    %cst_60 = arith.constant 1.000000e+00 : f32
    %189 = vector.broadcast %cst_60 : f32 to vector<2x128xf32>
    %190 = arith.addf %189, %188 : vector<2x128xf32>
    %191 = arith.divf %189, %190 : vector<2x128xf32>
    %192 = vector.extract_strided_slice %185 {offsets = [0, 128], sizes = [2, 128], strides = [1, 1]} : vector<2x512xf32> to vector<2x128xf32>
    %193 = arith.negf %192 : vector<2x128xf32>
    %194 = math.exp %193 : vector<2x128xf32>
    %cst_61 = arith.constant 1.000000e+00 : f32
    %195 = vector.broadcast %cst_61 : f32 to vector<2x128xf32>
    %196 = arith.addf %195, %194 : vector<2x128xf32>
    %197 = arith.divf %195, %196 : vector<2x128xf32>
    %198 = vector.extract_strided_slice %185 {offsets = [0, 256], sizes = [2, 128], strides = [1, 1]} : vector<2x512xf32> to vector<2x128xf32>
    %199 = math.tanh %198 : vector<2x128xf32>
    %200 = vector.extract_strided_slice %185 {offsets = [0, 384], sizes = [2, 128], strides = [1, 1]} : vector<2x512xf32> to vector<2x128xf32>
    %201 = arith.negf %200 : vector<2x128xf32>
    %202 = math.exp %201 : vector<2x128xf32>
    %cst_62 = arith.constant 1.000000e+00 : f32
    %203 = vector.broadcast %cst_62 : f32 to vector<2x128xf32>
    %204 = arith.addf %203, %202 : vector<2x128xf32>
    %205 = arith.divf %203, %204 : vector<2x128xf32>
    %206 = arith.mulf %197, %176 : vector<2x128xf32>
    %207 = arith.mulf %191, %199 : vector<2x128xf32>
    %208 = arith.addf %206, %207 : vector<2x128xf32>
    %209 = math.tanh %208 : vector<2x128xf32>
    %210 = arith.mulf %205, %209 : vector<2x128xf32>
    %c6_i32 = arith.constant 6 : i32
    %211 = arith.index_cast %c6_i32 : i32 to index
    %c0_63 = arith.constant 0 : index
    %c0_64 = arith.constant 0 : index
    %212 = vector.load %arg10[%211, %c0_63, %c0_64] : memref<13x2x512xf32, #tpu.memory_space<vmem>>, vector<1x2x512xf32>
    %213 = vector.shape_cast %212 : vector<1x2x512xf32> to vector<2x512xf32>
    %214 = arith.truncf %210 : vector<2x128xf32> to vector<2x128xbf16>
    %c0_65 = arith.constant 0 : index
    %c0_66 = arith.constant 0 : index
    %215 = vector.load %arg5[%c0_65, %c0_66] : memref<128x512xbf16, #tpu.memory_space<vmem>>, vector<128x512xbf16>
    %cst_67 = arith.constant dense<0.000000e+00> : vector<2x512xf32>
    %216 = tpu.matmul %214, %215, %cst_67 {dimension_numbers = #tpu.dot_dimension_numbers<[1], [0], [0], [1], [0, 0, 1, 1], [], []>} : vector<2x128xbf16>, vector<128x512xbf16>, vector<2x512xf32> -> vector<2x512xf32>
    %217 = arith.addf %213, %216 : vector<2x512xf32>
    %218 = vector.extract_strided_slice %217 {offsets = [0, 0], sizes = [2, 128], strides = [1, 1]} : vector<2x512xf32> to vector<2x128xf32>
    %219 = arith.negf %218 : vector<2x128xf32>
    %220 = math.exp %219 : vector<2x128xf32>
    %cst_68 = arith.constant 1.000000e+00 : f32
    %221 = vector.broadcast %cst_68 : f32 to vector<2x128xf32>
    %222 = arith.addf %221, %220 : vector<2x128xf32>
    %223 = arith.divf %221, %222 : vector<2x128xf32>
    %224 = vector.extract_strided_slice %217 {offsets = [0, 128], sizes = [2, 128], strides = [1, 1]} : vector<2x512xf32> to vector<2x128xf32>
    %225 = arith.negf %224 : vector<2x128xf32>
    %226 = math.exp %225 : vector<2x128xf32>
    %cst_69 = arith.constant 1.000000e+00 : f32
    %227 = vector.broadcast %cst_69 : f32 to vector<2x128xf32>
    %228 = arith.addf %227, %226 : vector<2x128xf32>
    %229 = arith.divf %227, %228 : vector<2x128xf32>
    %230 = vector.extract_strided_slice %217 {offsets = [0, 256], sizes = [2, 128], strides = [1, 1]} : vector<2x512xf32> to vector<2x128xf32>
    %231 = math.tanh %230 : vector<2x128xf32>
    %232 = vector.extract_strided_slice %217 {offsets = [0, 384], sizes = [2, 128], strides = [1, 1]} : vector<2x512xf32> to vector<2x128xf32>
    %233 = arith.negf %232 : vector<2x128xf32>
    %234 = math.exp %233 : vector<2x128xf32>
    %cst_70 = arith.constant 1.000000e+00 : f32
    %235 = vector.broadcast %cst_70 : f32 to vector<2x128xf32>
    %236 = arith.addf %235, %234 : vector<2x128xf32>
    %237 = arith.divf %235, %236 : vector<2x128xf32>
    %238 = arith.mulf %229, %208 : vector<2x128xf32>
    %239 = arith.mulf %223, %231 : vector<2x128xf32>
    %240 = arith.addf %238, %239 : vector<2x128xf32>
    %241 = math.tanh %240 : vector<2x128xf32>
    %242 = arith.mulf %237, %241 : vector<2x128xf32>
    %c7_i32 = arith.constant 7 : i32
    %243 = arith.index_cast %c7_i32 : i32 to index
    %c0_71 = arith.constant 0 : index
    %c0_72 = arith.constant 0 : index
    %244 = vector.load %arg10[%243, %c0_71, %c0_72] : memref<13x2x512xf32, #tpu.memory_space<vmem>>, vector<1x2x512xf32>
    %245 = vector.shape_cast %244 : vector<1x2x512xf32> to vector<2x512xf32>
    %246 = arith.truncf %242 : vector<2x128xf32> to vector<2x128xbf16>
    %c0_73 = arith.constant 0 : index
    %c0_74 = arith.constant 0 : index
    %247 = vector.load %arg5[%c0_73, %c0_74] : memref<128x512xbf16, #tpu.memory_space<vmem>>, vector<128x512xbf16>
    %cst_75 = arith.constant dense<0.000000e+00> : vector<2x512xf32>
    %248 = tpu.matmul %246, %247, %cst_75 {dimension_numbers = #tpu.dot_dimension_numbers<[1], [0], [0], [1], [0, 0, 1, 1], [], []>} : vector<2x128xbf16>, vector<128x512xbf16>, vector<2x512xf32> -> vector<2x512xf32>
    %249 = arith.addf %245, %248 : vector<2x512xf32>
    %250 = vector.extract_strided_slice %249 {offsets = [0, 0], sizes = [2, 128], strides = [1, 1]} : vector<2x512xf32> to vector<2x128xf32>
    %251 = arith.negf %250 : vector<2x128xf32>
    %252 = math.exp %251 : vector<2x128xf32>
    %cst_76 = arith.constant 1.000000e+00 : f32
    %253 = vector.broadcast %cst_76 : f32 to vector<2x128xf32>
    %254 = arith.addf %253, %252 : vector<2x128xf32>
    %255 = arith.divf %253, %254 : vector<2x128xf32>
    %256 = vector.extract_strided_slice %249 {offsets = [0, 128], sizes = [2, 128], strides = [1, 1]} : vector<2x512xf32> to vector<2x128xf32>
    %257 = arith.negf %256 : vector<2x128xf32>
    %258 = math.exp %257 : vector<2x128xf32>
    %cst_77 = arith.constant 1.000000e+00 : f32
    %259 = vector.broadcast %cst_77 : f32 to vector<2x128xf32>
    %260 = arith.addf %259, %258 : vector<2x128xf32>
    %261 = arith.divf %259, %260 : vector<2x128xf32>
    %262 = vector.extract_strided_slice %249 {offsets = [0, 256], sizes = [2, 128], strides = [1, 1]} : vector<2x512xf32> to vector<2x128xf32>
    %263 = math.tanh %262 : vector<2x128xf32>
    %264 = vector.extract_strided_slice %249 {offsets = [0, 384], sizes = [2, 128], strides = [1, 1]} : vector<2x512xf32> to vector<2x128xf32>
    %265 = arith.negf %264 : vector<2x128xf32>
    %266 = math.exp %265 : vector<2x128xf32>
    %cst_78 = arith.constant 1.000000e+00 : f32
    %267 = vector.broadcast %cst_78 : f32 to vector<2x128xf32>
    %268 = arith.addf %267, %266 : vector<2x128xf32>
    %269 = arith.divf %267, %268 : vector<2x128xf32>
    %270 = arith.mulf %261, %240 : vector<2x128xf32>
    %271 = arith.mulf %255, %263 : vector<2x128xf32>
    %272 = arith.addf %270, %271 : vector<2x128xf32>
    %273 = math.tanh %272 : vector<2x128xf32>
    %274 = arith.mulf %269, %273 : vector<2x128xf32>
    %c8_i32 = arith.constant 8 : i32
    %275 = arith.index_cast %c8_i32 : i32 to index
    %c0_79 = arith.constant 0 : index
    %c0_80 = arith.constant 0 : index
    %276 = vector.load %arg10[%275, %c0_79, %c0_80] : memref<13x2x512xf32, #tpu.memory_space<vmem>>, vector<1x2x512xf32>
    %277 = vector.shape_cast %276 : vector<1x2x512xf32> to vector<2x512xf32>
    %278 = arith.truncf %274 : vector<2x128xf32> to vector<2x128xbf16>
    %c0_81 = arith.constant 0 : index
    %c0_82 = arith.constant 0 : index
    %279 = vector.load %arg5[%c0_81, %c0_82] : memref<128x512xbf16, #tpu.memory_space<vmem>>, vector<128x512xbf16>
    %cst_83 = arith.constant dense<0.000000e+00> : vector<2x512xf32>
    %280 = tpu.matmul %278, %279, %cst_83 {dimension_numbers = #tpu.dot_dimension_numbers<[1], [0], [0], [1], [0, 0, 1, 1], [], []>} : vector<2x128xbf16>, vector<128x512xbf16>, vector<2x512xf32> -> vector<2x512xf32>
    %281 = arith.addf %277, %280 : vector<2x512xf32>
    %282 = vector.extract_strided_slice %281 {offsets = [0, 0], sizes = [2, 128], strides = [1, 1]} : vector<2x512xf32> to vector<2x128xf32>
    %283 = arith.negf %282 : vector<2x128xf32>
    %284 = math.exp %283 : vector<2x128xf32>
    %cst_84 = arith.constant 1.000000e+00 : f32
    %285 = vector.broadcast %cst_84 : f32 to vector<2x128xf32>
    %286 = arith.addf %285, %284 : vector<2x128xf32>
    %287 = arith.divf %285, %286 : vector<2x128xf32>
    %288 = vector.extract_strided_slice %281 {offsets = [0, 128], sizes = [2, 128], strides = [1, 1]} : vector<2x512xf32> to vector<2x128xf32>
    %289 = arith.negf %288 : vector<2x128xf32>
    %290 = math.exp %289 : vector<2x128xf32>
    %cst_85 = arith.constant 1.000000e+00 : f32
    %291 = vector.broadcast %cst_85 : f32 to vector<2x128xf32>
    %292 = arith.addf %291, %290 : vector<2x128xf32>
    %293 = arith.divf %291, %292 : vector<2x128xf32>
    %294 = vector.extract_strided_slice %281 {offsets = [0, 256], sizes = [2, 128], strides = [1, 1]} : vector<2x512xf32> to vector<2x128xf32>
    %295 = math.tanh %294 : vector<2x128xf32>
    %296 = vector.extract_strided_slice %281 {offsets = [0, 384], sizes = [2, 128], strides = [1, 1]} : vector<2x512xf32> to vector<2x128xf32>
    %297 = arith.negf %296 : vector<2x128xf32>
    %298 = math.exp %297 : vector<2x128xf32>
    %cst_86 = arith.constant 1.000000e+00 : f32
    %299 = vector.broadcast %cst_86 : f32 to vector<2x128xf32>
    %300 = arith.addf %299, %298 : vector<2x128xf32>
    %301 = arith.divf %299, %300 : vector<2x128xf32>
    %302 = arith.mulf %293, %272 : vector<2x128xf32>
    %303 = arith.mulf %287, %295 : vector<2x128xf32>
    %304 = arith.addf %302, %303 : vector<2x128xf32>
    %305 = math.tanh %304 : vector<2x128xf32>
    %306 = arith.mulf %301, %305 : vector<2x128xf32>
    %c9_i32 = arith.constant 9 : i32
    %307 = arith.index_cast %c9_i32 : i32 to index
    %c0_87 = arith.constant 0 : index
    %c0_88 = arith.constant 0 : index
    %308 = vector.load %arg10[%307, %c0_87, %c0_88] : memref<13x2x512xf32, #tpu.memory_space<vmem>>, vector<1x2x512xf32>
    %309 = vector.shape_cast %308 : vector<1x2x512xf32> to vector<2x512xf32>
    %310 = arith.truncf %306 : vector<2x128xf32> to vector<2x128xbf16>
    %c0_89 = arith.constant 0 : index
    %c0_90 = arith.constant 0 : index
    %311 = vector.load %arg5[%c0_89, %c0_90] : memref<128x512xbf16, #tpu.memory_space<vmem>>, vector<128x512xbf16>
    %cst_91 = arith.constant dense<0.000000e+00> : vector<2x512xf32>
    %312 = tpu.matmul %310, %311, %cst_91 {dimension_numbers = #tpu.dot_dimension_numbers<[1], [0], [0], [1], [0, 0, 1, 1], [], []>} : vector<2x128xbf16>, vector<128x512xbf16>, vector<2x512xf32> -> vector<2x512xf32>
    %313 = arith.addf %309, %312 : vector<2x512xf32>
    %314 = vector.extract_strided_slice %313 {offsets = [0, 0], sizes = [2, 128], strides = [1, 1]} : vector<2x512xf32> to vector<2x128xf32>
    %315 = arith.negf %314 : vector<2x128xf32>
    %316 = math.exp %315 : vector<2x128xf32>
    %cst_92 = arith.constant 1.000000e+00 : f32
    %317 = vector.broadcast %cst_92 : f32 to vector<2x128xf32>
    %318 = arith.addf %317, %316 : vector<2x128xf32>
    %319 = arith.divf %317, %318 : vector<2x128xf32>
    %320 = vector.extract_strided_slice %313 {offsets = [0, 128], sizes = [2, 128], strides = [1, 1]} : vector<2x512xf32> to vector<2x128xf32>
    %321 = arith.negf %320 : vector<2x128xf32>
    %322 = math.exp %321 : vector<2x128xf32>
    %cst_93 = arith.constant 1.000000e+00 : f32
    %323 = vector.broadcast %cst_93 : f32 to vector<2x128xf32>
    %324 = arith.addf %323, %322 : vector<2x128xf32>
    %325 = arith.divf %323, %324 : vector<2x128xf32>
    %326 = vector.extract_strided_slice %313 {offsets = [0, 256], sizes = [2, 128], strides = [1, 1]} : vector<2x512xf32> to vector<2x128xf32>
    %327 = math.tanh %326 : vector<2x128xf32>
    %328 = vector.extract_strided_slice %313 {offsets = [0, 384], sizes = [2, 128], strides = [1, 1]} : vector<2x512xf32> to vector<2x128xf32>
    %329 = arith.negf %328 : vector<2x128xf32>
    %330 = math.exp %329 : vector<2x128xf32>
    %cst_94 = arith.constant 1.000000e+00 : f32
    %331 = vector.broadcast %cst_94 : f32 to vector<2x128xf32>
    %332 = arith.addf %331, %330 : vector<2x128xf32>
    %333 = arith.divf %331, %332 : vector<2x128xf32>
    %334 = arith.mulf %325, %304 : vector<2x128xf32>
    %335 = arith.mulf %319, %327 : vector<2x128xf32>
    %336 = arith.addf %334, %335 : vector<2x128xf32>
    %337 = math.tanh %336 : vector<2x128xf32>
    %338 = arith.mulf %333, %337 : vector<2x128xf32>
    %c10_i32 = arith.constant 10 : i32
    %339 = arith.index_cast %c10_i32 : i32 to index
    %c0_95 = arith.constant 0 : index
    %c0_96 = arith.constant 0 : index
    %340 = vector.load %arg10[%339, %c0_95, %c0_96] : memref<13x2x512xf32, #tpu.memory_space<vmem>>, vector<1x2x512xf32>
    %341 = vector.shape_cast %340 : vector<1x2x512xf32> to vector<2x512xf32>
    %342 = arith.truncf %338 : vector<2x128xf32> to vector<2x128xbf16>
    %c0_97 = arith.constant 0 : index
    %c0_98 = arith.constant 0 : index
    %343 = vector.load %arg5[%c0_97, %c0_98] : memref<128x512xbf16, #tpu.memory_space<vmem>>, vector<128x512xbf16>
    %cst_99 = arith.constant dense<0.000000e+00> : vector<2x512xf32>
    %344 = tpu.matmul %342, %343, %cst_99 {dimension_numbers = #tpu.dot_dimension_numbers<[1], [0], [0], [1], [0, 0, 1, 1], [], []>} : vector<2x128xbf16>, vector<128x512xbf16>, vector<2x512xf32> -> vector<2x512xf32>
    %345 = arith.addf %341, %344 : vector<2x512xf32>
    %346 = vector.extract_strided_slice %345 {offsets = [0, 0], sizes = [2, 128], strides = [1, 1]} : vector<2x512xf32> to vector<2x128xf32>
    %347 = arith.negf %346 : vector<2x128xf32>
    %348 = math.exp %347 : vector<2x128xf32>
    %cst_100 = arith.constant 1.000000e+00 : f32
    %349 = vector.broadcast %cst_100 : f32 to vector<2x128xf32>
    %350 = arith.addf %349, %348 : vector<2x128xf32>
    %351 = arith.divf %349, %350 : vector<2x128xf32>
    %352 = vector.extract_strided_slice %345 {offsets = [0, 128], sizes = [2, 128], strides = [1, 1]} : vector<2x512xf32> to vector<2x128xf32>
    %353 = arith.negf %352 : vector<2x128xf32>
    %354 = math.exp %353 : vector<2x128xf32>
    %cst_101 = arith.constant 1.000000e+00 : f32
    %355 = vector.broadcast %cst_101 : f32 to vector<2x128xf32>
    %356 = arith.addf %355, %354 : vector<2x128xf32>
    %357 = arith.divf %355, %356 : vector<2x128xf32>
    %358 = vector.extract_strided_slice %345 {offsets = [0, 256], sizes = [2, 128], strides = [1, 1]} : vector<2x512xf32> to vector<2x128xf32>
    %359 = math.tanh %358 : vector<2x128xf32>
    %360 = vector.extract_strided_slice %345 {offsets = [0, 384], sizes = [2, 128], strides = [1, 1]} : vector<2x512xf32> to vector<2x128xf32>
    %361 = arith.negf %360 : vector<2x128xf32>
    %362 = math.exp %361 : vector<2x128xf32>
    %cst_102 = arith.constant 1.000000e+00 : f32
    %363 = vector.broadcast %cst_102 : f32 to vector<2x128xf32>
    %364 = arith.addf %363, %362 : vector<2x128xf32>
    %365 = arith.divf %363, %364 : vector<2x128xf32>
    %366 = arith.mulf %357, %336 : vector<2x128xf32>
    %367 = arith.mulf %351, %359 : vector<2x128xf32>
    %368 = arith.addf %366, %367 : vector<2x128xf32>
    %369 = math.tanh %368 : vector<2x128xf32>
    %370 = arith.mulf %365, %369 : vector<2x128xf32>
    %c11_i32 = arith.constant 11 : i32
    %371 = arith.index_cast %c11_i32 : i32 to index
    %c0_103 = arith.constant 0 : index
    %c0_104 = arith.constant 0 : index
    %372 = vector.load %arg10[%371, %c0_103, %c0_104] : memref<13x2x512xf32, #tpu.memory_space<vmem>>, vector<1x2x512xf32>
    %373 = vector.shape_cast %372 : vector<1x2x512xf32> to vector<2x512xf32>
    %374 = arith.truncf %370 : vector<2x128xf32> to vector<2x128xbf16>
    %c0_105 = arith.constant 0 : index
    %c0_106 = arith.constant 0 : index
    %375 = vector.load %arg5[%c0_105, %c0_106] : memref<128x512xbf16, #tpu.memory_space<vmem>>, vector<128x512xbf16>
    %cst_107 = arith.constant dense<0.000000e+00> : vector<2x512xf32>
    %376 = tpu.matmul %374, %375, %cst_107 {dimension_numbers = #tpu.dot_dimension_numbers<[1], [0], [0], [1], [0, 0, 1, 1], [], []>} : vector<2x128xbf16>, vector<128x512xbf16>, vector<2x512xf32> -> vector<2x512xf32>
    %377 = arith.addf %373, %376 : vector<2x512xf32>
    %378 = vector.extract_strided_slice %377 {offsets = [0, 0], sizes = [2, 128], strides = [1, 1]} : vector<2x512xf32> to vector<2x128xf32>
    %379 = arith.negf %378 : vector<2x128xf32>
    %380 = math.exp %379 : vector<2x128xf32>
    %cst_108 = arith.constant 1.000000e+00 : f32
    %381 = vector.broadcast %cst_108 : f32 to vector<2x128xf32>
    %382 = arith.addf %381, %380 : vector<2x128xf32>
    %383 = arith.divf %381, %382 : vector<2x128xf32>
    %384 = vector.extract_strided_slice %377 {offsets = [0, 128], sizes = [2, 128], strides = [1, 1]} : vector<2x512xf32> to vector<2x128xf32>
    %385 = arith.negf %384 : vector<2x128xf32>
    %386 = math.exp %385 : vector<2x128xf32>
    %cst_109 = arith.constant 1.000000e+00 : f32
    %387 = vector.broadcast %cst_109 : f32 to vector<2x128xf32>
    %388 = arith.addf %387, %386 : vector<2x128xf32>
    %389 = arith.divf %387, %388 : vector<2x128xf32>
    %390 = vector.extract_strided_slice %377 {offsets = [0, 256], sizes = [2, 128], strides = [1, 1]} : vector<2x512xf32> to vector<2x128xf32>
    %391 = math.tanh %390 : vector<2x128xf32>
    %392 = vector.extract_strided_slice %377 {offsets = [0, 384], sizes = [2, 128], strides = [1, 1]} : vector<2x512xf32> to vector<2x128xf32>
    %393 = arith.negf %392 : vector<2x128xf32>
    %394 = math.exp %393 : vector<2x128xf32>
    %cst_110 = arith.constant 1.000000e+00 : f32
    %395 = vector.broadcast %cst_110 : f32 to vector<2x128xf32>
    %396 = arith.addf %395, %394 : vector<2x128xf32>
    %397 = arith.divf %395, %396 : vector<2x128xf32>
    %398 = arith.mulf %389, %368 : vector<2x128xf32>
    %399 = arith.mulf %383, %391 : vector<2x128xf32>
    %400 = arith.addf %398, %399 : vector<2x128xf32>
    %401 = math.tanh %400 : vector<2x128xf32>
    %402 = arith.mulf %397, %401 : vector<2x128xf32>
    %c12_i32 = arith.constant 12 : i32
    %403 = arith.index_cast %c12_i32 : i32 to index
    %c0_111 = arith.constant 0 : index
    %c0_112 = arith.constant 0 : index
    %404 = vector.load %arg10[%403, %c0_111, %c0_112] : memref<13x2x512xf32, #tpu.memory_space<vmem>>, vector<1x2x512xf32>
    %405 = vector.shape_cast %404 : vector<1x2x512xf32> to vector<2x512xf32>
    %406 = arith.truncf %402 : vector<2x128xf32> to vector<2x128xbf16>
    %c0_113 = arith.constant 0 : index
    %c0_114 = arith.constant 0 : index
    %407 = vector.load %arg5[%c0_113, %c0_114] : memref<128x512xbf16, #tpu.memory_space<vmem>>, vector<128x512xbf16>
    %cst_115 = arith.constant dense<0.000000e+00> : vector<2x512xf32>
    %408 = tpu.matmul %406, %407, %cst_115 {dimension_numbers = #tpu.dot_dimension_numbers<[1], [0], [0], [1], [0, 0, 1, 1], [], []>} : vector<2x128xbf16>, vector<128x512xbf16>, vector<2x512xf32> -> vector<2x512xf32>
    %409 = arith.addf %405, %408 : vector<2x512xf32>
    %410 = vector.extract_strided_slice %409 {offsets = [0, 0], sizes = [2, 128], strides = [1, 1]} : vector<2x512xf32> to vector<2x128xf32>
    %411 = arith.negf %410 : vector<2x128xf32>
    %412 = math.exp %411 : vector<2x128xf32>
    %cst_116 = arith.constant 1.000000e+00 : f32
    %413 = vector.broadcast %cst_116 : f32 to vector<2x128xf32>
    %414 = arith.addf %413, %412 : vector<2x128xf32>
    %415 = arith.divf %413, %414 : vector<2x128xf32>
    %416 = vector.extract_strided_slice %409 {offsets = [0, 128], sizes = [2, 128], strides = [1, 1]} : vector<2x512xf32> to vector<2x128xf32>
    %417 = arith.negf %416 : vector<2x128xf32>
    %418 = math.exp %417 : vector<2x128xf32>
    %cst_117 = arith.constant 1.000000e+00 : f32
    %419 = vector.broadcast %cst_117 : f32 to vector<2x128xf32>
    %420 = arith.addf %419, %418 : vector<2x128xf32>
    %421 = arith.divf %419, %420 : vector<2x128xf32>
    %422 = vector.extract_strided_slice %409 {offsets = [0, 256], sizes = [2, 128], strides = [1, 1]} : vector<2x512xf32> to vector<2x128xf32>
    %423 = math.tanh %422 : vector<2x128xf32>
    %424 = vector.extract_strided_slice %409 {offsets = [0, 384], sizes = [2, 128], strides = [1, 1]} : vector<2x512xf32> to vector<2x128xf32>
    %425 = arith.negf %424 : vector<2x128xf32>
    %426 = math.exp %425 : vector<2x128xf32>
    %cst_118 = arith.constant 1.000000e+00 : f32
    %427 = vector.broadcast %cst_118 : f32 to vector<2x128xf32>
    %428 = arith.addf %427, %426 : vector<2x128xf32>
    %429 = arith.divf %427, %428 : vector<2x128xf32>
    %430 = arith.mulf %421, %400 : vector<2x128xf32>
    %431 = arith.mulf %415, %423 : vector<2x128xf32>
    %432 = arith.addf %430, %431 : vector<2x128xf32>
    %433 = math.tanh %432 : vector<2x128xf32>
    %434 = arith.mulf %429, %433 : vector<2x128xf32>
    %c13_i32 = arith.constant 13 : i32
    %c0_119 = arith.constant 0 : index
    %c0_120 = arith.constant 0 : index
    %435 = vector.load %arg7[%c0_119, %c0_120] : memref<128x128xf32, #tpu.memory_space<vmem>>, vector<128x128xf32>
    %cst_121 = arith.constant dense<0.000000e+00> : vector<2x128xf32>
    %436 = tpu.matmul %434, %435, %cst_121 {dimension_numbers = #tpu.dot_dimension_numbers<[1], [0], [0], [1], [0, 0, 1, 1], [], []>} : vector<2x128xf32>, vector<128x128xf32>, vector<2x128xf32> -> vector<2x128xf32>
    %c0_122 = arith.constant 0 : index
    %c0_123 = arith.constant 0 : index
    %437 = vector.load %arg8[%c0_122, %c0_123] : memref<1x128xf32, #tpu.memory_space<vmem>>, vector<1x128xf32>
    %438 = vector.broadcast %437 : vector<1x128xf32> to vector<2x128xf32>
    %439 = arith.addf %436, %438 : vector<2x128xf32>
    %440 = arith.negf %439 : vector<2x128xf32>
    %441 = math.exp %440 : vector<2x128xf32>
    %cst_124 = arith.constant 1.000000e+00 : f32
    %442 = vector.broadcast %cst_124 : f32 to vector<2x128xf32>
    %443 = arith.addf %442, %441 : vector<2x128xf32>
    %444 = arith.divf %442, %443 : vector<2x128xf32>
    %c0_125 = arith.constant 0 : index
    %c0_126 = arith.constant 0 : index
    %445 = vector.load %arg9[%c0_125, %c0_126] : memref<2x128xf32, #tpu.memory_space<vmem>>, vector<2x128xf32>
    tpu.vector_store %arg9[%c0_125, %c0_126], %444 {strides = array<i32>} : memref<2x128xf32, #tpu.memory_space<vmem>>, vector<2x128xf32>,
    return
  }
  func.func @transform_0(%arg0: i32) -> (i32, i32, i32) {
    %c0_i32 = arith.constant 0 : i32
    %c0_i32_0 = arith.constant 0 : i32
    %c0_i32_1 = arith.constant 0 : i32
    return %arg0, %c0_i32, %c0_i32_0 : i32, i32, i32
  }
  func.func @transform_1(%arg0: i32) -> (i32, i32) {
    %c0_i32 = arith.constant 0 : i32
    %c0_i32_0 = arith.constant 0 : i32
    %c0_i32_1 = arith.constant 0 : i32
    return %c0_i32, %c0_i32_0 : i32, i32
  }
  func.func @transform_2(%arg0: i32) -> (i32, i32) {
    %c0_i32 = arith.constant 0 : i32
    %c0_i32_0 = arith.constant 0 : i32
    %c0_i32_1 = arith.constant 0 : i32
    return %c0_i32, %c0_i32_0 : i32, i32
  }
  func.func @transform_3(%arg0: i32) -> (i32, i32) {
    %c0_i32 = arith.constant 0 : i32
    %c0_i32_0 = arith.constant 0 : i32
    %c0_i32_1 = arith.constant 0 : i32
    return %c0_i32, %c0_i32_0 : i32, i32
  }
  func.func @transform_4(%arg0: i32) -> (i32, i32) {
    %c0_i32 = arith.constant 0 : i32
    %c0_i32_0 = arith.constant 0 : i32
    %c0_i32_1 = arith.constant 0 : i32
    return %c0_i32, %c0_i32_0 : i32, i32
  }
  func.func @transform_5(%arg0: i32) -> (i32, i32) {
    %c0_i32 = arith.constant 0 : i32
    %c0_i32_0 = arith.constant 0 : i32
    %c0_i32_1 = arith.constant 0 : i32
    return %c0_i32, %c0_i32_0 : i32, i32
  }
  func.func @transform_6(%arg0: i32) -> (i32, i32) {
    %c0_i32 = arith.constant 0 : i32
    %c0_i32_0 = arith.constant 0 : i32
    %c0_i32_1 = arith.constant 0 : i32
    return %c0_i32, %c0_i32_0 : i32, i32
  }
  func.func @transform_7(%arg0: i32) -> (i32, i32) {
    %c0_i32 = arith.constant 0 : i32
    %c0_i32_0 = arith.constant 0 : i32
    %c0_i32_1 = arith.constant 0 : i32
    return %c0_i32, %c0_i32_0 : i32, i32
  }
  func.func @transform_8(%arg0: i32) -> (i32, i32) {
    %c0_i32 = arith.constant 0 : i32
    %c0_i32_0 = arith.constant 0 : i32
    return %arg0, %c0_i32 : i32, i32
  }
}

</mosaic_0001>

<bundles_post_ra>
// kernel: tpu_custom_call.1
= control target key start
LH: loop header
LB: loop body
LE: loop exit
PB: predicated region body
PF: predicated region fallthrough
CT: control target
= control target key end

     0   :  { %13 = vsyncpa [#allocation5], 0  ;;  %s4505_s0 = inlined_call_operand.vmem [shape: f32[2,13,1024], index: 0, kind: input, shape index: {}]   ;;  %s4506_s1 = inlined_call_operand.vmem [shape: bf16[128,128], index: 1, kind: input, shape index: {}]   ;;  %s4507_s2 = inlined_call_operand.vmem [shape: f32[1,128], index: 2, kind: input, shape index: {}]   ;;  %s4508_s3 = inlined_call_operand.vmem [shape: bf16[128,512], index: 3, kind: input, shape index: {}]   ;;  %s4509_s4 = inlined_call_operand.hbm [shape: bf16[128,512], index: 4, kind: input, shape index: {}]   ;;  %s4510_s5 = inlined_call_operand.vmem [shape: f32[1,512], index: 5, kind: input, shape index: {}]   ;;  %s4511_s6 = inlined_call_operand.vmem [shape: f32[128,128], index: 6, kind: input, shape index: {}]   ;;  %s4512_s7 = inlined_call_operand.vmem [shape: f32[1,128], index: 7, kind: input, shape index: {}]   ;;  %s4513_s8 = inlined_call_operand.hbm [shape: f32[2,128], index: 8, kind: output, shape index: {}]  }
   0x1   :  { %14 = vsyncpa [#allocation6], 0  ;;  %v51_v0 = vld [vmem:[%s4505_s0] sm:$0xff]  ;;  %s72_s11 = sshll.u32 %s4509_s4, 4  ;;  %s3440_s16 = smov [#allocation4]   ;;  %s73_s11 = int_to_ptr.hbm [resolvable:$true] %s72_s11 }
   0x2   :  { %v53_v1 = vld [vmem:[%s4505_s0 + $0x40] sm:$0xff]  ;;  %52 = vst [vmem:[#allocation3 + $0x10] sm:$0xff] %v51_v0  ;;  %s74_s17 = sshll.u32 %s3440_s16, 4  ;;  %s3441_s18 = smov 256   ;;  %s75_s17 = int_to_ptr.vmem [resolvable:$true] %s74_s17 }
   0x3   :  { %v55_v2 = vld [vmem:[%s4505_s0 + $0x80] sm:$0xff]  ;;  %54 = vst [vmem:[#allocation3] sm:$0xff] %v53_v1  ;;  %s3442_s19 = smov 16  }
   0x4   :  { %v57_v3 = vld [vmem:[%s4505_s0 + $0xc0] sm:$0xff]  ;;  %56 = vst [vmem:[#allocation3 + $0x18] sm:$0xff] %v55_v2 }
   0x5   :  { %58 = vst [vmem:[#allocation3 + $0x8] sm:$0xff] %v57_v3  ;;  %80 = dma.hbm_to_vmem [thread:$0]  %s73_s11, 4096, %s75_s17, [#allocation5], %s3441_s18, %s3441_s18, %s3442_s19  }
   0x6   :  { %3436 = dma.done.wait [#allocation5], 4096  }
   0x7   :  { %3437 = vsyncadd [#allocation5], 4294963200  ;;  %v3443_v4 = vmov 1983009808   ;;  %v3094_v7 = vld [vmem:[%s4506_s1 + $0x38] sm:$0xff]  ;;  %v3093_v10 = vld [vmem:[%s4506_s1 + $0x30] sm:$0xff] }
   0x8   :  { %v102_v5 = vunpack.c.l.s4 %v3443_v4  ;;  %v3444_v8 = vmov 1934713408   ;;  %296 = vmatpush.bf16.msra.mxu0 %v3094_v7  ;;  %vm99_vm0 = vcmask 1047556   ;;  %v3092_v24 = vld [vmem:[%s4506_s1 + $0x28] sm:$0xff]  ;;  %v3091_v39 = vld [vmem:[%s4506_s1 + $0x20] sm:$0xff]  ;;  %v3090_v54 = vld [vmem:[%s4506_s1 + $0x18] sm:$0xff] }
   0x9   :  { %v124_v9 = vunpack.c.l.s4 %v3444_v8  ;;  %v94_v11 = vld [vmem:[#allocation3 + $0x10] sm:$0xff]  ;;  %v3089_v58 = vld [vmem:[%s4506_s1 + $0x10] sm:$0xff]  ;;  %v2905_v63 = vld [vmem:[%s4508_s3 + $0xe0] sm:$0xf]  ;;  %vm629_vm1 = vcmask 1045508   ;;  %vm633_vm2 = vcmask 1043458  }
   0xa   :  { %v103_v6 = vunpack.c.0.s8 %v102_v5  ;;  %v95_v12 = vld [vmem:[#allocation3] sm:$0x1f]  ;;  %v98_v15 = vrot.slane %v94_v11, 4  ;;  %v3125_v0 = vld [vmem:[%s4508_s3 + $0xec] sm:$0xf0]  ;;  %vm635_vm3 = vcmask 1045504  }
   0xb   :  { %v96_v13 = vld [vmem:[#allocation3 + $0x18] sm:$0xff]  ;;  %v3513_v19 = vunpack.c.0.s8 %v124_v9  ;;  %v155_v42 = vrot.slane %v95_v12, 4  ;;  %v2906_v1 = vor.u32 %v3125_v0, %v2905_v63  ;;  %v2907_v3 = vld [vmem:[%s4508_s3 + $0xf0] sm:$0xf0]  ;;  %v3126_v7 = vld [vmem:[%s4508_s3 + $0xf4] sm:$0xf0] }
   0xc   :  { %v97_v14 = vld [vmem:[#allocation3 + $0x8] sm:$0x1f]  ;;  %v104_v16 = vperm.slane %v94_v11, %v103_v6  ;;  %v109_v17 = vrot.slane %v96_v13, 4  ;;  %v114_v18 = vperm.slane %v96_v13, %v103_v6  ;;  %v154_v20 = vperm.slane %v95_v12, %v103_v6  ;;  %297 = vmatpush.bf16.msra.mxu0 %v3093_v10  ;;  %v3123_v2 = vld [vmem:[%s4508_s3 + $0xe4] sm:$0xf]  ;;  %v3088_v8 = vld [vmem:[%s4506_s1 + $0x8] sm:$0xff] }
   0xd   :  { %v100_v21 = vsel %vm99_vm0, 0.0, %v98_v15  ;;  %v160_v23 = vperm.slane %v97_v14, %v103_v6  ;;  %v161_v30 = vrot.slane %v97_v14, 4  ;;  %v156_v60 = vsel %vm99_vm0, 0.0, %v155_v42  ;;  %523 = vmatpush.bf16.msra.mxu1 %v2906_v1  ;;  %v2889_v11 = vld [vmem:[%s4508_s3 + $0xc0] sm:$0xf]  ;;  %s3446_s0 = smov [#allocation7]  }
   0xe   :  { %v121_v22 = vrot.slane %v104_v16, 4  ;;  %v108_v25 = vperm.slane %v100_v21, %v103_v6  ;;  %v110_v26 = vsel %vm99_vm0, 0.0, %v109_v17  ;;  %v119_v27 = vrot.slane %v114_v18, 4  ;;  %v3121_v12 = vld [vmem:[%s4508_s3 + $0xcc] sm:$0xf0]  ;;  %s2743_s21 = sshll.u32 %s3446_s0, 4  ;;  %s2744_s21 = int_to_ptr.vmem [resolvable:$true] %s2743_s21 }
   0xf   :  { %v118_v28 = vperm.slane %v110_v26, %v103_v6  ;;  %v163_v31 = vrot.slane %v160_v23, 4  ;;  %v165_v35 = vrot.slane %v154_v20, 4  ;;  %v162_v47 = vsel %vm99_vm0, 0.0, %v161_v30  ;;  %v2913_v6 = vld [vmem:[%s4508_s3 + $0xe8] sm:$0xf]  ;;  %v3087_v26 = vld [vmem:[%s4506_s1] sm:$0xff] }
  0x10   :  { %v122_v29 = vsel %vm99_vm0, %v114_v18, %v121_v22  ;;  %v120_v32 = vsel %vm99_vm0, %v119_v27, %v104_v16  ;;  %v133_v34 = vrot.slane %v108_v25, 4  ;;  %298 = vmatpush.bf16.msra.mxu0 %v3092_v24  ;;  %v175_v57 = vrot.slane %v162_v47, 4  ;;  %v3119_v16 = vld [vmem:[%s4508_s3 + $0xc4] sm:$0xf]  ;;  %v2891_v18 = vld [vmem:[%s4508_s3 + $0xd0] sm:$0xf0] }
  0x11   :  { %v130_v33 = vperm.slane %v122_v29, %v3513_v19  ;;  %v126_v36 = vperm.slane %v120_v32, %v3513_v19  ;;  %v131_v37 = vrot.slane %v118_v28, 4  ;;  %v164_v38 = vsel %vm99_vm0, %v163_v31, %v154_v20  ;;  %v2897_v20 = vld [vmem:[%s4508_s3 + $0xc8] sm:$0xf]  ;;  %v3124_v21 = vld [vmem:[%s4508_s3 + $0xec] sm:$0xf] }
  0x12   :  { %v134_v40 = vsel %vm99_vm0, %v118_v28, %v133_v34  ;;  %v166_v43 = vsel %vm99_vm0, %v160_v23, %v165_v35  ;;  %v170_v50 = vperm.slane %v164_v38, %v3513_v19  ;;  %v176_v4 = vsel %vm99_vm0, %v175_v57, %v156_v60  ;;  %v2915_v23 = vld [vmem:[%s4508_s3 + $0xf8] sm:$0xf0]  ;;  %v3117_v28 = vld [vmem:[%s4508_s3 + $0xac] sm:$0xf0]  ;;  %v3115_v29 = vld [vmem:[%s4508_s3 + $0xa4] sm:$0xf] }
  0x13   :  { %v145_v41 = vrot.slane %v130_v33, 4  ;;  %202 = vst [vmem:[#allocation1 + $0x2] ss:$4 sm:$0xff] %v130_v33  ;;  %v132_v44 = vsel %vm99_vm0, %v131_v37, %v108_v25  ;;  %v142_v45 = vperm.slane %v134_v40, %v3513_v19  ;;  %v143_v46 = vrot.slane %v126_v36, 4  ;;  %v2873_v25 = vld [vmem:[%s4508_s3 + $0xa0] sm:$0xf] }
  0x14   :  { %198 = vst [vmem:[#allocation1] ss:$4 sm:$0xff] %v126_v36  ;;  %v138_v48 = vperm.slane %v132_v44, %v3513_v19  ;;  %v174_v51 = vperm.slane %v166_v43, %v3513_v19  ;;  %299 = vmatpush.bf16.msra.mxu0 %v3091_v39  ;;  %v177_v61 = vrot.slane %v170_v50, 4  ;;  %v2910_v5 = vor.u32 %v3123_v2, %v2907_v3  ;;  %v2875_v32 = vld [vmem:[%s4508_s3 + $0xb0] sm:$0xf0] }
  0x15   :  { %v146_v49 = vsel %vm99_vm0, 0.0, %v145_v41  ;;  %v144_v52 = vsel %vm99_vm0, 0.0, %v143_v46  ;;  %v149_v53 = vrot.slane %v142_v45, 4  ;;  %210 = vst [vmem:[#allocation1 + $0x22] ss:$4 sm:$0xff] %v142_v45  ;;  %v2914_v10 = vor.u32 %v3126_v7, %v2913_v6 }
  0x16   :  { %204 = vst [vmem:[#allocation1 + $0x3] ss:$4 sm:$0xff] %v146_v49  ;;  %v147_v55 = vrot.slane %v138_v48, 4  ;;  %v179_v62 = vrot.slane %v174_v51, 4  ;;  %v178_v9 = vsel %vm99_vm0, 0.0, %v177_v61  ;;  %542 = vmatpush.bf16.msra.mxu2 %v2910_v5  ;;  %v2890_v15 = vor.u32 %v3121_v12, %v2889_v11 }
  0x17   :  { %200 = vst [vmem:[#allocation1 + $0x1] ss:$4 sm:$0xff] %v144_v52  ;;  %v150_v56 = vsel %vm99_vm0, 0.0, %v149_v53  ;;  %v184_v17 = vperm.slane %v176_v4, %v3513_v19  ;;  %561 = vmatpush.bf16.msra.mxu3 %v2914_v10  ;;  %v2894_v22 = vor.u32 %v3119_v16, %v2891_v18  ;;  %v3122_v19 = vld [vmem:[%s4508_s3 + $0xd4] sm:$0xf0]  ;;  %v2918_v30 = vor.u32 %v3124_v21, %v2915_v23 }
  0x18   :  { %206 = vst [vmem:[#allocation1 + $0x20] ss:$4 sm:$0xff] %v138_v48  ;;  %v148_v59 = vsel %vm99_vm0, 0.0, %v147_v55  ;;  %300 = vmatpush.bf16.msra.mxu0 %v3090_v54  ;;  %v180_v13 = vsel %vm99_vm0, 0.0, %v179_v62  ;;  %524 = vmatpush.bf16.msra.mxu1 %v2890_v15  ;;  %v2898_v24 = vor.u32 %v3122_v19, %v2897_v20  ;;  %v2874_v31 = vor.u32 %v3117_v28, %v2873_v25  ;;  %v2881_v33 = vld [vmem:[%s4508_s3 + $0xa8] sm:$0xf] }
  0x19   :  { %208 = vst [vmem:[#allocation1 + $0x21] ss:$4 sm:$0xff] %v148_v59  ;;  %v3118_v34 = vld [vmem:[%s4508_s3 + $0xb4] sm:$0xf0]  ;;  %v3120_v35 = vld [vmem:[%s4508_s3 + $0xcc] sm:$0xf]  ;;  %v2878_v37 = vor.u32 %v3115_v29, %v2875_v32 }
  0x1a   :  { %212 = vst [vmem:[#allocation1 + $0x23] ss:$4 sm:$0xff] %v150_v56  ;;  %543 = vmatpush.bf16.msra.mxu2 %v2894_v22  ;;  %v2899_v36 = vld [vmem:[%s4508_s3 + $0xd8] sm:$0xf0]  ;;  %v2882_v38 = vor.u32 %v3118_v34, %v2881_v33  ;;  %v3116_v41 = vld [vmem:[%s4508_s3 + $0xac] sm:$0xf] }
  0x1b   :  { %562 = vmatpush.bf16.msra.mxu3 %v2898_v24  ;;  %v2902_v40 = vor.u32 %v3120_v35, %v2899_v36  ;;  %v2883_v42 = vld [vmem:[%s4508_s3 + $0xb8] sm:$0xf0]  ;;  %v2857_v47 = vld [vmem:[%s4508_s3 + $0x80] sm:$0xf]  ;;  %v3113_v48 = vld [vmem:[%s4508_s3 + $0x8c] sm:$0xf0] }
  0x1c   :  { %301 = vmatpush.bf16.msra.mxu0 %v3089_v58  ;;  %525 = vmatpush.bf16.msra.mxu1 %v2874_v31  ;;  %v2886_v43 = vor.u32 %v3116_v41, %v2883_v42  ;;  %v3111_v49 = vld [vmem:[%s4508_s3 + $0x84] sm:$0xf]  ;;  %v2865_v52 = vld [vmem:[%s4508_s3 + $0x88] sm:$0xf]  ;;  %v3114_v53 = vld [vmem:[%s4508_s3 + $0x94] sm:$0xf0] }
  0x1d   :  { %v2866_v55 = vor.u32 %v3114_v53, %v2865_v52  ;;  %v3112_v56 = vld [vmem:[%s4508_s3 + $0x8c] sm:$0xf]  ;;  %v2867_v57 = vld [vmem:[%s4508_s3 + $0x98] sm:$0xf0]  ;;  %v2841_v59 = vld [vmem:[%s4508_s3 + $0x60] sm:$0xf] }
  0x1e   :  { %v213_v14 = vld.sshfl [vmem:[#allocation1] sm:$0xff pattern:$0x73625140]  ;;  %544 = vmatpush.bf16.msra.mxu2 %v2878_v37  ;;  %v2870_v58 = vor.u32 %v3112_v56, %v2867_v57  ;;  %v3109_v60 = vld [vmem:[%s4508_s3 + $0x6c] sm:$0xf0]  ;;  %vm627_vm4 = vcmask 1041408  }
  0x1f   :  { %215 = vst [vmem:[#allocation1] ss:$4 sm:$0xff] %v170_v50  ;;  %563 = vmatpush.bf16.msra.mxu3 %v2882_v38  ;;  %v2858_v50 = vor.u32 %v3113_v48, %v2857_v47  ;;  %v3107_v61 = vld [vmem:[%s4508_s3 + $0x64] sm:$0xf]  ;;  %v2842_v62 = vor.u32 %v3109_v60, %v2841_v59  ;;  %v2843_v63 = vld [vmem:[%s4508_s3 + $0x70] sm:$0xf0] }
  0x20   :  { %216 = vst [vmem:[#allocation1 + $0x1] ss:$4 sm:$0xff] %v178_v9  ;;  %302 = vmatpush.bf16.msra.mxu0 %v3088_v8  ;;  %v2849_v0 = vld [vmem:[%s4508_s3 + $0x68] sm:$0xf]  ;;  %v3110_v1 = vld [vmem:[%s4508_s3 + $0x74] sm:$0xf0]  ;;  %v2846_v2 = vor.u32 %v3107_v61, %v2843_v63 }
  0x21   :  { %217 = vst [vmem:[#allocation1 + $0x2] ss:$4 sm:$0xff] %v174_v51  ;;  %v214_v27 = vld.sshfl [vmem:[#allocation1 + $0x20] sm:$0xff pattern:$0x73625140]  ;;  %526 = vmatpush.bf16.msra.mxu1 %v2858_v50  ;;  %v2850_v3 = vor.u32 %v3110_v1, %v2849_v0  ;;  %vm631_vm5 = vcmask 1043456  }
  0x22   :  { %218 = vst [vmem:[#allocation1 + $0x3] ss:$4 sm:$0xff] %v180_v13  ;;  %v226_v39 = vpack.c.bf16 %v214_v27, %v213_v14  ;;  %v2859_v51 = vld [vmem:[%s4508_s3 + $0x90] sm:$0xf0]  ;;  %v3108_v4 = vld [vmem:[%s4508_s3 + $0x6c] sm:$0xf] }
  0x23   :  { %219 = vst [vmem:[#allocation1 + $0x20] ss:$4 sm:$0xff] %v184_v17  ;;  %v2862_v54 = vor.u32 %v3111_v49, %v2859_v51  ;;  %564 = vmatpush.bf16.msra.mxu3 %v2866_v55  ;;  %v2851_v5 = vld [vmem:[%s4508_s3 + $0x78] sm:$0xf0]  ;;  %v2825_v7 = vld [vmem:[%s4508_s3 + $0x40] sm:$0xf] }
  0x24   :  { %303 = vmatpush.bf16.msra.mxu0 %v3087_v26  ;;  %v2854_v6 = vor.u32 %v3108_v4, %v2851_v5  ;;  %v3105_v8 = vld [vmem:[%s4508_s3 + $0x4c] sm:$0xf0]  ;;  %v3103_v9 = vld [vmem:[%s4508_s3 + $0x44] sm:$0xf]  ;;  %v2827_v11 = vld [vmem:[%s4508_s3 + $0x50] sm:$0xf0] }
  0x25   :  { %545 = vmatpush.bf16.msra.mxu2 %v2862_v54  ;;  %527 = vmatpush.bf16.msra.mxu1 %v2842_v62  ;;  %v2826_v10 = vor.u32 %v3105_v8, %v2825_v7  ;;  %v2833_v12 = vld [vmem:[%s4508_s3 + $0x48] sm:$0xf]  ;;  %v3106_v13 = vld [vmem:[%s4508_s3 + $0x54] sm:$0xf0]  ;;  %v2830_v14 = vor.u32 %v3103_v9, %v2827_v11  ;;  %v3104_v16 = vld [vmem:[%s4508_s3 + $0x4c] sm:$0xf] }
  0x26   :  { %v2834_v15 = vor.u32 %v3106_v13, %v2833_v12  ;;  %v2835_v17 = vld [vmem:[%s4508_s3 + $0x58] sm:$0xf0]  ;;  %v2809_v20 = vld [vmem:[%s4508_s3 + $0x20] sm:$0xf]  ;;  %v3101_v21 = vld [vmem:[%s4508_s3 + $0x2c] sm:$0xf0] }
  0x27   :  { %304 = vmatmul.bf16.vlgmr.msra.gmra.mxu0 %v226_v39  ;;  %565 = vmatpush.bf16.msra.mxu3 %v2850_v3  ;;  %v2838_v18 = vor.u32 %v3104_v16, %v2835_v17  ;;  %v3099_v22 = vld [vmem:[%s4508_s3 + $0x24] sm:$0xf]  ;;  %v2810_v19 = vor.u32 %v3101_v21, %v2809_v20  ;;  %v2811_v23 = vld [vmem:[%s4508_s3 + $0x30] sm:$0xf0]  ;;  %v2817_v24 = vld [vmem:[%s4508_s3 + $0x28] sm:$0xf] }
  0x28   :  { %580 = vmatpush.bf16.msrb.mxu0 %v2918_v30  ;;  %v3102_v25 = vld [vmem:[%s4508_s3 + $0x34] sm:$0xf0]  ;;  %v2814_v26 = vor.u32 %v3099_v22, %v2811_v23  ;;  %v3100_v28 = vld [vmem:[%s4508_s3 + $0x2c] sm:$0xf]  ;;  %v2819_v29 = vld [vmem:[%s4508_s3 + $0x38] sm:$0xf0] }
  0x29   :  { %v220_v44 = vld.sshfl [vmem:[#allocation1] sm:$0xff pattern:$0x73625140]  ;;  %546 = vmatpush.bf16.msra.mxu2 %v2846_v2  ;;  %528 = vmatpush.bf16.msra.mxu1 %v2826_v10  ;;  %v2818_v27 = vor.u32 %v3102_v25, %v2817_v24  ;;  %v2822_v30 = vor.u32 %v3100_v28, %v2819_v29  ;;  %v3097_v32 = vld [vmem:[%s4508_s3 + $0xc] sm:$0xf0]  ;;  %vm637_vm6 = vcmask 1045506  }
  0x2a   :  { %v221_v45 = vld.sshfl [vmem:[#allocation1 + $0x20] sm:$0xff pattern:$0x73625140]  ;;  %v2795_v35 = vld [vmem:[%s4508_s3 + $0x10] sm:$0xf0] }
  0x2b   :  { %v227_v46 = vpack.c.bf16 %v221_v45, %v220_v44  ;;  %566 = vmatpush.bf16.msra.mxu3 %v2834_v15  ;;  %v2793_v31 = vld [vmem:[%s4508_s3] sm:$0xf]  ;;  %v3095_v33 = vld [vmem:[%s4508_s3 + $0x4] sm:$0xf]  ;;  %v2801_v36 = vld [vmem:[%s4508_s3 + $0x8] sm:$0xf] }
  0x2c   :  { %581 = vmatpush.bf16.msrb.mxu0 %v2902_v40  ;;  %v2794_v34 = vor.u32 %v3097_v32, %v2793_v31  ;;  %v3098_v37 = vld [vmem:[%s4508_s3 + $0x14] sm:$0xf0]  ;;  %v2798_v38 = vor.u32 %v3095_v33, %v2795_v35  ;;  %v3096_v40 = vld [vmem:[%s4508_s3 + $0xc] sm:$0xf]  ;;  %v2803_v41 = vld [vmem:[%s4508_s3 + $0x18] sm:$0xf0] }
  0x2d   :  { %547 = vmatpush.bf16.msra.mxu2 %v2830_v14  ;;  %529 = vmatpush.bf16.msra.mxu1 %v2810_v19  ;;  %v2802_v39 = vor.u32 %v3098_v37, %v2801_v36  ;;  %v2806_v42 = vor.u32 %v3096_v40, %v2803_v41  ;;  %v3035_v44 = vld [vmem:[#allocation4 + $0xf0] sm:$0xf0]  ;;  %v3041_v45 = vld [vmem:[#allocation4 + $0xe8] sm:$0xf]  ;;  %v3158_v47 = vld [vmem:[#allocation4 + $0xf4] sm:$0xf0] }
  0x2e   :  { %v3033_v48 = vld [vmem:[#allocation4 + $0xe0] sm:$0xf]  ;;  %v3157_v49 = vld [vmem:[#allocation4 + $0xec] sm:$0xf0]  ;;  %v3751_v50 = vor.u32 %v3158_v47, %v3041_v45  ;;  %v3156_v52 = vld [vmem:[#allocation4 + $0xec] sm:$0xf] }
  0x2f   :  { %567 = vmatpush.bf16.msra.mxu3 %v2818_v27  ;;  %v3753_v51 = vor.u32 %v3157_v49, %v3033_v48  ;;  %v3043_v53 = vld [vmem:[#allocation4 + $0xf8] sm:$0xf0]  ;;  %v3151_v55 = vld [vmem:[#allocation4 + $0xc4] sm:$0xf]  ;;  %v3019_v56 = vld [vmem:[#allocation4 + $0xd0] sm:$0xf0] }
  0x30   :  { %582 = vmatpush.bf16.msrb.mxu0 %v2886_v43  ;;  %v3155_v43 = vld [vmem:[#allocation4 + $0xe4] sm:$0xf]  ;;  %v3756_v54 = vor.u32 %v3156_v52, %v3043_v53  ;;  %v3025_v57 = vld [vmem:[#allocation4 + $0xc8] sm:$0xf]  ;;  %v3154_v59 = vld [vmem:[#allocation4 + $0xd4] sm:$0xf0] }
  0x31   :  { %548 = vmatpush.bf16.msra.mxu2 %v2814_v26  ;;  %530 = vmatpush.bf16.msra.mxu1 %v2794_v34  ;;  %v3017_v60 = vld [vmem:[#allocation4 + $0xc0] sm:$0xf]  ;;  %v3153_v61 = vld [vmem:[#allocation4 + $0xcc] sm:$0xf0]  ;;  %v3763_v62 = vor.u32 %v3154_v59, %v3025_v57  ;;  %v3152_v0 = vld [vmem:[#allocation4 + $0xcc] sm:$0xf] }
  0x32   :  { %v3765_v63 = vor.u32 %v3153_v61, %v3017_v60  ;;  %v3027_v1 = vld [vmem:[#allocation4 + $0xd8] sm:$0xf0]  ;;  %v3147_v3 = vld [vmem:[#allocation4 + $0xa4] sm:$0xf]  ;;  %v3003_v4 = vld [vmem:[#allocation4 + $0xb0] sm:$0xf0] }
  0x33   :  { %568 = vmatpush.bf16.msra.mxu3 %v2802_v39  ;;  %v3768_v2 = vor.u32 %v3152_v0, %v3027_v1  ;;  %v3009_v5 = vld [vmem:[#allocation4 + $0xa8] sm:$0xf]  ;;  %v3150_v7 = vld [vmem:[#allocation4 + $0xb4] sm:$0xf0]  ;;  %v3001_v8 = vld [vmem:[#allocation4 + $0xa0] sm:$0xf] }
  0x34   :  { %583 = vmatpush.bf16.msrb.mxu0 %v2870_v58  ;;  %v3761_v58 = vor.u32 %v3151_v55, %v3019_v56  ;;  %v3149_v9 = vld [vmem:[#allocation4 + $0xac] sm:$0xf0]  ;;  %v3775_v10 = vor.u32 %v3150_v7, %v3009_v5  ;;  %v3148_v12 = vld [vmem:[#allocation4 + $0xac] sm:$0xf]  ;;  %v3011_v13 = vld [vmem:[#allocation4 + $0xb8] sm:$0xf0] }
  0x35   :  { %549 = vmatpush.bf16.msra.mxu2 %v2798_v38  ;;  %900 = vmatpush.bf16.msrb.mxu1 %v3753_v51  ;;  %v3777_v11 = vor.u32 %v3149_v9, %v3001_v8  ;;  %v3143_v14 = vld [vmem:[#allocation4 + $0x84] sm:$0xf]  ;;  %v3780_v15 = vor.u32 %v3148_v12, %v3011_v13  ;;  %v2987_v16 = vld [vmem:[#allocation4 + $0x90] sm:$0xf0]  ;;  %v2993_v17 = vld [vmem:[#allocation4 + $0x88] sm:$0xf] }
  0x36   :  { %v3784_v20 = vor.u32 %v3143_v14, %v2987_v16  ;;  %v2985_v22 = vld [vmem:[#allocation4 + $0x80] sm:$0xf]  ;;  %v3145_v19 = vld [vmem:[#allocation4 + $0x8c] sm:$0xf0]  ;;  %v3144_v23 = vld [vmem:[#allocation4 + $0x8c] sm:$0xf] }
  0x37   :  { %309 = vmatmul.bf16.gmra.mxu0 %v227_v46  ;;  %v3749_v46 = vor.u32 %v3155_v43, %v3035_v44  ;;  %926 = vmatpush.bf16.msrb.mxu3 %v3751_v50  ;;  %v3789_v25 = vor.u32 %v3145_v19, %v2985_v22  ;;  %v2995_v26 = vld [vmem:[#allocation4 + $0x98] sm:$0xf0]  ;;  %v3796_v28 = vld [vmem:[%s4507_s2] ss:$0 sm:$0xff]  ;;  %v3139_v29 = vld [vmem:[#allocation4 + $0x64] sm:$0xf] }
  0x38   :  { %584 = vmatpush.bf16.msrb.mxu0 %v2854_v6  ;;  %v3773_v6 = vor.u32 %v3147_v3, %v3003_v4  ;;  %v3791_v27 = vor.u32 %v3144_v23, %v2995_v26  ;;  %v2977_v31 = vld [vmem:[#allocation4 + $0x68] sm:$0xf]  ;;  %v3142_v33 = vld [vmem:[#allocation4 + $0x74] sm:$0xf0]  ;;  %v2969_v34 = vld [vmem:[#allocation4 + $0x60] sm:$0xf] }
  0x39   :  { %913 = vmatpush.bf16.msrb.mxu2 %v3749_v46  ;;  %901 = vmatpush.bf16.msrb.mxu1 %v3765_v63  ;;  %v3141_v35 = vld [vmem:[#allocation4 + $0x6c] sm:$0xf0]  ;;  %v3804_v36 = vor.u32 %v3142_v33, %v2977_v31  ;;  %v3140_v38 = vld [vmem:[#allocation4 + $0x6c] sm:$0xf]  ;;  %v2979_v39 = vld [vmem:[#allocation4 + $0x78] sm:$0xf0] }
  0x3a   :  { %v3806_v37 = vor.u32 %v3141_v35, %v2969_v34  ;;  %v3135_v40 = vld [vmem:[#allocation4 + $0x44] sm:$0xf]  ;;  %v2955_v43 = vld [vmem:[#allocation4 + $0x50] sm:$0xf0]  ;;  %v2961_v44 = vld [vmem:[#allocation4 + $0x48] sm:$0xf] }
  0x3b   :  { %927 = vmatpush.bf16.msrb.mxu3 %v3763_v62  ;;  %v3138_v45 = vld [vmem:[#allocation4 + $0x54] sm:$0xf0]  ;;  %v3814_v47 = vor.u32 %v3135_v40, %v2955_v43  ;;  %v2953_v49 = vld [vmem:[#allocation4 + $0x40] sm:$0xf]  ;;  %v3137_v52 = vld [vmem:[#allocation4 + $0x4c] sm:$0xf0] }
  0x3c   :  { %585 = vmatpush.bf16.msrb.mxu0 %v2838_v18  ;;  %v3146_v18 = vld [vmem:[#allocation4 + $0x94] sm:$0xf0]  ;;  %v3816_v48 = vor.u32 %v3138_v45, %v2961_v44  ;;  %v3136_v53 = vld [vmem:[#allocation4 + $0x4c] sm:$0xf]  ;;  %v3819_v56 = vor.u32 %v3137_v52, %v2953_v49  ;;  %v2963_v57 = vld [vmem:[#allocation4 + $0x58] sm:$0xf0] }
  0x3d   :  { %914 = vmatpush.bf16.msrb.mxu2 %v3761_v58  ;;  %902 = vmatpush.bf16.msrb.mxu1 %v3777_v11  ;;  %v3786_v21 = vor.u32 %v3146_v18, %v2993_v17  ;;  %v3131_v59 = vld [vmem:[#allocation4 + $0x24] sm:$0xf]  ;;  %v2939_v60 = vld [vmem:[#allocation4 + $0x30] sm:$0xf0]  ;;  %v3822_v0 = vor.u32 %v3136_v53, %v2963_v57  ;;  %v2945_v1 = vld [vmem:[#allocation4 + $0x28] sm:$0xf] }
  0x3e   :  { %v3134_v3 = vld [vmem:[#allocation4 + $0x34] sm:$0xf0]  ;;  %v2937_v4 = vld [vmem:[#allocation4 + $0x20] sm:$0xf]  ;;  %v3825_v5 = vor.u32 %v3131_v59, %v2939_v60  ;;  %v3133_v7 = vld [vmem:[#allocation4 + $0x2c] sm:$0xf0] }
  0x3f   :  { %928 = vmatpush.bf16.msrb.mxu3 %v3775_v10  ;;  %v3132_v8 = vld [vmem:[#allocation4 + $0x2c] sm:$0xf]  ;;  %v2947_v9 = vld [vmem:[#allocation4 + $0x38] sm:$0xf0]  ;;  %v3829_v12 = vor.u32 %v3134_v3, %v2945_v1  ;;  %v3831_v13 = vor.u32 %v3133_v7, %v2937_v4  ;;  %v3127_v14 = vld [vmem:[#allocation4 + $0x4] sm:$0xf] }
  0x40   :  { %586 = vmatpush.bf16.msrb.mxu0 %v2822_v30  ;;  %v2971_v30 = vld [vmem:[#allocation4 + $0x70] sm:$0xf0]  ;;  %v2929_v17 = vld [vmem:[#allocation4 + $0x8] sm:$0xf]  ;;  %v3834_v18 = vor.u32 %v3132_v8, %v2947_v9  ;;  %v3130_v22 = vld [vmem:[#allocation4 + $0x14] sm:$0xf0] }
  0x41   :  { %915 = vmatpush.bf16.msrb.mxu2 %v3773_v6  ;;  %903 = vmatpush.bf16.msrb.mxu1 %v3789_v25  ;;  %v3802_v32 = vor.u32 %v3139_v29, %v2971_v30  ;;  %v2923_v16 = vld [vmem:[#allocation4 + $0x10] sm:$0xf0]  ;;  %v2921_v19 = vld [vmem:[#allocation4] sm:$0xf]  ;;  %v3129_v23 = vld [vmem:[#allocation4 + $0xc] sm:$0xf0]  ;;  %v3841_v26 = vor.u32 %v3130_v22, %v2929_v17 }
  0x42   :  { %v3843_v29 = vor.u32 %v3129_v23, %v2921_v19  ;;  %v3128_v30 = vld [vmem:[#allocation4 + $0xc] sm:$0xf]  ;;  %v2931_v31 = vld [vmem:[#allocation4 + $0x18] sm:$0xf0]  ;;  %v3445_v49 = vmov 0  }
  0x43   :  { %929 = vmatpush.bf16.msrb.mxu3 %v3786_v21  ;;  %v353_v52 = vld [vmem:[%s4510_s5] sm:$0xf] }
  0x44   :  { %587 = vmatpush.bf16.msrb.mxu0 %v2806_v42  ;;  %v3810_v42 = vor.u32 %v3140_v38, %v2979_v39  ;;  %v3847_v39 = vor.u32 %v3128_v30, %v2931_v31  ;;  %v3921_v57 = vperm.slane %v353_v52, 3  ;;  %v3923_v59 = vperm.slane %v353_v52, 1 }
  0x45   :  { %916 = vmatpush.bf16.msrb.mxu2 %v3784_v20  ;;  %904 = vmatpush.bf16.msrb.mxu1 %v3806_v37  ;;  %v3925_v60 = vperm.slane %v353_v52, 2 }
  0x47   :  { %930 = vmatpush.bf16.msrb.mxu3 %v3804_v36 }
  0x48   :  { %939 = vmatpush.bf16.msra.mxu0 %v3756_v54 }
  0x49   :  { %917 = vmatpush.bf16.msrb.mxu2 %v3802_v32  ;;  %905 = vmatpush.bf16.msrb.mxu1 %v3819_v56 }
  0x4b   :  { %931 = vmatpush.bf16.msrb.mxu3 %v3816_v48 }
  0x4c   :  { %940 = vmatpush.bf16.msra.mxu0 %v3768_v2 }
  0x4d   :  { %918 = vmatpush.bf16.msrb.mxu2 %v3814_v47  ;;  %906 = vmatpush.bf16.msrb.mxu1 %v3831_v13 }
  0x4f   :  { %932 = vmatpush.bf16.msrb.mxu3 %v3829_v12 }
  0x50   :  { %941 = vmatpush.bf16.msra.mxu0 %v3780_v15 }
  0x51   :  { %919 = vmatpush.bf16.msrb.mxu2 %v3825_v5  ;;  %907 = vmatpush.bf16.msrb.mxu1 %v3843_v29 }
  0x53   :  { %933 = vmatpush.bf16.msrb.mxu3 %v3841_v26 }
  0x54   :  { %942 = vmatpush.bf16.msra.mxu0 %v3791_v27 }
  0x58   :  { %943 = vmatpush.bf16.msra.mxu0 %v3810_v42 }
  0x5c   :  { %944 = vmatpush.bf16.msra.mxu0 %v3822_v0 }
  0x60   :  { %945 = vmatpush.bf16.msra.mxu0 %v3834_v18 }
  0x64   :  { %946 = vmatpush.bf16.msra.mxu0 %v3847_v39 }
  0xa4   :  { %v305_v24 = vpop.f32.mrf.mxu0 }
  0xa5   :  { %v306_v41 = vadd.f32 %v3796_v28, %v305_v24  ;;  %v3837_v24 = vor.u32 %v3127_v14, %v2923_v16 }
  0xa7   :  { %3168 = vtanh.f32 %v306_v41  ;;  %920 = vmatpush.bf16.msrb.mxu2 %v3837_v24 }
  0xac   :  { %v307_v55 = vpop.f32.mrf.mxu0 }
  0xad   :  { %v308_v61 = vadd.f32 %v3796_v28, %v307_v55  ;;  %v3169_v33 = vpop.eup %3168 }
  0xaf   :  { %3170 = vtanh.f32 %v308_v61  ;;  %v3927_v61 = vperm.slane %v353_v52, 0 }
  0xb4   :  { %v310_v34 = vpop.f32.mrf.mxu0 }
  0xb5   :  { %v3171_v35 = vpop.eup %3170  ;;  %v311_v40 = vadd.f32 %v3796_v28, %v310_v34 }
  0xb6   :  { %v319_v38 = vpack.c.bf16 %v3171_v35, %v3169_v33 }
  0xb7   :  { %3172 = vtanh.f32 %v311_v40 }
  0xb8   :  { %531 = vmatmul.bf16.vlgmr.msra.gmra.mxu1 %v319_v38  ;;  %550 = vmatmul.bf16.vlgmr.msra.gmra.mxu2 %v319_v38 }
  0xb9   :  { %569 = vmatmul.bf16.vlgmr.msra.gmra.mxu3 %v319_v38  ;;  %588 = vmatmul.bf16.vlgmr.msrb.gmra.mxu0 %v319_v38 }
  0xba   :  { %1037 = vmatpush.bf16.msra.mxu1 %v3753_v51  ;;  %1050 = vmatpush.bf16.msra.mxu2 %v3749_v46 }
  0xbb   :  { %1063 = vmatpush.bf16.msra.mxu3 %v3751_v50  ;;  %1076 = vmatpush.bf16.msrb.mxu0 %v3756_v54 }
  0xbc   :  { %v312_v41 = vpop.f32.mrf.mxu0 }
  0xbd   :  { %v313_v43 = vadd.f32 %v3796_v28, %v312_v41  ;;  %v3173_v44 = vpop.eup %3172 }
  0xbe   :  { %1038 = vmatpush.bf16.msra.mxu1 %v3765_v63  ;;  %1051 = vmatpush.bf16.msra.mxu2 %v3761_v58 }
  0xbf   :  { %3174 = vtanh.f32 %v313_v43  ;;  %1064 = vmatpush.bf16.msra.mxu3 %v3763_v62  ;;  %1077 = vmatpush.bf16.msrb.mxu0 %v3768_v2 }
  0xc2   :  { %1039 = vmatpush.bf16.msra.mxu1 %v3777_v11  ;;  %1052 = vmatpush.bf16.msra.mxu2 %v3773_v6 }
  0xc3   :  { %1065 = vmatpush.bf16.msra.mxu3 %v3775_v10  ;;  %1078 = vmatpush.bf16.msrb.mxu0 %v3780_v15 }
  0xc5   :  { %v3175_v28 = vpop.eup %3174 }
  0xc6   :  { %v320_v45 = vpack.c.bf16 %v3175_v28, %v3173_v44  ;;  %1040 = vmatpush.bf16.msra.mxu1 %v3789_v25  ;;  %1053 = vmatpush.bf16.msra.mxu2 %v3784_v20 }
  0xc7   :  { %1066 = vmatpush.bf16.msra.mxu3 %v3786_v21  ;;  %1079 = vmatpush.bf16.msrb.mxu0 %v3791_v27 }
  0xc8   :  { %536 = vmatmul.bf16.gmra.mxu1 %v320_v45  ;;  %555 = vmatmul.bf16.gmra.mxu2 %v320_v45 }
  0xc9   :  { %574 = vmatmul.bf16.gmra.mxu3 %v320_v45  ;;  %593 = vmatmul.bf16.gmra.mxu0 %v320_v45 }
  0xca   :  { %1041 = vmatpush.bf16.msra.mxu1 %v3806_v37  ;;  %1054 = vmatpush.bf16.msra.mxu2 %v3802_v32 }
  0xcb   :  { %1067 = vmatpush.bf16.msra.mxu3 %v3804_v36  ;;  %1080 = vmatpush.bf16.msrb.mxu0 %v3810_v42 }
  0xce   :  { %1042 = vmatpush.bf16.msra.mxu1 %v3819_v56  ;;  %1055 = vmatpush.bf16.msra.mxu2 %v3814_v47 }
  0xcf   :  { %1068 = vmatpush.bf16.msra.mxu3 %v3816_v48  ;;  %1081 = vmatpush.bf16.msrb.mxu0 %v3822_v0 }
  0xd2   :  { %1043 = vmatpush.bf16.msra.mxu1 %v3831_v13  ;;  %1056 = vmatpush.bf16.msra.mxu2 %v3825_v5 }
  0xd3   :  { %1069 = vmatpush.bf16.msra.mxu3 %v3829_v12  ;;  %1082 = vmatpush.bf16.msrb.mxu0 %v3834_v18 }
  0xd6   :  { %1044 = vmatpush.bf16.msra.mxu1 %v3843_v29  ;;  %1057 = vmatpush.bf16.msra.mxu2 %v3837_v24 }
  0xd7   :  { %1070 = vmatpush.bf16.msra.mxu3 %v3841_v26  ;;  %1083 = vmatpush.bf16.msrb.mxu0 %v3847_v39 }
  0xd8   :  { %908 = vmatmul.bf16.vlgmr.msrb.gmra.mxu1 %v3445_v49  ;;  %921 = vmatmul.bf16.vlgmr.msrb.gmra.mxu2 %v3445_v49 }
  0xd9   :  { %934 = vmatmul.bf16.vlgmr.msrb.gmra.mxu3 %v3445_v49  ;;  %947 = vmatmul.bf16.vlgmr.msra.gmra.mxu0 %v3445_v49 }
  0xda   :  { %1174 = vmatpush.bf16.msrb.mxu1 %v3753_v51  ;;  %1187 = vmatpush.bf16.msrb.mxu2 %v3749_v46 }
  0xdb   :  { %1200 = vmatpush.bf16.msrb.mxu3 %v3751_v50  ;;  %1213 = vmatpush.bf16.msra.mxu0 %v3756_v54 }
  0xde   :  { %1175 = vmatpush.bf16.msrb.mxu1 %v3765_v63  ;;  %1188 = vmatpush.bf16.msrb.mxu2 %v3761_v58 }
  0xdf   :  { %1201 = vmatpush.bf16.msrb.mxu3 %v3763_v62  ;;  %1214 = vmatpush.bf16.msra.mxu0 %v3768_v2 }
  0xe2   :  { %1176 = vmatpush.bf16.msrb.mxu1 %v3777_v11  ;;  %1189 = vmatpush.bf16.msrb.mxu2 %v3773_v6 }
  0xe3   :  { %1202 = vmatpush.bf16.msrb.mxu3 %v3775_v10  ;;  %1215 = vmatpush.bf16.msra.mxu0 %v3780_v15 }
  0xe6   :  { %1177 = vmatpush.bf16.msrb.mxu1 %v3789_v25  ;;  %1190 = vmatpush.bf16.msrb.mxu2 %v3784_v20 }
  0xe7   :  { %1203 = vmatpush.bf16.msrb.mxu3 %v3786_v21  ;;  %1216 = vmatpush.bf16.msra.mxu0 %v3791_v27 }
  0xea   :  { %1178 = vmatpush.bf16.msrb.mxu1 %v3806_v37  ;;  %1191 = vmatpush.bf16.msrb.mxu2 %v3802_v32 }
  0xeb   :  { %1204 = vmatpush.bf16.msrb.mxu3 %v3804_v36  ;;  %1217 = vmatpush.bf16.msra.mxu0 %v3810_v42 }
  0xee   :  { %1179 = vmatpush.bf16.msrb.mxu1 %v3819_v56  ;;  %1192 = vmatpush.bf16.msrb.mxu2 %v3814_v47 }
  0xef   :  { %1205 = vmatpush.bf16.msrb.mxu3 %v3816_v48  ;;  %1218 = vmatpush.bf16.msra.mxu0 %v3822_v0 }
  0xf2   :  { %1180 = vmatpush.bf16.msrb.mxu1 %v3831_v13  ;;  %1193 = vmatpush.bf16.msrb.mxu2 %v3825_v5 }
  0xf3   :  { %1206 = vmatpush.bf16.msrb.mxu3 %v3829_v12  ;;  %1219 = vmatpush.bf16.msra.mxu0 %v3834_v18 }
  0xf6   :  { %1181 = vmatpush.bf16.msrb.mxu1 %v3843_v29  ;;  %1194 = vmatpush.bf16.msrb.mxu2 %v3837_v24 }
  0xf7   :  { %1207 = vmatpush.bf16.msrb.mxu3 %v3841_v26  ;;  %1220 = vmatpush.bf16.msra.mxu0 %v3847_v39 }
 0x135   :  { %v532_v53 = vpop.f32.mrf.mxu1 }
 0x136   :  { %v589_v55 = vpop.f32.mrf.mxu0  ;;  %v3933_v14 = vadd.f32 %v532_v53, %v3927_v61 }
 0x137   :  { %v590_v1 = vadd.f32 %v589_v55, %v3921_v57 }
 0x139   :  { %v3937_v22 = vrot.slane %v590_v1, 2 }
 0x13b   :  { %v551_v3 = vpop.f32.mrf.mxu2 }
 0x13c   :  { %v552_v4 = vadd.f32 %v551_v3, %v3923_v59  ;;  %v570_v7 = vpop.f32.mrf.mxu3 }
 0x13d   :  { %v571_v8 = vadd.f32 %v570_v7, %v3925_v60  ;;  %v534_v9 = vpop.f32.mrf.mxu1 }
 0x13e   :  { %v3935_v16 = vrot.slane %v552_v4, 6  ;;  %v591_v17 = vpop.f32.mrf.mxu0  ;;  %v535_v53 = vadd.f32 %v534_v9, %v3927_v61 }
 0x13f   :  { %v3939_v19 = vrot.slane %v571_v8, 4  ;;  %v592_v41 = vadd.f32 %v591_v17, %v3921_v57 }
 0x140   :  { %v634_v23 = vsel %vm633_vm2, %v3933_v14, %v3935_v16  ;;  %v640_v30 = vsel %vm629_vm1, %v3933_v14, %v3935_v16  ;;  %v644_v31 = vsel %vm635_vm3, %v3935_v16, %v3933_v14 }
 0x141   :  { %v636_v33 = vsel %vm635_vm3, %v3937_v22, %v3939_v19  ;;  %v641_v34 = vsel %vm627_vm4, %v3939_v19, %v3937_v22  ;;  %v645_v35 = vsel %vm633_vm2, %v3939_v19, %v3937_v22  ;;  %v620_v4 = vrot.slane %v592_v41, 2 }
 0x142   :  { %v3960_v38 = vsel %vm637_vm6, %v634_v23, %v636_v33  ;;  %v3963_v40 = vsel %vm631_vm5, %v641_v34, %v640_v30  ;;  %v3967_v44 = vsel %vm637_vm6, %v645_v35, %v644_v31 }
 0x143   :  { %v553_v43 = vpop.f32.mrf.mxu2 }
 0x144   :  { %v554_v28 = vadd.f32 %v553_v43, %v3923_v59  ;;  %v572_v45 = vpop.f32.mrf.mxu3 }
 0x145   :  { %v573_v49 = vadd.f32 %v572_v45, %v3925_v60  ;;  %v537_v52 = vpop.f32.mrf.mxu1 }
 0x146   :  { %v618_v55 = vrot.slane %v554_v28, 6  ;;  %v538_v1 = vadd.f32 %v537_v52, %v3927_v61  ;;  %v594_v3 = vpop.f32.mrf.mxu0 }
 0x147   :  { %v619_v7 = vrot.slane %v573_v49, 4  ;;  %v595_v8 = vadd.f32 %v594_v3, %v3921_v57 }
 0x148   :  { %v648_v17 = vsel %vm627_vm4, %v535_v53, %v618_v55  ;;  %v651_v23 = vsel %vm633_vm2, %v535_v53, %v618_v55  ;;  %v655_v30 = vsel %vm629_vm1, %v535_v53, %v618_v55  ;;  %v659_v31 = vsel %vm635_vm3, %v618_v55, %v535_v53 }
 0x149   :  { %v649_v33 = vsel %vm629_vm1, %v619_v7, %v620_v4  ;;  %v652_v9 = vsel %vm635_vm3, %v620_v4, %v619_v7  ;;  %v656_v34 = vsel %vm627_vm4, %v619_v7, %v620_v4  ;;  %v660_v35 = vsel %vm633_vm2, %v619_v7, %v620_v4 }
 0x14a   :  { %v3983_v41 = vsel %vm631_vm5, %v648_v17, %v649_v33  ;;  %v3986_v43 = vsel %vm637_vm6, %v651_v23, %v652_v9  ;;  %v3989_v28 = vsel %vm631_vm5, %v656_v34, %v655_v30  ;;  %v3992_v49 = vsel %vm637_vm6, %v660_v35, %v659_v31 }
 0x14b   :  { %4514 = vst [vmem:[#allocation10_spill] sm:$0xff] %v3986_v43  ;;  %v556_v45 = vpop.f32.mrf.mxu2  ;;  %v623_v17 = vrot.slane %v595_v8, 2 }
 0x14c   :  { %4515 = vst [vmem:[#allocation11_spill] sm:$0xff] %v3989_v28  ;;  %v557_v52 = vadd.f32 %v556_v45, %v3923_v59  ;;  %v575_v53 = vpop.f32.mrf.mxu3 }
 0x14d   :  { %4516 = vst [vmem:[#allocation12_spill] sm:$0xff] %v3992_v49  ;;  %v576_v55 = vadd.f32 %v575_v53, %v3925_v60  ;;  %v539_v3 = vpop.f32.mrf.mxu1 }
 0x14e   :  { %v621_v4 = vrot.slane %v557_v52, 6  ;;  %v596_v7 = vpop.f32.mrf.mxu0 }
 0x14f   :  { %v622_v33 = vrot.slane %v576_v55, 4  ;;  %v597_v49 = vadd.f32 %v596_v7, %v3921_v57 }
 0x150   :  { %v663_v23 = vsel %vm627_vm4, %v538_v1, %v621_v4  ;;  %v666_v9 = vsel %vm633_vm2, %v538_v1, %v621_v4  ;;  %v670_v30 = vsel %vm629_vm1, %v538_v1, %v621_v4  ;;  %v674_v34 = vsel %vm635_vm3, %v621_v4, %v538_v1 }
 0x151   :  { %v664_v31 = vsel %vm629_vm1, %v622_v33, %v623_v17  ;;  %v667_v35 = vsel %vm635_vm3, %v623_v17, %v622_v33  ;;  %v671_v45 = vsel %vm627_vm4, %v622_v33, %v623_v17  ;;  %v675_v53 = vsel %vm633_vm2, %v622_v33, %v623_v17 }
 0x152   :  { %v4005_v52 = vsel %vm631_vm5, %v663_v23, %v664_v31  ;;  %v4008_v8 = vsel %vm637_vm6, %v666_v9, %v667_v35  ;;  %v4011_v55 = vsel %vm631_vm5, %v671_v45, %v670_v30  ;;  %v4015_v4 = vsel %vm637_vm6, %v675_v53, %v674_v34 }
 0x153   :  { %4517 = vst [vmem:[#allocation13_spill] sm:$0xff] %v4008_v8  ;;  %v558_v1 = vpop.f32.mrf.mxu2  ;;  %v540_v23 = vadd.f32 %v539_v3, %v3927_v61  ;;  %v626_v35 = vrot.slane %v597_v49, 2  ;;  %v630_v61 = vsel %vm629_vm1, %v3939_v19, %v3937_v22 }
 0x154   :  { %4518 = vst [vmem:[#allocation14_spill] sm:$0xff] %v4015_v4  ;;  %v559_v28 = vadd.f32 %v558_v1, %v3923_v59  ;;  %v577_v43 = vpop.f32.mrf.mxu3 }
 0x155   :  { %v578_v17 = vadd.f32 %v577_v43, %v3925_v60  ;;  %v909_v33 = vpop.f32.mrf.mxu1  ;;  %v628_v60 = vsel %vm627_vm4, %v3933_v14, %v3935_v16 }
 0x156   :  { %v624_v31 = vrot.slane %v559_v28, 6  ;;  %v948_v9 = vpop.f32.mrf.mxu0  ;;  %v632_v1 = vsel %vm631_vm5, %v628_v60, %v630_v61 }
 0x157   :  { %v625_v8 = vrot.slane %v578_v17, 4  ;;  %v958_v34 = vrot.slane %v948_v9, 2 }
 0x158   :  { %v678_v30 = vsel %vm627_vm4, %v540_v23, %v624_v31 }
 0x159   :  { %v679_v57 = vsel %vm629_vm1, %v625_v8, %v626_v35 }
 0x15a   :  { %v4023_v7 = vsel %vm631_vm5, %v678_v30, %v679_v57 }
 0x15b   :  { %4519 = vst [vmem:[#allocation15_spill] sm:$0xff] %v4023_v7  ;;  %v922_v45 = vpop.f32.mrf.mxu2 }
 0x15c   :  { %v956_v59 = vrot.slane %v922_v45, 6  ;;  %v935_v53 = vpop.f32.mrf.mxu3 }
 0x15d   :  { %v957_v43 = vrot.slane %v935_v53, 4  ;;  %v911_v28 = vpop.f32.mrf.mxu1 }
 0x15e   :  { %v959_v49 = vsel %vm627_vm4, %v909_v33, %v956_v59  ;;  %v950_v3 = vpop.f32.mrf.mxu0 }
 0x15f   :  { %v960_v8 = vsel %vm629_vm1, %v957_v43, %v958_v34 }
 0x160   :  { %v961_v17 = vsel %vm631_vm5, %v959_v49, %v960_v8 }
 0x161   :  { %v963_v23 = vadd.f32 %v961_v17, %v632_v1 }
 0x163   :  { %v3047_v31 = vmul.f32 -1.442695, %v963_v23  ;;  %v984_v9 = vrot.slane %v963_v23, 2  ;;  %v1008_v35 = vrot.slane %v963_v23, 6  ;;  %v924_v14 = vpop.f32.mrf.mxu2  ;;  %v1005_v43 = vrot.slane %v963_v23, 4 }
 0x164   :  { %v937_v16 = vpop.f32.mrf.mxu3 }
 0x165   :  { %3176 = vpow2.f32 %v3047_v31  ;;  %v3048_v30 = vmul.f32 -1.442695, %v984_v9  ;;  %v3049_v22 = vmul.f32 -1.442695, %v1008_v35 }
 0x167   :  { %3178 = vpow2.f32 %v3048_v30 }
 0x168   :  { %3180 = vpow2.f32 %v3049_v22 }
 0x16b   :  { %v3177_v19 = vpop.eup %3176 }
 0x16c   :  { %v967_v33 = vadd.f32 1.0, %v3177_v19 }
 0x16d   :  { %v3179_v57 = vpop.eup %3178 }
 0x16e   :  { %v3181_v45 = vpop.eup %3180  ;;  %3182 = vrcp.f32 %v967_v33  ;;  %v989_v34 = vadd.f32 1.0, %v3179_v57  ;;  %v979_v8 = vand.u32 2147483648, %v967_v33  ;;  %v977_v31 = vand.u32 2147483647, %v967_v33 }
 0x16f   :  { %v1013_v59 = vadd.f32 1.0, %v3181_v45  ;;  %vm973_vm8 = vweird.f32 %v967_v33 }
 0x170   :  { %3184 = vrcp.f32 %v989_v34  ;;  %v1001_v35 = vand.u32 2147483648, %v989_v34  ;;  %v999_v30 = vand.u32 2147483647, %v989_v34  ;;  %v980_v22 = vor.u32 1.1754944e-38, %v979_v8 }
 0x171   :  { %3186 = vrcp.f32 %v1013_v59  ;;  %vm978_vm11 = vcmp.eq.f32.partialorder %v977_v31, 8.507059e+37  ;;  %vm995_vm12 = vweird.f32 %v989_v34  ;;  %v1025_v8 = vand.u32 2147483648, %v1013_v59 }
 0x172   :  { %3188 = vtanh.f32 %v1005_v43  ;;  %vm1000_vm14 = vcmp.eq.f32.partialorder %v999_v30, 8.507059e+37  ;;  %vm1019_vm0 = vweird.f32 %v1013_v59 }
 0x174   :  { %v3183_v53 = vpop.eup %3182 }
 0x175   :  { %v969_v60 = vmul.f32 %v3183_v53, %v967_v33  ;;  %vm974_vm7 = vweird.f32 %v3183_v53 }
 0x176   :  { %v3185_v61 = vpop.eup %3184  ;;  %vm975_vm10 = vmor %vm973_vm8, %vm974_vm7 }
 0x177   :  { %v3187_v28 = vpop.eup %3186  ;;  %v970_v49 = vsub.f32 1.0, %v969_v60  ;;  %v991_v3 = vmul.f32 %v3185_v61, %v989_v34  ;;  %vm996_vm9 = vweird.f32 %v3185_v61  ;;  %v1002_v60 = vor.u32 1.1754944e-38, %v1001_v35 }
 0x178   :  { %v1015_v1 = vmul.f32 %v3187_v28, %v1013_v59  ;;  %vm997_vm13 = vmor %vm995_vm12, %vm996_vm9  ;;  %vm1020_vm15 = vweird.f32 %v3187_v28 }
 0x179   :  { %v971_v17 = vmul.f32 %v3183_v53, %v970_v49  ;;  %v992_v9 = vsub.f32 1.0, %v991_v3  ;;  %v3189_v3 = vpop.eup %3188  ;;  %vm1021_vm2 = vmor %vm1019_vm0, %vm1020_vm15 }
 0x17a   :  { %v1016_v19 = vsub.f32 1.0, %v1015_v1  ;;  %v1026_v1 = vor.u32 1.1754944e-38, %v1025_v8 }
 0x17b   :  { %v972_v14 = vadd.f32 %v3183_v53, %v971_v17  ;;  %v993_v16 = vmul.f32 %v3185_v61, %v992_v9 }
 0x17c   :  { %v1017_v33 = vmul.f32 %v3187_v28, %v1016_v19 }
 0x17d   :  { %v976_v23 = vsel %vm975_vm10, %v3183_v53, %v972_v14  ;;  %v994_v57 = vadd.f32 %v3185_v61, %v993_v16  ;;  %v1023_v53 = vand.u32 2147483647, %v1013_v59 }
 0x17e   :  { %v981_v45 = vsel %vm978_vm11, %v980_v22, %v976_v23  ;;  %v1018_v4 = vadd.f32 %v3187_v28, %v1017_v33 }
 0x17f   :  { %v998_v49 = vsel %vm997_vm13, %v3185_v61, %v994_v57  ;;  %v1030_v17 = vmul.f32 %v3189_v3, %v981_v45  ;;  %vm1024_vm3 = vcmp.eq.f32.partialorder %v1023_v53, 8.507059e+37  ;;  %v639_v45 = vrot.slane %v3960_v38, 2 }
 0x180   :  { %v1003_v43 = vsel %vm1000_vm14, %v1002_v60, %v998_v49  ;;  %v1022_v34 = vsel %vm1021_vm2, %v3187_v28, %v1018_v4 }
 0x181   :  { %v1029_v7 = vmul.f32 0.0, %v1003_v43  ;;  %v1027_v31 = vsel %vm1024_vm3, %v1026_v1, %v1022_v34 }
 0x183   :  { %v4035_v9 = vadd.f32 %v1030_v17, %v1029_v7 }
 0x185   :  { %3190 = vtanh.f32 %v4035_v9 }
 0x18b   :  { %v3191_v61 = vpop.eup %3190 }
 0x18c   :  { %v1033_v35 = vmul.f32 %v3191_v61, %v1027_v31 }
 0x18e   :  { %v1036_v14 = vpack.c.bf16 %v1033_v35, %v1033_v35 }
 0x190   :  { %1045 = vmatmul.bf16.vlgmr.msra.gmra.mxu1 %v1036_v14  ;;  %1058 = vmatmul.bf16.vlgmr.msra.gmra.mxu2 %v1036_v14 }
 0x191   :  { %1071 = vmatmul.bf16.vlgmr.msra.gmra.mxu3 %v1036_v14  ;;  %1084 = vmatmul.bf16.vlgmr.msrb.gmra.mxu0 %v1036_v14 }
 0x192   :  { %1311 = vmatpush.bf16.msra.mxu1 %v3753_v51  ;;  %1324 = vmatpush.bf16.msra.mxu2 %v3749_v46 }
 0x193   :  { %1337 = vmatpush.bf16.msra.mxu3 %v3751_v50  ;;  %1350 = vmatpush.bf16.msrb.mxu0 %v3756_v54 }
 0x196   :  { %1312 = vmatpush.bf16.msra.mxu1 %v3765_v63  ;;  %1325 = vmatpush.bf16.msra.mxu2 %v3761_v58 }
 0x197   :  { %1338 = vmatpush.bf16.msra.mxu3 %v3763_v62  ;;  %1351 = vmatpush.bf16.msrb.mxu0 %v3768_v2 }
 0x19a   :  { %1313 = vmatpush.bf16.msra.mxu1 %v3777_v11  ;;  %1326 = vmatpush.bf16.msra.mxu2 %v3773_v6 }
 0x19b   :  { %1339 = vmatpush.bf16.msra.mxu3 %v3775_v10  ;;  %1352 = vmatpush.bf16.msrb.mxu0 %v3780_v15 }
 0x19e   :  { %1314 = vmatpush.bf16.msra.mxu1 %v3789_v25  ;;  %1327 = vmatpush.bf16.msra.mxu2 %v3784_v20 }
 0x19f   :  { %1340 = vmatpush.bf16.msra.mxu3 %v3786_v21  ;;  %1353 = vmatpush.bf16.msrb.mxu0 %v3791_v27 }
 0x1a2   :  { %1315 = vmatpush.bf16.msra.mxu1 %v3806_v37  ;;  %1328 = vmatpush.bf16.msra.mxu2 %v3802_v32 }
 0x1a3   :  { %1341 = vmatpush.bf16.msra.mxu3 %v3804_v36  ;;  %1354 = vmatpush.bf16.msrb.mxu0 %v3810_v42 }
 0x1a6   :  { %1316 = vmatpush.bf16.msra.mxu1 %v3819_v56  ;;  %1329 = vmatpush.bf16.msra.mxu2 %v3814_v47 }
 0x1a7   :  { %1342 = vmatpush.bf16.msra.mxu3 %v3816_v48  ;;  %1355 = vmatpush.bf16.msrb.mxu0 %v3822_v0 }
 0x1aa   :  { %1317 = vmatpush.bf16.msra.mxu1 %v3831_v13  ;;  %1330 = vmatpush.bf16.msra.mxu2 %v3825_v5 }
 0x1ab   :  { %1343 = vmatpush.bf16.msra.mxu3 %v3829_v12  ;;  %1356 = vmatpush.bf16.msrb.mxu0 %v3834_v18 }
 0x1ae   :  { %1318 = vmatpush.bf16.msra.mxu1 %v3843_v29  ;;  %1331 = vmatpush.bf16.msra.mxu2 %v3837_v24 }
 0x1af   :  { %1344 = vmatpush.bf16.msra.mxu3 %v3841_v26  ;;  %1357 = vmatpush.bf16.msrb.mxu0 %v3847_v39 }
 0x20d   :  { %v1046_v4 = vpop.f32.mrf.mxu1 }
 0x20e   :  { %v1085_v7 = vpop.f32.mrf.mxu0 }
 0x20f   :  { %v1095_v30 = vrot.slane %v1085_v7, 2 }
 0x213   :  { %v1059_v59 = vpop.f32.mrf.mxu2 }
 0x214   :  { %v1093_v28 = vrot.slane %v1059_v59, 6  ;;  %v1072_v16 = vpop.f32.mrf.mxu3 }
 0x215   :  { %v1094_v22 = vrot.slane %v1072_v16, 4  ;;  %v1048_v19 = vpop.f32.mrf.mxu1 }
 0x216   :  { %v1096_v23 = vsel %vm627_vm4, %v1046_v4, %v1093_v28  ;;  %v1087_v57 = vpop.f32.mrf.mxu0 }
 0x217   :  { %v1097_v60 = vsel %vm629_vm1, %v1094_v22, %v1095_v30 }
 0x218   :  { %v1098_v49 = vsel %vm631_vm5, %v1096_v23, %v1097_v60 }
 0x219   :  { %v1100_v3 = vadd.f32 %v1098_v49, %v639_v45 }
 0x21b   :  { %v3050_v43 = vmul.f32 -1.442695, %v1100_v3  ;;  %v1121_v33 = vrot.slane %v1100_v3, 2  ;;  %v1145_v17 = vrot.slane %v1100_v3, 6  ;;  %v1061_v8 = vpop.f32.mrf.mxu2  ;;  %v1142_v16 = vrot.slane %v1100_v3, 4 }
 0x21c   :  { %v1074_v53 = vpop.f32.mrf.mxu3 }
 0x21d   :  { %3192 = vpow2.f32 %v3050_v43  ;;  %v3051_v34 = vmul.f32 -1.442695, %v1121_v33  ;;  %v3052_v1 = vmul.f32 -1.442695, %v1145_v17 }
 0x21f   :  { %3194 = vpow2.f32 %v3051_v34 }
 0x220   :  { %3196 = vpow2.f32 %v3052_v1 }
 0x223   :  { %v3193_v61 = vpop.eup %3192 }
 0x224   :  { %v1104_v31 = vadd.f32 1.0, %v3193_v61 }
 0x225   :  { %v3195_v35 = vpop.eup %3194 }
 0x226   :  { %v3197_v14 = vpop.eup %3196  ;;  %3198 = vrcp.f32 %v1104_v31  ;;  %v1126_v38 = vadd.f32 1.0, %v3195_v35  ;;  %v1116_v23 = vand.u32 2147483648, %v1104_v31  ;;  %v1114_v60 = vand.u32 2147483647, %v1104_v31 }
 0x227   :  { %v1150_v4 = vadd.f32 1.0, %v3197_v14  ;;  %vm1110_vm7 = vweird.f32 %v1104_v31 }
 0x228   :  { %3200 = vrcp.f32 %v1126_v38  ;;  %v1138_v43 = vand.u32 2147483648, %v1126_v38  ;;  %v1136_v8 = vand.u32 2147483647, %v1126_v38  ;;  %v1117_v53 = vor.u32 1.1754944e-38, %v1116_v23 }
 0x229   :  { %3202 = vrcp.f32 %v1150_v4  ;;  %vm1115_vm10 = vcmp.eq.f32.partialorder %v1114_v60, 8.507059e+37  ;;  %vm1132_vm11 = vweird.f32 %v1126_v38  ;;  %v1162_v23 = vand.u32 2147483648, %v1150_v4 }
 0x22a   :  { %3204 = vtanh.f32 %v1142_v16  ;;  %v1139_v35 = vor.u32 1.1754944e-38, %v1138_v43  ;;  %vm1137_vm13 = vcmp.eq.f32.partialorder %v1136_v8, 8.507059e+37  ;;  %vm1156_vm15 = vweird.f32 %v1150_v4 }
 0x22c   :  { %v3199_v7 = vpop.eup %3198 }
 0x22d   :  { %v1106_v59 = vmul.f32 %v3199_v7, %v1104_v31  ;;  %vm1111_vm6 = vweird.f32 %v3199_v7 }
 0x22e   :  { %v3201_v28 = vpop.eup %3200  ;;  %vm1112_vm9 = vmor %vm1110_vm7, %vm1111_vm6 }
 0x22f   :  { %v3203_v30 = vpop.eup %3202  ;;  %v1107_v22 = vsub.f32 1.0, %v1106_v59  ;;  %v1128_v19 = vmul.f32 %v3201_v28, %v1126_v38  ;;  %vm1133_vm8 = vweird.f32 %v3201_v28  ;;  %v1160_v38 = vand.u32 2147483647, %v1150_v4 }
 0x230   :  { %v1152_v57 = vmul.f32 %v3203_v30, %v1150_v4  ;;  %vm1134_vm12 = vmor %vm1132_vm11, %vm1133_vm8  ;;  %v3205_v59 = vpop.eup %3204  ;;  %vm1157_vm14 = vweird.f32 %v3203_v30 }
 0x231   :  { %v1108_v45 = vmul.f32 %v3199_v7, %v1107_v22  ;;  %v1129_v49 = vsub.f32 1.0, %v1128_v19  ;;  %vm1158_vm0 = vmor %vm1156_vm15, %vm1157_vm14  ;;  %vm1161_vm2 = vcmp.eq.f32.partialorder %v1160_v38, 8.507059e+37 }
 0x232   :  { %v1153_v34 = vsub.f32 1.0, %v1152_v57  ;;  %v1163_v57 = vor.u32 1.1754944e-38, %v1162_v23 }
 0x233   :  { %v1109_v33 = vadd.f32 %v3199_v7, %v1108_v45  ;;  %v1130_v17 = vmul.f32 %v3201_v28, %v1129_v49 }
 0x234   :  { %v1154_v31 = vmul.f32 %v3203_v30, %v1153_v34 }
 0x235   :  { %v1113_v3 = vsel %vm1112_vm9, %v3199_v7, %v1109_v33  ;;  %v1131_v1 = vadd.f32 %v3201_v28, %v1130_v17 }
 0x236   :  { %v1118_v61 = vsel %vm1115_vm10, %v1117_v53, %v1113_v3  ;;  %v1155_v49 = vadd.f32 %v3203_v30, %v1154_v31 }
 0x237   :  { %v1135_v14 = vsel %vm1134_vm12, %v3201_v28, %v1131_v1  ;;  %v1167_v19 = vmul.f32 %v3205_v59, %v1118_v61 }
 0x238   :  { %v1140_v16 = vsel %vm1137_vm13, %v1139_v35, %v1135_v14  ;;  %v1159_v7 = vsel %vm1158_vm0, %v3203_v30, %v1155_v49  ;;  %v643_v35 = vrot.slane %v3963_v40, 4 }
 0x239   :  { %v1166_v22 = vmul.f32 %v1140_v16, %v4035_v9  ;;  %v1164_v60 = vsel %vm1161_vm2, %v1163_v57, %v1159_v7 }
 0x23b   :  { %v4075_v45 = vadd.f32 %v1167_v19, %v1166_v22 }
 0x23d   :  { %3206 = vtanh.f32 %v4075_v45 }
 0x243   :  { %v3207_v28 = vpop.eup %3206 }
 0x244   :  { %v1170_v43 = vmul.f32 %v3207_v28, %v1164_v60 }
 0x246   :  { %v1173_v33 = vpack.c.bf16 %v1170_v43, %v1170_v43 }
 0x248   :  { %1182 = vmatmul.bf16.vlgmr.msrb.gmra.mxu1 %v1173_v33  ;;  %1195 = vmatmul.bf16.vlgmr.msrb.gmra.mxu2 %v1173_v33 }
 0x249   :  { %1208 = vmatmul.bf16.vlgmr.msrb.gmra.mxu3 %v1173_v33  ;;  %1221 = vmatmul.bf16.vlgmr.msra.gmra.mxu0 %v1173_v33 }
 0x24a   :  { %1448 = vmatpush.bf16.msrb.mxu1 %v3753_v51  ;;  %1461 = vmatpush.bf16.msrb.mxu2 %v3749_v46 }
 0x24b   :  { %1474 = vmatpush.bf16.msrb.mxu3 %v3751_v50  ;;  %1487 = vmatpush.bf16.msra.mxu0 %v3756_v54 }
 0x24e   :  { %1449 = vmatpush.bf16.msrb.mxu1 %v3765_v63  ;;  %1462 = vmatpush.bf16.msrb.mxu2 %v3761_v58 }
 0x24f   :  { %1475 = vmatpush.bf16.msrb.mxu3 %v3763_v62  ;;  %1488 = vmatpush.bf16.msra.mxu0 %v3768_v2 }
 0x252   :  { %1450 = vmatpush.bf16.msrb.mxu1 %v3777_v11  ;;  %1463 = vmatpush.bf16.msrb.mxu2 %v3773_v6 }
 0x253   :  { %1476 = vmatpush.bf16.msrb.mxu3 %v3775_v10  ;;  %1489 = vmatpush.bf16.msra.mxu0 %v3780_v15 }
 0x256   :  { %1451 = vmatpush.bf16.msrb.mxu1 %v3789_v25  ;;  %1464 = vmatpush.bf16.msrb.mxu2 %v3784_v20 }
 0x257   :  { %1477 = vmatpush.bf16.msrb.mxu3 %v3786_v21  ;;  %1490 = vmatpush.bf16.msra.mxu0 %v3791_v27 }
 0x25a   :  { %1452 = vmatpush.bf16.msrb.mxu1 %v3806_v37  ;;  %1465 = vmatpush.bf16.msrb.mxu2 %v3802_v32 }
 0x25b   :  { %1478 = vmatpush.bf16.msrb.mxu3 %v3804_v36  ;;  %1491 = vmatpush.bf16.msra.mxu0 %v3810_v42 }
 0x25e   :  { %1453 = vmatpush.bf16.msrb.mxu1 %v3819_v56  ;;  %1466 = vmatpush.bf16.msrb.mxu2 %v3814_v47 }
 0x25f   :  { %1479 = vmatpush.bf16.msrb.mxu3 %v3816_v48  ;;  %1492 = vmatpush.bf16.msra.mxu0 %v3822_v0 }
 0x262   :  { %1454 = vmatpush.bf16.msrb.mxu1 %v3831_v13  ;;  %1467 = vmatpush.bf16.msrb.mxu2 %v3825_v5 }
 0x263   :  { %1480 = vmatpush.bf16.msrb.mxu3 %v3829_v12  ;;  %1493 = vmatpush.bf16.msra.mxu0 %v3834_v18 }
 0x266   :  { %1455 = vmatpush.bf16.msrb.mxu1 %v3843_v29  ;;  %1468 = vmatpush.bf16.msrb.mxu2 %v3837_v24 }
 0x267   :  { %1481 = vmatpush.bf16.msrb.mxu3 %v3841_v26  ;;  %1494 = vmatpush.bf16.msra.mxu0 %v3847_v39 }
 0x2c5   :  { %v1183_v9 = vpop.f32.mrf.mxu1 }
 0x2c6   :  { %v1222_v4 = vpop.f32.mrf.mxu0 }
 0x2c7   :  { %v1232_v53 = vrot.slane %v1222_v4, 2 }
 0x2cb   :  { %v1196_v30 = vpop.f32.mrf.mxu2 }
 0x2cc   :  { %v1230_v17 = vrot.slane %v1196_v30, 6  ;;  %v1209_v8 = vpop.f32.mrf.mxu3 }
 0x2cd   :  { %v1231_v34 = vrot.slane %v1209_v8, 4  ;;  %v1185_v3 = vpop.f32.mrf.mxu1 }
 0x2ce   :  { %v1233_v1 = vsel %vm627_vm4, %v1183_v9, %v1230_v17  ;;  %v1224_v61 = vpop.f32.mrf.mxu0 }
 0x2cf   :  { %v1234_v14 = vsel %vm629_vm1, %v1231_v34, %v1232_v53 }
 0x2d0   :  { %v1235_v59 = vsel %vm631_vm5, %v1233_v1, %v1234_v14 }
 0x2d1   :  { %v1237_v16 = vadd.f32 %v1235_v59, %v643_v35 }
 0x2d3   :  { %v3053_v31 = vmul.f32 -1.442695, %v1237_v16  ;;  %v1258_v22 = vrot.slane %v1237_v16, 2  ;;  %v1282_v19 = vrot.slane %v1237_v16, 6  ;;  %v1198_v49 = vpop.f32.mrf.mxu2  ;;  %v1279_v17 = vrot.slane %v1237_v16, 4 }
 0x2d4   :  { %v1211_v23 = vpop.f32.mrf.mxu3 }
 0x2d5   :  { %3208 = vpow2.f32 %v3053_v31  ;;  %v3054_v38 = vmul.f32 -1.442695, %v1258_v22  ;;  %v3055_v7 = vmul.f32 -1.442695, %v1282_v19 }
 0x2d7   :  { %3210 = vpow2.f32 %v3054_v38 }
 0x2d8   :  { %3212 = vpow2.f32 %v3055_v7 }
 0x2db   :  { %v3209_v57 = vpop.eup %3208 }
 0x2dc   :  { %v1241_v28 = vadd.f32 1.0, %v3209_v57 }
 0x2dd   :  { %v3211_v60 = vpop.eup %3210 }
 0x2de   :  { %v3213_v43 = vpop.eup %3212  ;;  %3214 = vrcp.f32 %v1241_v28  ;;  %v1263_v40 = vadd.f32 1.0, %v3211_v60  ;;  %v1253_v3 = vand.u32 2147483648, %v1241_v28  ;;  %v1251_v35 = vand.u32 2147483647, %v1241_v28 }
 0x2df   :  { %v1287_v33 = vadd.f32 1.0, %v3213_v43  ;;  %vm1247_vm6 = vweird.f32 %v1241_v28 }
 0x2e0   :  { %3216 = vrcp.f32 %v1263_v40  ;;  %v1275_v59 = vand.u32 2147483648, %v1263_v40  ;;  %v1273_v19 = vand.u32 2147483647, %v1263_v40  ;;  %v1254_v49 = vor.u32 1.1754944e-38, %v1253_v3 }
 0x2e1   :  { %3218 = vrcp.f32 %v1287_v33  ;;  %vm1252_vm9 = vcmp.eq.f32.partialorder %v1251_v35, 8.507059e+37  ;;  %vm1269_vm10 = vweird.f32 %v1263_v40  ;;  %v1299_v3 = vand.u32 2147483648, %v1287_v33 }
 0x2e2   :  { %3220 = vtanh.f32 %v1279_v17  ;;  %v1276_v57 = vor.u32 1.1754944e-38, %v1275_v59  ;;  %vm1274_vm12 = vcmp.eq.f32.partialorder %v1273_v19, 8.507059e+37  ;;  %vm1293_vm14 = vweird.f32 %v1287_v33 }
 0x2e4   :  { %v3215_v9 = vpop.eup %3214 }
 0x2e5   :  { %v1243_v4 = vmul.f32 %v3215_v9, %v1241_v28  ;;  %vm1248_vm3 = vweird.f32 %v3215_v9 }
 0x2e6   :  { %v3217_v30 = vpop.eup %3216  ;;  %vm1249_vm8 = vmor %vm1247_vm6, %vm1248_vm3 }
 0x2e7   :  { %v3219_v8 = vpop.eup %3218  ;;  %v1244_v53 = vsub.f32 1.0, %v1243_v4  ;;  %v1265_v34 = vmul.f32 %v3217_v30, %v1263_v40  ;;  %vm1270_vm7 = vweird.f32 %v3217_v30  ;;  %v1297_v40 = vand.u32 2147483647, %v1287_v33 }
 0x2e8   :  { %v1289_v1 = vmul.f32 %v3219_v8, %v1287_v33  ;;  %vm1271_vm11 = vmor %vm1269_vm10, %vm1270_vm7  ;;  %v3221_v43 = vpop.eup %3220  ;;  %vm1294_vm13 = vweird.f32 %v3219_v8 }
 0x2e9   :  { %v1245_v61 = vmul.f32 %v3215_v9, %v1244_v53  ;;  %v1266_v14 = vsub.f32 1.0, %v1265_v34  ;;  %vm1295_vm15 = vmor %vm1293_vm14, %vm1294_vm13  ;;  %vm1298_vm0 = vcmp.eq.f32.partialorder %v1297_v40, 8.507059e+37 }
 0x2ea   :  { %v1290_v23 = vsub.f32 1.0, %v1289_v1  ;;  %v1300_v1 = vor.u32 1.1754944e-38, %v1299_v3 }
 0x2eb   :  { %v1246_v31 = vadd.f32 %v3215_v9, %v1245_v61  ;;  %v1267_v22 = vmul.f32 %v3217_v30, %v1266_v14 }
 0x2ec   :  { %v1291_v28 = vmul.f32 %v3219_v8, %v1290_v23 }
 0x2ed   :  { %v1250_v16 = vsel %vm1249_vm8, %v3215_v9, %v1246_v31  ;;  %v1268_v38 = vadd.f32 %v3217_v30, %v1267_v22 }
 0x2ee   :  { %v1255_v7 = vsel %vm1252_vm9, %v1254_v49, %v1250_v16  ;;  %v1292_v61 = vadd.f32 %v3219_v8, %v1291_v28 }
 0x2ef   :  { %v1272_v60 = vsel %vm1271_vm11, %v3217_v30, %v1268_v38  ;;  %v1304_v53 = vmul.f32 %v3221_v43, %v1255_v7  ;;  %v647_v7 = vrot.slane %v3967_v44, 6 }
 0x2f0   :  { %v1277_v4 = vsel %vm1274_vm12, %v1276_v57, %v1272_v60  ;;  %v1296_v9 = vsel %vm1295_vm15, %v3219_v8, %v1292_v61 }
 0x2f1   :  { %v1303_v17 = vmul.f32 %v1277_v4, %v4075_v45  ;;  %v1301_v35 = vsel %vm1298_vm0, %v1300_v1, %v1296_v9 }
 0x2f3   :  { %v4115_v34 = vadd.f32 %v1304_v53, %v1303_v17 }
 0x2f5   :  { %3222 = vtanh.f32 %v4115_v34 }
 0x2fb   :  { %v3223_v30 = vpop.eup %3222 }
 0x2fc   :  { %v1307_v14 = vmul.f32 %v3223_v30, %v1301_v35 }
 0x2fe   :  { %v1310_v59 = vpack.c.bf16 %v1307_v14, %v1307_v14 }
 0x300   :  { %1319 = vmatmul.bf16.vlgmr.msra.gmra.mxu1 %v1310_v59  ;;  %1332 = vmatmul.bf16.vlgmr.msra.gmra.mxu2 %v1310_v59 }
 0x301   :  { %1345 = vmatmul.bf16.vlgmr.msra.gmra.mxu3 %v1310_v59  ;;  %1358 = vmatmul.bf16.vlgmr.msrb.gmra.mxu0 %v1310_v59 }
 0x302   :  { %1585 = vmatpush.bf16.msra.mxu1 %v3753_v51  ;;  %1598 = vmatpush.bf16.msra.mxu2 %v3749_v46 }
 0x303   :  { %1611 = vmatpush.bf16.msra.mxu3 %v3751_v50  ;;  %1624 = vmatpush.bf16.msrb.mxu0 %v3756_v54 }
 0x306   :  { %1586 = vmatpush.bf16.msra.mxu1 %v3765_v63  ;;  %1599 = vmatpush.bf16.msra.mxu2 %v3761_v58 }
 0x307   :  { %1612 = vmatpush.bf16.msra.mxu3 %v3763_v62  ;;  %1625 = vmatpush.bf16.msrb.mxu0 %v3768_v2 }
 0x30a   :  { %1587 = vmatpush.bf16.msra.mxu1 %v3777_v11  ;;  %1600 = vmatpush.bf16.msra.mxu2 %v3773_v6 }
 0x30b   :  { %1613 = vmatpush.bf16.msra.mxu3 %v3775_v10  ;;  %1626 = vmatpush.bf16.msrb.mxu0 %v3780_v15 }
 0x30e   :  { %1588 = vmatpush.bf16.msra.mxu1 %v3789_v25  ;;  %1601 = vmatpush.bf16.msra.mxu2 %v3784_v20 }
 0x30f   :  { %1614 = vmatpush.bf16.msra.mxu3 %v3786_v21  ;;  %1627 = vmatpush.bf16.msrb.mxu0 %v3791_v27 }
 0x312   :  { %1589 = vmatpush.bf16.msra.mxu1 %v3806_v37  ;;  %1602 = vmatpush.bf16.msra.mxu2 %v3802_v32 }
 0x313   :  { %1615 = vmatpush.bf16.msra.mxu3 %v3804_v36  ;;  %1628 = vmatpush.bf16.msrb.mxu0 %v3810_v42 }
 0x316   :  { %1590 = vmatpush.bf16.msra.mxu1 %v3819_v56  ;;  %1603 = vmatpush.bf16.msra.mxu2 %v3814_v47 }
 0x317   :  { %1616 = vmatpush.bf16.msra.mxu3 %v3816_v48  ;;  %1629 = vmatpush.bf16.msrb.mxu0 %v3822_v0 }
 0x31a   :  { %1591 = vmatpush.bf16.msra.mxu1 %v3831_v13  ;;  %1604 = vmatpush.bf16.msra.mxu2 %v3825_v5 }
 0x31b   :  { %1617 = vmatpush.bf16.msra.mxu3 %v3829_v12  ;;  %1630 = vmatpush.bf16.msrb.mxu0 %v3834_v18 }
 0x31e   :  { %1592 = vmatpush.bf16.msra.mxu1 %v3843_v29  ;;  %1605 = vmatpush.bf16.msra.mxu2 %v3837_v24 }
 0x31f   :  { %1618 = vmatpush.bf16.msra.mxu3 %v3841_v26  ;;  %1631 = vmatpush.bf16.msrb.mxu0 %v3847_v39 }
 0x37d   :  { %v1320_v45 = vpop.f32.mrf.mxu1 }
 0x37e   :  { %v1359_v33 = vpop.f32.mrf.mxu0 }
 0x37f   :  { %v1369_v19 = vrot.slane %v1359_v33, 2 }
 0x383   :  { %v1333_v8 = vpop.f32.mrf.mxu2 }
 0x384   :  { %v1367_v31 = vrot.slane %v1333_v8, 6  ;;  %v1346_v22 = vpop.f32.mrf.mxu3 }
 0x385   :  { %v1368_v49 = vrot.slane %v1346_v22, 4  ;;  %v1322_v23 = vpop.f32.mrf.mxu1 }
 0x386   :  { %v1370_v16 = vsel %vm627_vm4, %v1320_v45, %v1367_v31  ;;  %v1361_v38 = vpop.f32.mrf.mxu0 }
 0x387   :  { %v1371_v57 = vsel %vm629_vm1, %v1368_v49, %v1369_v19 }
 0x388   :  { %v1372_v60 = vsel %vm631_vm5, %v1370_v16, %v1371_v57 }
 0x389   :  { %v1374_v43 = vadd.f32 %v1372_v60, %v647_v7 }
 0x38b   :  { %v3056_v4 = vmul.f32 -1.442695, %v1374_v43  ;;  %v1395_v28 = vrot.slane %v1374_v43, 2  ;;  %v1419_v17 = vrot.slane %v1374_v43, 6  ;;  %v1335_v53 = vpop.f32.mrf.mxu2  ;;  %v1416_v8 = vrot.slane %v1374_v43, 4 }
 0x38c   :  { %v1348_v61 = vpop.f32.mrf.mxu3 }
 0x38d   :  { %3224 = vpow2.f32 %v3056_v4  ;;  %v3057_v3 = vmul.f32 -1.442695, %v1395_v28  ;;  %v3058_v40 = vmul.f32 -1.442695, %v1419_v17 }
 0x38f   :  { %3226 = vpow2.f32 %v3057_v3 }
 0x390   :  { %3228 = vpow2.f32 %v3058_v40 }
 0x393   :  { %v3225_v9 = vpop.eup %3224 }
 0x394   :  { %v1378_v1 = vadd.f32 1.0, %v3225_v9 }
 0x395   :  { %v3227_v30 = vpop.eup %3226 }
 0x396   :  { %v3229_v35 = vpop.eup %3228  ;;  %3230 = vrcp.f32 %v1378_v1  ;;  %v1400_v44 = vadd.f32 1.0, %v3227_v30  ;;  %v1390_v49 = vand.u32 2147483648, %v1378_v1  ;;  %v1388_v38 = vand.u32 2147483647, %v1378_v1 }
 0x397   :  { %v1424_v14 = vadd.f32 1.0, %v3229_v35  ;;  %vm1384_vm3 = vweird.f32 %v1378_v1 }
 0x398   :  { %3232 = vrcp.f32 %v1400_v44  ;;  %v1412_v57 = vand.u32 2147483648, %v1400_v44  ;;  %v1410_v28 = vand.u32 2147483647, %v1400_v44  ;;  %v1391_v17 = vor.u32 1.1754944e-38, %v1390_v49 }
 0x399   :  { %3234 = vrcp.f32 %v1424_v14  ;;  %vm1389_vm8 = vcmp.eq.f32.partialorder %v1388_v38, 8.507059e+37  ;;  %vm1406_vm9 = vweird.f32 %v1400_v44  ;;  %v1436_v49 = vand.u32 2147483648, %v1424_v14 }
 0x39a   :  { %3236 = vtanh.f32 %v1416_v8  ;;  %v1413_v40 = vor.u32 1.1754944e-38, %v1412_v57  ;;  %vm1411_vm11 = vcmp.eq.f32.partialorder %v1410_v28, 8.507059e+37  ;;  %vm1430_vm13 = vweird.f32 %v1424_v14 }
 0x39c   :  { %v3231_v59 = vpop.eup %3230 }
 0x39d   :  { %v1380_v45 = vmul.f32 %v3231_v59, %v1378_v1  ;;  %vm1385_vm2 = vweird.f32 %v3231_v59 }
 0x39e   :  { %v3233_v33 = vpop.eup %3232  ;;  %vm1386_vm7 = vmor %vm1384_vm3, %vm1385_vm2 }
 0x39f   :  { %v3235_v31 = vpop.eup %3234  ;;  %v1381_v22 = vsub.f32 1.0, %v1380_v45  ;;  %v1402_v19 = vmul.f32 %v3233_v33, %v1400_v44  ;;  %vm1407_vm6 = vweird.f32 %v3233_v33  ;;  %v1434_v44 = vand.u32 2147483647, %v1424_v14 }
 0x3a0   :  { %v1426_v23 = vmul.f32 %v3235_v31, %v1424_v14  ;;  %vm1408_vm10 = vmor %vm1406_vm9, %vm1407_vm6  ;;  %v3237_v30 = vpop.eup %3236  ;;  %vm1431_vm12 = vweird.f32 %v3235_v31 }
 0x3a1   :  { %v1382_v16 = vmul.f32 %v3231_v59, %v1381_v22  ;;  %v1403_v7 = vsub.f32 1.0, %v1402_v19  ;;  %vm1432_vm14 = vmor %vm1430_vm13, %vm1431_vm12  ;;  %vm1435_vm15 = vcmp.eq.f32.partialorder %v1434_v44, 8.507059e+37 }
 0x3a2   :  { %v1427_v53 = vsub.f32 1.0, %v1426_v23  ;;  %v1437_v23 = vor.u32 1.1754944e-38, %v1436_v49 }
 0x3a3   :  { %v1383_v60 = vadd.f32 %v3231_v59, %v1382_v16  ;;  %v1404_v4 = vmul.f32 %v3233_v33, %v1403_v7 }
 0x3a4   :  { %v1428_v1 = vmul.f32 %v3235_v31, %v1427_v53 }
 0x3a5   :  { %v1387_v43 = vsel %vm1386_vm7, %v3231_v59, %v1383_v60  ;;  %v1405_v61 = vadd.f32 %v3233_v33, %v1404_v4 }
 0x3a6   :  { %v1392_v3 = vsel %vm1389_vm8, %v1391_v17, %v1387_v43  ;;  %v1429_v19 = vadd.f32 %v3235_v31, %v1428_v1 }
 0x3a7   :  { %v1409_v9 = vsel %vm1408_vm10, %v3233_v33, %v1405_v61  ;;  %v1441_v8 = vmul.f32 %v3237_v30, %v1392_v3 }
 0x3a8   :  { %v1414_v35 = vsel %vm1411_vm11, %v1413_v40, %v1409_v9  ;;  %v1433_v59 = vsel %vm1432_vm14, %v3235_v31, %v1429_v19 }
 0x3a9   :  { %v1440_v45 = vmul.f32 %v1414_v35, %v4115_v34  ;;  %v1438_v16 = vsel %vm1435_vm15, %v1437_v23, %v1433_v59 }
 0x3ab   :  { %v4155_v22 = vadd.f32 %v1441_v8, %v1440_v45 }
 0x3ad   :  { %3238 = vtanh.f32 %v4155_v22 }
 0x3b3   :  { %v3239_v33 = vpop.eup %3238 }
 0x3b4   :  { %v1444_v38 = vmul.f32 %v3239_v33, %v1438_v16 }
 0x3b6   :  { %v1447_v7 = vpack.c.bf16 %v1444_v38, %v1444_v38 }
 0x3b8   :  { %1456 = vmatmul.bf16.vlgmr.msrb.gmra.mxu1 %v1447_v7  ;;  %1469 = vmatmul.bf16.vlgmr.msrb.gmra.mxu2 %v1447_v7 }
 0x3b9   :  { %1482 = vmatmul.bf16.vlgmr.msrb.gmra.mxu3 %v1447_v7  ;;  %1495 = vmatmul.bf16.vlgmr.msra.gmra.mxu0 %v1447_v7 }
 0x3ba   :  { %1722 = vmatpush.bf16.msrb.mxu1 %v3753_v51  ;;  %1735 = vmatpush.bf16.msrb.mxu2 %v3749_v46 }
 0x3bb   :  { %1748 = vmatpush.bf16.msrb.mxu3 %v3751_v50  ;;  %1761 = vmatpush.bf16.msra.mxu0 %v3756_v54 }
 0x3be   :  { %1723 = vmatpush.bf16.msrb.mxu1 %v3765_v63  ;;  %1736 = vmatpush.bf16.msrb.mxu2 %v3761_v58 }
 0x3bf   :  { %1749 = vmatpush.bf16.msrb.mxu3 %v3763_v62  ;;  %1762 = vmatpush.bf16.msra.mxu0 %v3768_v2 }
 0x3c2   :  { %1724 = vmatpush.bf16.msrb.mxu1 %v3777_v11  ;;  %1737 = vmatpush.bf16.msrb.mxu2 %v3773_v6 }
 0x3c3   :  { %1750 = vmatpush.bf16.msrb.mxu3 %v3775_v10  ;;  %1763 = vmatpush.bf16.msra.mxu0 %v3780_v15 }
 0x3c6   :  { %1725 = vmatpush.bf16.msrb.mxu1 %v3789_v25  ;;  %1738 = vmatpush.bf16.msrb.mxu2 %v3784_v20 }
 0x3c7   :  { %1751 = vmatpush.bf16.msrb.mxu3 %v3786_v21  ;;  %1764 = vmatpush.bf16.msra.mxu0 %v3791_v27 }
 0x3ca   :  { %1726 = vmatpush.bf16.msrb.mxu1 %v3806_v37  ;;  %1739 = vmatpush.bf16.msrb.mxu2 %v3802_v32 }
 0x3cb   :  { %1752 = vmatpush.bf16.msrb.mxu3 %v3804_v36  ;;  %1765 = vmatpush.bf16.msra.mxu0 %v3810_v42 }
 0x3ce   :  { %1727 = vmatpush.bf16.msrb.mxu1 %v3819_v56  ;;  %1740 = vmatpush.bf16.msrb.mxu2 %v3814_v47 }
 0x3cf   :  { %1753 = vmatpush.bf16.msrb.mxu3 %v3816_v48  ;;  %1766 = vmatpush.bf16.msra.mxu0 %v3822_v0 }
 0x3d2   :  { %1728 = vmatpush.bf16.msrb.mxu1 %v3831_v13  ;;  %1741 = vmatpush.bf16.msrb.mxu2 %v3825_v5 }
 0x3d3   :  { %1754 = vmatpush.bf16.msrb.mxu3 %v3829_v12  ;;  %1767 = vmatpush.bf16.msra.mxu0 %v3834_v18 }
 0x3d6   :  { %1729 = vmatpush.bf16.msrb.mxu1 %v3843_v29  ;;  %1742 = vmatpush.bf16.msrb.mxu2 %v3837_v24 }
 0x3d7   :  { %1755 = vmatpush.bf16.msrb.mxu3 %v3841_v26  ;;  %1768 = vmatpush.bf16.msra.mxu0 %v3847_v39 }
 0x435   :  { %v1457_v34 = vpop.f32.mrf.mxu1 }
 0x436   :  { %v1496_v14 = vpop.f32.mrf.mxu0 }
 0x437   :  { %v1506_v4 = vrot.slane %v1496_v14, 2 }
 0x43b   :  { %v1470_v31 = vpop.f32.mrf.mxu2 }
 0x43c   :  { %v1504_v57 = vrot.slane %v1470_v31, 6  ;;  %v1483_v60 = vpop.f32.mrf.mxu3 }
 0x43d   :  { %v1505_v28 = vrot.slane %v1483_v60, 4  ;;  %v1459_v17 = vpop.f32.mrf.mxu1 }
 0x43e   :  { %v1507_v53 = vsel %vm627_vm4, %v1457_v34, %v1504_v57  ;;  %v1498_v43 = vpop.f32.mrf.mxu0 }
 0x43f   :  { %v1508_v61 = vsel %vm629_vm1, %v1505_v28, %v1506_v4 }
 0x440   :  { %v1509_v3 = vsel %vm631_vm5, %v1507_v53, %v1508_v61 }
 0x441   :  { %v1511_v40 = vadd.f32 %v1509_v3, %v3983_v41 }
 0x443   :  { %v3059_v9 = vmul.f32 -1.442695, %v1511_v40  ;;  %v1532_v30 = vrot.slane %v1511_v40, 2  ;;  %v1556_v35 = vrot.slane %v1511_v40, 6  ;;  %v1472_v1 = vpop.f32.mrf.mxu2  ;;  %v1553_v34 = vrot.slane %v1511_v40, 4 }
 0x444   :  { %v1485_v45 = vpop.f32.mrf.mxu3 }
 0x445   :  { %3240 = vpow2.f32 %v3059_v9  ;;  %v3060_v8 = vmul.f32 -1.442695, %v1532_v30  ;;  %v3061_v19 = vmul.f32 -1.442695, %v1556_v35 }
 0x447   :  { %3242 = vpow2.f32 %v3060_v8 }
 0x448   :  { %3244 = vpow2.f32 %v3061_v19 }
 0x44b   :  { %v3241_v49 = vpop.eup %3240 }
 0x44c   :  { %v1515_v44 = vadd.f32 1.0, %v3241_v49 }
 0x44d   :  { %v3243_v59 = vpop.eup %3242 }
 0x44e   :  { %v3245_v23 = vpop.eup %3244  ;;  %3246 = vrcp.f32 %v1515_v44  ;;  %v1537_v33 = vadd.f32 1.0, %v3243_v59  ;;  %v1527_v60 = vand.u32 2147483648, %v1515_v44  ;;  %v1525_v17 = vand.u32 2147483647, %v1515_v44 }
 0x44f   :  { %v1561_v16 = vadd.f32 1.0, %v3245_v23  ;;  %vm1521_vm2 = vweird.f32 %v1515_v44 }
 0x450   :  { %3248 = vrcp.f32 %v1537_v33  ;;  %v1549_v43 = vand.u32 2147483648, %v1537_v33  ;;  %v1547_v9 = vand.u32 2147483647, %v1537_v33  ;;  %v1528_v30 = vor.u32 1.1754944e-38, %v1527_v60 }
 0x451   :  { %3250 = vrcp.f32 %v1561_v16  ;;  %vm1526_vm7 = vcmp.eq.f32.partialorder %v1525_v17, 8.507059e+37  ;;  %vm1543_vm8 = vweird.f32 %v1537_v33  ;;  %vm1567_vm12 = vweird.f32 %v1561_v16 }
 0x452   :  { %3252 = vtanh.f32 %v1553_v34  ;;  %v1550_v8 = vor.u32 1.1754944e-38, %v1549_v43  ;;  %vm1548_vm10 = vcmp.eq.f32.partialorder %v1547_v9, 8.507059e+37 }
 0x454   :  { %v3247_v41 = vpop.eup %3246 }
 0x455   :  { %v1517_v38 = vmul.f32 %v3247_v41, %v1515_v44  ;;  %vm1522_vm0 = vweird.f32 %v3247_v41 }
 0x456   :  { %v3249_v7 = vpop.eup %3248  ;;  %vm1523_vm6 = vmor %vm1521_vm2, %vm1522_vm0 }
 0x457   :  { %v3251_v14 = vpop.eup %3250  ;;  %v1518_v31 = vsub.f32 1.0, %v1517_v38  ;;  %v1539_v57 = vmul.f32 %v3249_v7, %v1537_v33  ;;  %vm1544_vm3 = vweird.f32 %v3249_v7  ;;  %v1571_v33 = vand.u32 2147483647, %v1561_v16 }
 0x458   :  { %v1563_v4 = vmul.f32 %v3251_v14, %v1561_v16  ;;  %vm1545_vm9 = vmor %vm1543_vm8, %vm1544_vm3  ;;  %v3253_v49 = vpop.eup %3252  ;;  %vm1568_vm11 = vweird.f32 %v3251_v14 }
 0x459   :  { %v1519_v28 = vmul.f32 %v3247_v41, %v1518_v31  ;;  %v1540_v53 = vsub.f32 1.0, %v1539_v57  ;;  %v1573_v57 = vand.u32 2147483648, %v1561_v16  ;;  %vm1569_vm13 = vmor %vm1567_vm12, %vm1568_vm11  ;;  %vm1572_vm14 = vcmp.eq.f32.partialorder %v1571_v33, 8.507059e+37 }
 0x45a   :  { %v1564_v35 = vsub.f32 1.0, %v1563_v4 }
 0x45b   :  { %v1520_v61 = vadd.f32 %v3247_v41, %v1519_v28  ;;  %v1541_v3 = vmul.f32 %v3249_v7, %v1540_v53  ;;  %v1574_v60 = vor.u32 1.1754944e-38, %v1573_v57 }
 0x45c   :  { %v1565_v44 = vmul.f32 %v3251_v14, %v1564_v35 }
 0x45d   :  { %v1524_v40 = vsel %vm1523_vm6, %v3247_v41, %v1520_v61  ;;  %v1542_v1 = vadd.f32 %v3249_v7, %v1541_v3 }
 0x45e   :  { %v1529_v45 = vsel %vm1526_vm7, %v1528_v30, %v1524_v40  ;;  %v1566_v31 = vadd.f32 %v3251_v14, %v1565_v44  ;;  %v4520_v40 = vld [vmem:[#allocation10_spill] sm:$0xff] }
 0x45f   :  { %v1546_v19 = vsel %vm1545_vm9, %v3249_v7, %v1542_v1  ;;  %v1578_v38 = vmul.f32 %v3253_v49, %v1529_v45  ;;  %v654_v1 = vrot.slane %v4520_v40, 2 }
 0x460   :  { %v1551_v59 = vsel %vm1548_vm10, %v1550_v8, %v1546_v19  ;;  %v1570_v41 = vsel %vm1569_vm13, %v3251_v14, %v1566_v31 }
 0x461   :  { %v1577_v23 = vmul.f32 %v1551_v59, %v4155_v22  ;;  %v1575_v4 = vsel %vm1572_vm14, %v1574_v60, %v1570_v41 }
 0x463   :  { %v4195_v34 = vadd.f32 %v1578_v38, %v1577_v23 }
 0x465   :  { %3254 = vtanh.f32 %v4195_v34 }
 0x46b   :  { %v3255_v7 = vpop.eup %3254 }
 0x46c   :  { %v1581_v28 = vmul.f32 %v3255_v7, %v1575_v4 }
 0x46e   :  { %v1584_v17 = vpack.c.bf16 %v1581_v28, %v1581_v28 }
 0x470   :  { %1593 = vmatmul.bf16.vlgmr.msra.gmra.mxu1 %v1584_v17  ;;  %1606 = vmatmul.bf16.vlgmr.msra.gmra.mxu2 %v1584_v17 }
 0x471   :  { %1619 = vmatmul.bf16.vlgmr.msra.gmra.mxu3 %v1584_v17  ;;  %1632 = vmatmul.bf16.vlgmr.msrb.gmra.mxu0 %v1584_v17 }
 0x472   :  { %1859 = vmatpush.bf16.msra.mxu1 %v3753_v51  ;;  %1872 = vmatpush.bf16.msra.mxu2 %v3749_v46 }
 0x473   :  { %1885 = vmatpush.bf16.msra.mxu3 %v3751_v50  ;;  %1898 = vmatpush.bf16.msrb.mxu0 %v3756_v54 }
 0x476   :  { %1860 = vmatpush.bf16.msra.mxu1 %v3765_v63  ;;  %1873 = vmatpush.bf16.msra.mxu2 %v3761_v58 }
 0x477   :  { %1886 = vmatpush.bf16.msra.mxu3 %v3763_v62  ;;  %1899 = vmatpush.bf16.msrb.mxu0 %v3768_v2 }
 0x47a   :  { %1861 = vmatpush.bf16.msra.mxu1 %v3777_v11  ;;  %1874 = vmatpush.bf16.msra.mxu2 %v3773_v6 }
 0x47b   :  { %1887 = vmatpush.bf16.msra.mxu3 %v3775_v10  ;;  %1900 = vmatpush.bf16.msrb.mxu0 %v3780_v15 }
 0x47e   :  { %1862 = vmatpush.bf16.msra.mxu1 %v3789_v25  ;;  %1875 = vmatpush.bf16.msra.mxu2 %v3784_v20 }
 0x47f   :  { %1888 = vmatpush.bf16.msra.mxu3 %v3786_v21  ;;  %1901 = vmatpush.bf16.msrb.mxu0 %v3791_v27 }
 0x482   :  { %1863 = vmatpush.bf16.msra.mxu1 %v3806_v37  ;;  %1876 = vmatpush.bf16.msra.mxu2 %v3802_v32 }
 0x483   :  { %1889 = vmatpush.bf16.msra.mxu3 %v3804_v36  ;;  %1902 = vmatpush.bf16.msrb.mxu0 %v3810_v42 }
 0x486   :  { %1864 = vmatpush.bf16.msra.mxu1 %v3819_v56  ;;  %1877 = vmatpush.bf16.msra.mxu2 %v3814_v47 }
 0x487   :  { %1890 = vmatpush.bf16.msra.mxu3 %v3816_v48  ;;  %1903 = vmatpush.bf16.msrb.mxu0 %v3822_v0 }
 0x48a   :  { %1865 = vmatpush.bf16.msra.mxu1 %v3831_v13  ;;  %1878 = vmatpush.bf16.msra.mxu2 %v3825_v5 }
 0x48b   :  { %1891 = vmatpush.bf16.msra.mxu3 %v3829_v12  ;;  %1904 = vmatpush.bf16.msrb.mxu0 %v3834_v18 }
 0x48e   :  { %1866 = vmatpush.bf16.msra.mxu1 %v3843_v29  ;;  %1879 = vmatpush.bf16.msra.mxu2 %v3837_v24 }
 0x48f   :  { %1892 = vmatpush.bf16.msra.mxu3 %v3841_v26  ;;  %1905 = vmatpush.bf16.msrb.mxu0 %v3847_v39 }
 0x4ed   :  { %v1594_v22 = vpop.f32.mrf.mxu1 }
 0x4ee   :  { %v1633_v16 = vpop.f32.mrf.mxu0 }
 0x4ef   :  { %v1643_v61 = vrot.slane %v1633_v16, 2 }
 0x4f3   :  { %v1607_v14 = vpop.f32.mrf.mxu2 }
 0x4f4   :  { %v1641_v53 = vrot.slane %v1607_v14, 6  ;;  %v1620_v43 = vpop.f32.mrf.mxu3 }
 0x4f5   :  { %v1642_v3 = vrot.slane %v1620_v43, 4  ;;  %v1596_v9 = vpop.f32.mrf.mxu1 }
 0x4f6   :  { %v1644_v30 = vsel %vm627_vm4, %v1594_v22, %v1641_v53  ;;  %v1635_v35 = vpop.f32.mrf.mxu0 }
 0x4f7   :  { %v1645_v45 = vsel %vm629_vm1, %v1642_v3, %v1643_v61 }
 0x4f8   :  { %v1646_v8 = vsel %vm631_vm5, %v1644_v30, %v1645_v45 }
 0x4f9   :  { %v1648_v19 = vadd.f32 %v1646_v8, %v654_v1 }
 0x4fb   :  { %v3062_v49 = vmul.f32 -1.442695, %v1648_v19  ;;  %v1669_v59 = vrot.slane %v1648_v19, 2  ;;  %v1693_v44 = vrot.slane %v1648_v19, 6  ;;  %v1609_v23 = vpop.f32.mrf.mxu2  ;;  %v1690_v14 = vrot.slane %v1648_v19, 4 }
 0x4fc   :  { %v1622_v38 = vpop.f32.mrf.mxu3 }
 0x4fd   :  { %3256 = vpow2.f32 %v3062_v49  ;;  %v3063_v31 = vmul.f32 -1.442695, %v1669_v59  ;;  %v3064_v57 = vmul.f32 -1.442695, %v1693_v44 }
 0x4ff   :  { %3258 = vpow2.f32 %v3063_v31 }
 0x500   :  { %3260 = vpow2.f32 %v3064_v57 }
 0x503   :  { %v3257_v33 = vpop.eup %3256 }
 0x504   :  { %v1652_v41 = vadd.f32 1.0, %v3257_v33 }
 0x505   :  { %v3259_v60 = vpop.eup %3258 }
 0x506   :  { %v3261_v7 = vpop.eup %3260  ;;  %3262 = vrcp.f32 %v1652_v41  ;;  %v1674_v4 = vadd.f32 1.0, %v3259_v60  ;;  %v1664_v3 = vand.u32 2147483648, %v1652_v41  ;;  %v1662_v35 = vand.u32 2147483647, %v1652_v41 }
 0x507   :  { %v1698_v28 = vadd.f32 1.0, %v3261_v7  ;;  %vm1658_vm0 = vweird.f32 %v1652_v41 }
 0x508   :  { %3264 = vrcp.f32 %v1674_v4  ;;  %v1686_v1 = vand.u32 2147483648, %v1674_v4  ;;  %v1684_v49 = vand.u32 2147483647, %v1674_v4  ;;  %v1665_v59 = vor.u32 1.1754944e-38, %v1664_v3 }
 0x509   :  { %3266 = vrcp.f32 %v1698_v28  ;;  %vm1663_vm6 = vcmp.eq.f32.partialorder %v1662_v35, 8.507059e+37  ;;  %vm1680_vm7 = vweird.f32 %v1674_v4  ;;  %vm1704_vm11 = vweird.f32 %v1698_v28 }
 0x50a   :  { %3268 = vtanh.f32 %v1690_v14  ;;  %v1687_v31 = vor.u32 1.1754944e-38, %v1686_v1  ;;  %vm1685_vm9 = vcmp.eq.f32.partialorder %v1684_v49, 8.507059e+37 }
 0x50c   :  { %v3263_v17 = vpop.eup %3262 }
 0x50d   :  { %v1654_v22 = vmul.f32 %v3263_v17, %v1652_v41  ;;  %vm1659_vm15 = vweird.f32 %v3263_v17 }
 0x50e   :  { %v3265_v16 = vpop.eup %3264  ;;  %vm1660_vm3 = vmor %vm1658_vm0, %vm1659_vm15 }
 0x50f   :  { %v3267_v53 = vpop.eup %3266  ;;  %v1655_v43 = vsub.f32 1.0, %v1654_v22  ;;  %v1676_v61 = vmul.f32 %v3265_v16, %v1674_v4  ;;  %vm1681_vm2 = vweird.f32 %v3265_v16  ;;  %v1708_v4 = vand.u32 2147483647, %v1698_v28 }
 0x510   :  { %v1700_v9 = vmul.f32 %v3267_v53, %v1698_v28  ;;  %vm1682_vm8 = vmor %vm1680_vm7, %vm1681_vm2  ;;  %v3269_v33 = vpop.eup %3268  ;;  %vm1705_vm10 = vweird.f32 %v3267_v53 }
 0x511   :  { %v1656_v30 = vmul.f32 %v3263_v17, %v1655_v43  ;;  %v1677_v40 = vsub.f32 1.0, %v1676_v61  ;;  %v1710_v61 = vand.u32 2147483648, %v1698_v28  ;;  %vm1706_vm12 = vmor %vm1704_vm11, %vm1705_vm10  ;;  %vm1709_vm13 = vcmp.eq.f32.partialorder %v1708_v4, 8.507059e+37 }
 0x512   :  { %v1701_v44 = vsub.f32 1.0, %v1700_v9 }
 0x513   :  { %v1657_v45 = vadd.f32 %v3263_v17, %v1656_v30  ;;  %v1678_v8 = vmul.f32 %v3265_v16, %v1677_v40  ;;  %v1711_v3 = vor.u32 1.1754944e-38, %v1710_v61 }
 0x514   :  { %v1702_v41 = vmul.f32 %v3267_v53, %v1701_v44 }
 0x515   :  { %v1661_v19 = vsel %vm1660_vm3, %v3263_v17, %v1657_v45  ;;  %v1679_v23 = vadd.f32 %v3265_v16, %v1678_v8 }
 0x516   :  { %v1666_v38 = vsel %vm1663_vm6, %v1665_v59, %v1661_v19  ;;  %v1703_v43 = vadd.f32 %v3267_v53, %v1702_v41  ;;  %v4521_v19 = vld [vmem:[#allocation11_spill] sm:$0xff] }
 0x517   :  { %v1683_v57 = vsel %vm1682_vm8, %v3265_v16, %v1679_v23  ;;  %v1715_v22 = vmul.f32 %v3269_v33, %v1666_v38  ;;  %v658_v23 = vrot.slane %v4521_v19, 4 }
 0x518   :  { %v1688_v60 = vsel %vm1685_vm9, %v1687_v31, %v1683_v57  ;;  %v1707_v17 = vsel %vm1706_vm12, %v3267_v53, %v1703_v43 }
 0x519   :  { %v1714_v7 = vmul.f32 %v1688_v60, %v4195_v34  ;;  %v1712_v9 = vsel %vm1709_vm13, %v1711_v3, %v1707_v17 }
 0x51b   :  { %v4235_v14 = vadd.f32 %v1715_v22, %v1714_v7 }
 0x51d   :  { %3270 = vtanh.f32 %v4235_v14 }
 0x523   :  { %v3271_v16 = vpop.eup %3270 }
 0x524   :  { %v1718_v30 = vmul.f32 %v3271_v16, %v1712_v9 }
 0x526   :  { %v1721_v35 = vpack.c.bf16 %v1718_v30, %v1718_v30 }
 0x528   :  { %1730 = vmatmul.bf16.vlgmr.msrb.gmra.mxu1 %v1721_v35  ;;  %1743 = vmatmul.bf16.vlgmr.msrb.gmra.mxu2 %v1721_v35 }
 0x529   :  { %1756 = vmatmul.bf16.vlgmr.msrb.gmra.mxu3 %v1721_v35  ;;  %1769 = vmatmul.bf16.vlgmr.msra.gmra.mxu0 %v1721_v35 }
 0x52a   :  { %1996 = vmatpush.bf16.msrb.mxu1 %v3753_v51  ;;  %2009 = vmatpush.bf16.msrb.mxu2 %v3749_v46 }
 0x52b   :  { %2022 = vmatpush.bf16.msrb.mxu3 %v3751_v50  ;;  %2035 = vmatpush.bf16.msra.mxu0 %v3756_v54 }
 0x52e   :  { %1997 = vmatpush.bf16.msrb.mxu1 %v3765_v63  ;;  %2010 = vmatpush.bf16.msrb.mxu2 %v3761_v58 }
 0x52f   :  { %2023 = vmatpush.bf16.msrb.mxu3 %v3763_v62  ;;  %2036 = vmatpush.bf16.msra.mxu0 %v3768_v2 }
 0x532   :  { %1998 = vmatpush.bf16.msrb.mxu1 %v3777_v11  ;;  %2011 = vmatpush.bf16.msrb.mxu2 %v3773_v6 }
 0x533   :  { %2024 = vmatpush.bf16.msrb.mxu3 %v3775_v10  ;;  %2037 = vmatpush.bf16.msra.mxu0 %v3780_v15 }
 0x536   :  { %1999 = vmatpush.bf16.msrb.mxu1 %v3789_v25  ;;  %2012 = vmatpush.bf16.msrb.mxu2 %v3784_v20 }
 0x537   :  { %2025 = vmatpush.bf16.msrb.mxu3 %v3786_v21  ;;  %2038 = vmatpush.bf16.msra.mxu0 %v3791_v27 }
 0x53a   :  { %2000 = vmatpush.bf16.msrb.mxu1 %v3806_v37  ;;  %2013 = vmatpush.bf16.msrb.mxu2 %v3802_v32 }
 0x53b   :  { %2026 = vmatpush.bf16.msrb.mxu3 %v3804_v36  ;;  %2039 = vmatpush.bf16.msra.mxu0 %v3810_v42 }
 0x53e   :  { %2001 = vmatpush.bf16.msrb.mxu1 %v3819_v56  ;;  %2014 = vmatpush.bf16.msrb.mxu2 %v3814_v47 }
 0x53f   :  { %2027 = vmatpush.bf16.msrb.mxu3 %v3816_v48  ;;  %2040 = vmatpush.bf16.msra.mxu0 %v3822_v0 }
 0x542   :  { %2002 = vmatpush.bf16.msrb.mxu1 %v3831_v13  ;;  %2015 = vmatpush.bf16.msrb.mxu2 %v3825_v5 }
 0x543   :  { %2028 = vmatpush.bf16.msrb.mxu3 %v3829_v12  ;;  %2041 = vmatpush.bf16.msra.mxu0 %v3834_v18 }
 0x546   :  { %2003 = vmatpush.bf16.msrb.mxu1 %v3843_v29  ;;  %2016 = vmatpush.bf16.msrb.mxu2 %v3837_v24 }
 0x547   :  { %2029 = vmatpush.bf16.msrb.mxu3 %v3841_v26  ;;  %2042 = vmatpush.bf16.msra.mxu0 %v3847_v39 }
 0x5a5   :  { %v1731_v34 = vpop.f32.mrf.mxu1 }
 0x5a6   :  { %v1770_v28 = vpop.f32.mrf.mxu0 }
 0x5a7   :  { %v1780_v45 = vrot.slane %v1770_v28, 2 }
 0x5ab   :  { %v1744_v53 = vpop.f32.mrf.mxu2 }
 0x5ac   :  { %v1778_v40 = vrot.slane %v1744_v53, 6  ;;  %v1757_v1 = vpop.f32.mrf.mxu3 }
 0x5ad   :  { %v1779_v8 = vrot.slane %v1757_v1, 4  ;;  %v1733_v49 = vpop.f32.mrf.mxu1 }
 0x5ae   :  { %v1781_v59 = vsel %vm627_vm4, %v1731_v34, %v1778_v40  ;;  %v1772_v44 = vpop.f32.mrf.mxu0 }
 0x5af   :  { %v1782_v38 = vsel %vm629_vm1, %v1779_v8, %v1780_v45 }
 0x5b0   :  { %v1783_v31 = vsel %vm631_vm5, %v1781_v59, %v1782_v38 }
 0x5b1   :  { %v1785_v57 = vadd.f32 %v1783_v31, %v658_v23 }
 0x5b3   :  { %v3065_v33 = vmul.f32 -1.442695, %v1785_v57  ;;  %v1806_v60 = vrot.slane %v1785_v57, 2  ;;  %v1830_v41 = vrot.slane %v1785_v57, 6  ;;  %v1746_v7 = vpop.f32.mrf.mxu2  ;;  %v1827_v53 = vrot.slane %v1785_v57, 4 }
 0x5b4   :  { %v1759_v22 = vpop.f32.mrf.mxu3 }
 0x5b5   :  { %3272 = vpow2.f32 %v3065_v33  ;;  %v3066_v43 = vmul.f32 -1.442695, %v1806_v60  ;;  %v3067_v61 = vmul.f32 -1.442695, %v1830_v41 }
 0x5b7   :  { %3274 = vpow2.f32 %v3066_v43 }
 0x5b8   :  { %3276 = vpow2.f32 %v3067_v61 }
 0x5bb   :  { %v3273_v4 = vpop.eup %3272 }
 0x5bc   :  { %v1789_v17 = vadd.f32 1.0, %v3273_v4 }
 0x5bd   :  { %v3275_v3 = vpop.eup %3274 }
 0x5be   :  { %v3277_v16 = vpop.eup %3276  ;;  %3278 = vrcp.f32 %v1789_v17  ;;  %v1811_v9 = vadd.f32 1.0, %v3275_v3  ;;  %v1801_v8 = vand.u32 2147483648, %v1789_v17  ;;  %v1799_v44 = vand.u32 2147483647, %v1789_v17 }
 0x5bf   :  { %v1835_v30 = vadd.f32 1.0, %v3277_v16  ;;  %vm1795_vm15 = vweird.f32 %v1789_v17 }
 0x5c0   :  { %3280 = vrcp.f32 %v1811_v9  ;;  %v1823_v23 = vand.u32 2147483648, %v1811_v9  ;;  %v1821_v33 = vand.u32 2147483647, %v1811_v9  ;;  %v1802_v60 = vor.u32 1.1754944e-38, %v1801_v8 }
 0x5c1   :  { %3282 = vrcp.f32 %v1835_v30  ;;  %vm1800_vm3 = vcmp.eq.f32.partialorder %v1799_v44, 8.507059e+37  ;;  %vm1817_vm6 = vweird.f32 %v1811_v9  ;;  %vm1841_vm10 = vweird.f32 %v1835_v30 }
 0x5c2   :  { %3284 = vtanh.f32 %v1827_v53  ;;  %v1824_v43 = vor.u32 1.1754944e-38, %v1823_v23  ;;  %vm1822_vm8 = vcmp.eq.f32.partialorder %v1821_v33, 8.507059e+37 }
 0x5c4   :  { %v3279_v35 = vpop.eup %3278 }
 0x5c5   :  { %v1791_v34 = vmul.f32 %v3279_v35, %v1789_v17  ;;  %vm1796_vm14 = vweird.f32 %v3279_v35 }
 0x5c6   :  { %v3281_v28 = vpop.eup %3280  ;;  %vm1797_vm2 = vmor %vm1795_vm15, %vm1796_vm14 }
 0x5c7   :  { %v3283_v40 = vpop.eup %3282  ;;  %v1792_v1 = vsub.f32 1.0, %v1791_v34  ;;  %v1813_v45 = vmul.f32 %v3281_v28, %v1811_v9  ;;  %vm1818_vm0 = vweird.f32 %v3281_v28  ;;  %v1845_v9 = vand.u32 2147483647, %v1835_v30 }
 0x5c8   :  { %v1837_v49 = vmul.f32 %v3283_v40, %v1835_v30  ;;  %vm1819_vm7 = vmor %vm1817_vm6, %vm1818_vm0  ;;  %v3285_v4 = vpop.eup %3284  ;;  %vm1842_vm9 = vweird.f32 %v3283_v40 }
 0x5c9   :  { %v1793_v59 = vmul.f32 %v3279_v35, %v1792_v1  ;;  %v1814_v19 = vsub.f32 1.0, %v1813_v45  ;;  %v1847_v45 = vand.u32 2147483648, %v1835_v30  ;;  %vm1843_vm11 = vmor %vm1841_vm10, %vm1842_vm9  ;;  %vm1846_vm12 = vcmp.eq.f32.partialorder %v1845_v9, 8.507059e+37 }
 0x5ca   :  { %v1838_v41 = vsub.f32 1.0, %v1837_v49 }
 0x5cb   :  { %v1794_v38 = vadd.f32 %v3279_v35, %v1793_v59  ;;  %v1815_v31 = vmul.f32 %v3281_v28, %v1814_v19  ;;  %v1848_v8 = vor.u32 1.1754944e-38, %v1847_v45 }
 0x5cc   :  { %v1839_v17 = vmul.f32 %v3283_v40, %v1838_v41 }
 0x5cd   :  { %v1798_v57 = vsel %vm1797_vm2, %v3279_v35, %v1794_v38  ;;  %v1816_v7 = vadd.f32 %v3281_v28, %v1815_v31 }
 0x5ce   :  { %v1803_v22 = vsel %vm1800_vm3, %v1802_v60, %v1798_v57  ;;  %v1840_v1 = vadd.f32 %v3283_v40, %v1839_v17  ;;  %v4522_v57 = vld [vmem:[#allocation12_spill] sm:$0xff] }
 0x5cf   :  { %v1820_v61 = vsel %vm1819_vm7, %v3281_v28, %v1816_v7  ;;  %v1852_v34 = vmul.f32 %v3285_v4, %v1803_v22  ;;  %v662_v7 = vrot.slane %v4522_v57, 6 }
 0x5d0   :  { %v1825_v3 = vsel %vm1822_vm8, %v1824_v43, %v1820_v61  ;;  %v1844_v35 = vsel %vm1843_vm11, %v3283_v40, %v1840_v1 }
 0x5d1   :  { %v1851_v16 = vmul.f32 %v1825_v3, %v4235_v14  ;;  %v1849_v49 = vsel %vm1846_vm12, %v1848_v8, %v1844_v35 }
 0x5d3   :  { %v4275_v53 = vadd.f32 %v1852_v34, %v1851_v16 }
 0x5d5   :  { %3286 = vtanh.f32 %v4275_v53 }
 0x5db   :  { %v3287_v28 = vpop.eup %3286 }
 0x5dc   :  { %v1855_v59 = vmul.f32 %v3287_v28, %v1849_v49 }
 0x5de   :  { %v1858_v44 = vpack.c.bf16 %v1855_v59, %v1855_v59 }
 0x5e0   :  { %1867 = vmatmul.bf16.vlgmr.msra.gmra.mxu1 %v1858_v44  ;;  %1880 = vmatmul.bf16.vlgmr.msra.gmra.mxu2 %v1858_v44 }
 0x5e1   :  { %1893 = vmatmul.bf16.vlgmr.msra.gmra.mxu3 %v1858_v44  ;;  %1906 = vmatmul.bf16.vlgmr.msrb.gmra.mxu0 %v1858_v44 }
 0x5e2   :  { %2133 = vmatpush.bf16.msra.mxu1 %v3753_v51  ;;  %2146 = vmatpush.bf16.msra.mxu2 %v3749_v46 }
 0x5e3   :  { %2159 = vmatpush.bf16.msra.mxu3 %v3751_v50  ;;  %2172 = vmatpush.bf16.msrb.mxu0 %v3756_v54 }
 0x5e6   :  { %2134 = vmatpush.bf16.msra.mxu1 %v3765_v63  ;;  %2147 = vmatpush.bf16.msra.mxu2 %v3761_v58 }
 0x5e7   :  { %2160 = vmatpush.bf16.msra.mxu3 %v3763_v62  ;;  %2173 = vmatpush.bf16.msrb.mxu0 %v3768_v2 }
 0x5ea   :  { %2135 = vmatpush.bf16.msra.mxu1 %v3777_v11  ;;  %2148 = vmatpush.bf16.msra.mxu2 %v3773_v6 }
 0x5eb   :  { %2161 = vmatpush.bf16.msra.mxu3 %v3775_v10  ;;  %2174 = vmatpush.bf16.msrb.mxu0 %v3780_v15 }
 0x5ee   :  { %2136 = vmatpush.bf16.msra.mxu1 %v3789_v25  ;;  %2149 = vmatpush.bf16.msra.mxu2 %v3784_v20 }
 0x5ef   :  { %2162 = vmatpush.bf16.msra.mxu3 %v3786_v21  ;;  %2175 = vmatpush.bf16.msrb.mxu0 %v3791_v27 }
 0x5f2   :  { %2137 = vmatpush.bf16.msra.mxu1 %v3806_v37  ;;  %2150 = vmatpush.bf16.msra.mxu2 %v3802_v32 }
 0x5f3   :  { %2163 = vmatpush.bf16.msra.mxu3 %v3804_v36  ;;  %2176 = vmatpush.bf16.msrb.mxu0 %v3810_v42 }
 0x5f6   :  { %2138 = vmatpush.bf16.msra.mxu1 %v3819_v56  ;;  %2151 = vmatpush.bf16.msra.mxu2 %v3814_v47 }
 0x5f7   :  { %2164 = vmatpush.bf16.msra.mxu3 %v3816_v48  ;;  %2177 = vmatpush.bf16.msrb.mxu0 %v3822_v0 }
 0x5fa   :  { %2139 = vmatpush.bf16.msra.mxu1 %v3831_v13  ;;  %2152 = vmatpush.bf16.msra.mxu2 %v3825_v5 }
 0x5fb   :  { %2165 = vmatpush.bf16.msra.mxu3 %v3829_v12  ;;  %2178 = vmatpush.bf16.msrb.mxu0 %v3834_v18 }
 0x5fe   :  { %2140 = vmatpush.bf16.msra.mxu1 %v3843_v29  ;;  %2153 = vmatpush.bf16.msra.mxu2 %v3837_v24 }
 0x5ff   :  { %2166 = vmatpush.bf16.msra.mxu3 %v3841_v26  ;;  %2179 = vmatpush.bf16.msrb.mxu0 %v3847_v39 }
 0x65d   :  { %v1868_v14 = vpop.f32.mrf.mxu1 }
 0x65e   :  { %v1907_v30 = vpop.f32.mrf.mxu0 }
 0x65f   :  { %v1917_v38 = vrot.slane %v1907_v30, 2 }
 0x663   :  { %v1881_v40 = vpop.f32.mrf.mxu2 }
 0x664   :  { %v1915_v19 = vrot.slane %v1881_v40, 6  ;;  %v1894_v23 = vpop.f32.mrf.mxu3 }
 0x665   :  { %v1916_v31 = vrot.slane %v1894_v23, 4  ;;  %v1870_v33 = vpop.f32.mrf.mxu1 }
 0x666   :  { %v1918_v60 = vsel %vm627_vm4, %v1868_v14, %v1915_v19  ;;  %v1909_v41 = vpop.f32.mrf.mxu0 }
 0x667   :  { %v1919_v22 = vsel %vm629_vm1, %v1916_v31, %v1917_v38 }
 0x668   :  { %v1920_v43 = vsel %vm631_vm5, %v1918_v60, %v1919_v22 }
 0x669   :  { %v1922_v61 = vadd.f32 %v1920_v43, %v662_v7 }
 0x66b   :  { %v3068_v4 = vmul.f32 -1.442695, %v1922_v61  ;;  %v1943_v3 = vrot.slane %v1922_v61, 2  ;;  %v1967_v17 = vrot.slane %v1922_v61, 6  ;;  %v1883_v16 = vpop.f32.mrf.mxu2  ;;  %v1964_v40 = vrot.slane %v1922_v61, 4 }
 0x66c   :  { %v1896_v34 = vpop.f32.mrf.mxu3 }
 0x66d   :  { %3288 = vpow2.f32 %v3068_v4  ;;  %v3069_v1 = vmul.f32 -1.442695, %v1943_v3  ;;  %v3070_v45 = vmul.f32 -1.442695, %v1967_v17 }
 0x66f   :  { %3290 = vpow2.f32 %v3069_v1 }
 0x670   :  { %3292 = vpow2.f32 %v3070_v45 }
 0x673   :  { %v3289_v9 = vpop.eup %3288 }
 0x674   :  { %v1926_v35 = vadd.f32 1.0, %v3289_v9 }
 0x675   :  { %v3291_v8 = vpop.eup %3290 }
 0x676   :  { %v3293_v28 = vpop.eup %3292  ;;  %3294 = vrcp.f32 %v1926_v35  ;;  %v1948_v49 = vadd.f32 1.0, %v3291_v8  ;;  %v1938_v31 = vand.u32 2147483648, %v1926_v35  ;;  %v1936_v41 = vand.u32 2147483647, %v1926_v35 }
 0x677   :  { %v1972_v59 = vadd.f32 1.0, %v3293_v28  ;;  %vm1932_vm14 = vweird.f32 %v1926_v35 }
 0x678   :  { %3296 = vrcp.f32 %v1948_v49  ;;  %v1960_v7 = vand.u32 2147483648, %v1948_v49  ;;  %v1958_v4 = vand.u32 2147483647, %v1948_v49  ;;  %v1939_v3 = vor.u32 1.1754944e-38, %v1938_v31 }
 0x679   :  { %3298 = vrcp.f32 %v1972_v59  ;;  %vm1937_vm2 = vcmp.eq.f32.partialorder %v1936_v41, 8.507059e+37  ;;  %vm1954_vm3 = vweird.f32 %v1948_v49  ;;  %vm1978_vm9 = vweird.f32 %v1972_v59 }
 0x67a   :  { %3300 = vtanh.f32 %v1964_v40  ;;  %v1961_v1 = vor.u32 1.1754944e-38, %v1960_v7  ;;  %vm1959_vm7 = vcmp.eq.f32.partialorder %v1958_v4, 8.507059e+37 }
 0x67c   :  { %v3295_v44 = vpop.eup %3294 }
 0x67d   :  { %v1928_v14 = vmul.f32 %v3295_v44, %v1926_v35  ;;  %vm1933_vm13 = vweird.f32 %v3295_v44 }
 0x67e   :  { %v3297_v30 = vpop.eup %3296  ;;  %vm1934_vm0 = vmor %vm1932_vm14, %vm1933_vm13 }
 0x67f   :  { %v3299_v19 = vpop.eup %3298  ;;  %v1929_v23 = vsub.f32 1.0, %v1928_v14  ;;  %v1950_v38 = vmul.f32 %v3297_v30, %v1948_v49  ;;  %vm1955_vm15 = vweird.f32 %v3297_v30  ;;  %v1982_v49 = vand.u32 2147483647, %v1972_v59 }
 0x680   :  { %v1974_v33 = vmul.f32 %v3299_v19, %v1972_v59  ;;  %vm1956_vm6 = vmor %vm1954_vm3, %vm1955_vm15  ;;  %v3301_v9 = vpop.eup %3300  ;;  %vm1979_vm8 = vweird.f32 %v3299_v19 }
 0x681   :  { %v1930_v60 = vmul.f32 %v3295_v44, %v1929_v23  ;;  %v1951_v57 = vsub.f32 1.0, %v1950_v38  ;;  %v1984_v38 = vand.u32 2147483648, %v1972_v59  ;;  %vm1980_vm10 = vmor %vm1978_vm9, %vm1979_vm8  ;;  %vm1983_vm11 = vcmp.eq.f32.partialorder %v1982_v49, 8.507059e+37 }
 0x682   :  { %v1975_v17 = vsub.f32 1.0, %v1974_v33 }
 0x683   :  { %v1931_v22 = vadd.f32 %v3295_v44, %v1930_v60  ;;  %v1952_v43 = vmul.f32 %v3297_v30, %v1951_v57  ;;  %v1985_v31 = vor.u32 1.1754944e-38, %v1984_v38 }
 0x684   :  { %v1976_v35 = vmul.f32 %v3299_v19, %v1975_v17 }
 0x685   :  { %v1935_v61 = vsel %vm1934_vm0, %v3295_v44, %v1931_v22  ;;  %v1953_v16 = vadd.f32 %v3297_v30, %v1952_v43 }
 0x686   :  { %v1940_v34 = vsel %vm1937_vm2, %v1939_v3, %v1935_v61  ;;  %v1977_v23 = vadd.f32 %v3299_v19, %v1976_v35 }
 0x687   :  { %v1957_v45 = vsel %vm1956_vm6, %v3297_v30, %v1953_v16  ;;  %v1989_v14 = vmul.f32 %v3301_v9, %v1940_v34 }
 0x688   :  { %v1962_v8 = vsel %vm1959_vm7, %v1961_v1, %v1957_v45  ;;  %v1981_v44 = vsel %vm1980_vm10, %v3299_v19, %v1977_v23 }
 0x689   :  { %v1988_v28 = vmul.f32 %v1962_v8, %v4275_v53  ;;  %v1986_v33 = vsel %vm1983_vm11, %v1985_v31, %v1981_v44 }
 0x68b   :  { %v4315_v40 = vadd.f32 %v1989_v14, %v1988_v28 }
 0x68d   :  { %3302 = vtanh.f32 %v4315_v40 }
 0x693   :  { %v3303_v30 = vpop.eup %3302 }
 0x694   :  { %v1992_v60 = vmul.f32 %v3303_v30, %v1986_v33 }
 0x696   :  { %v1995_v41 = vpack.c.bf16 %v1992_v60, %v1992_v60 }
 0x698   :  { %2004 = vmatmul.bf16.vlgmr.msrb.gmra.mxu1 %v1995_v41  ;;  %2017 = vmatmul.bf16.vlgmr.msrb.gmra.mxu2 %v1995_v41 }
 0x699   :  { %2030 = vmatmul.bf16.vlgmr.msrb.gmra.mxu3 %v1995_v41  ;;  %2043 = vmatmul.bf16.vlgmr.msra.gmra.mxu0 %v1995_v41 }
 0x69a   :  { %2270 = vmatpush.bf16.msrb.mxu1 %v3753_v51  ;;  %2283 = vmatpush.bf16.msrb.mxu2 %v3749_v46 }
 0x69b   :  { %2296 = vmatpush.bf16.msrb.mxu3 %v3751_v50  ;;  %2309 = vmatpush.bf16.msra.mxu0 %v3756_v54 }
 0x69e   :  { %2271 = vmatpush.bf16.msrb.mxu1 %v3765_v63  ;;  %2284 = vmatpush.bf16.msrb.mxu2 %v3761_v58 }
 0x69f   :  { %2297 = vmatpush.bf16.msrb.mxu3 %v3763_v62  ;;  %2310 = vmatpush.bf16.msra.mxu0 %v3768_v2 }
 0x6a2   :  { %2272 = vmatpush.bf16.msrb.mxu1 %v3777_v11  ;;  %2285 = vmatpush.bf16.msrb.mxu2 %v3773_v6 }
 0x6a3   :  { %2298 = vmatpush.bf16.msrb.mxu3 %v3775_v10  ;;  %2311 = vmatpush.bf16.msra.mxu0 %v3780_v15 }
 0x6a6   :  { %2273 = vmatpush.bf16.msrb.mxu1 %v3789_v25  ;;  %2286 = vmatpush.bf16.msrb.mxu2 %v3784_v20 }
 0x6a7   :  { %2299 = vmatpush.bf16.msrb.mxu3 %v3786_v21  ;;  %2312 = vmatpush.bf16.msra.mxu0 %v3791_v27 }
 0x6aa   :  { %2274 = vmatpush.bf16.msrb.mxu1 %v3806_v37  ;;  %2287 = vmatpush.bf16.msrb.mxu2 %v3802_v32 }
 0x6ab   :  { %2300 = vmatpush.bf16.msrb.mxu3 %v3804_v36  ;;  %2313 = vmatpush.bf16.msra.mxu0 %v3810_v42 }
 0x6ae   :  { %2275 = vmatpush.bf16.msrb.mxu1 %v3819_v56  ;;  %2288 = vmatpush.bf16.msrb.mxu2 %v3814_v47 }
 0x6af   :  { %2301 = vmatpush.bf16.msrb.mxu3 %v3816_v48  ;;  %2314 = vmatpush.bf16.msra.mxu0 %v3822_v0 }
 0x6b2   :  { %2276 = vmatpush.bf16.msrb.mxu1 %v3831_v13  ;;  %2289 = vmatpush.bf16.msrb.mxu2 %v3825_v5 }
 0x6b3   :  { %2302 = vmatpush.bf16.msrb.mxu3 %v3829_v12  ;;  %2315 = vmatpush.bf16.msra.mxu0 %v3834_v18 }
 0x6b6   :  { %2277 = vmatpush.bf16.msrb.mxu1 %v3843_v29  ;;  %2290 = vmatpush.bf16.msrb.mxu2 %v3837_v24 }
 0x6b7   :  { %2303 = vmatpush.bf16.msrb.mxu3 %v3841_v26  ;;  %2316 = vmatpush.bf16.msra.mxu0 %v3847_v39 }
 0x715   :  { %v2005_v53 = vpop.f32.mrf.mxu1 }
 0x716   :  { %v2044_v59 = vpop.f32.mrf.mxu0 }
 0x717   :  { %v2054_v22 = vrot.slane %v2044_v59, 2 }
 0x71b   :  { %v2018_v19 = vpop.f32.mrf.mxu2 }
 0x71c   :  { %v2052_v57 = vrot.slane %v2018_v19, 6  ;;  %v2031_v7 = vpop.f32.mrf.mxu3 }
 0x71d   :  { %v2053_v43 = vrot.slane %v2031_v7, 4  ;;  %v2007_v4 = vpop.f32.mrf.mxu1 }
 0x71e   :  { %v2055_v3 = vsel %vm627_vm4, %v2005_v53, %v2052_v57  ;;  %v2046_v17 = vpop.f32.mrf.mxu0 }
 0x71f   :  { %v2056_v61 = vsel %vm629_vm1, %v2053_v43, %v2054_v22 }
 0x720   :  { %v2057_v16 = vsel %vm631_vm5, %v2055_v3, %v2056_v61 }
 0x721   :  { %v2059_v34 = vadd.f32 %v2057_v16, %v4005_v52 }
 0x723   :  { %v3071_v1 = vmul.f32 -1.442695, %v2059_v34  ;;  %v2080_v45 = vrot.slane %v2059_v34, 2  ;;  %v2104_v9 = vrot.slane %v2059_v34, 6  ;;  %v2020_v8 = vpop.f32.mrf.mxu2  ;;  %v2101_v41 = vrot.slane %v2059_v34, 4 }
 0x724   :  { %v2033_v35 = vpop.f32.mrf.mxu3 }
 0x725   :  { %3304 = vpow2.f32 %v3071_v1  ;;  %v3072_v28 = vmul.f32 -1.442695, %v2080_v45  ;;  %v3073_v14 = vmul.f32 -1.442695, %v2104_v9 }
 0x727   :  { %3306 = vpow2.f32 %v3072_v28 }
 0x728   :  { %3308 = vpow2.f32 %v3073_v14 }
 0x72b   :  { %v3305_v23 = vpop.eup %3304 }
 0x72c   :  { %v2063_v38 = vadd.f32 1.0, %v3305_v23 }
 0x72d   :  { %v3307_v49 = vpop.eup %3306 }
 0x72e   :  { %v3309_v44 = vpop.eup %3308  ;;  %3310 = vrcp.f32 %v2063_v38  ;;  %v2085_v31 = vadd.f32 1.0, %v3307_v49  ;;  %v2075_v57 = vand.u32 2147483648, %v2063_v38  ;;  %v2073_v43 = vand.u32 2147483647, %v2063_v38 }
 0x72f   :  { %v2109_v30 = vadd.f32 1.0, %v3309_v44  ;;  %vm2069_vm13 = vweird.f32 %v2063_v38 }
 0x730   :  { %3312 = vrcp.f32 %v2085_v31  ;;  %v2097_v3 = vand.u32 2147483648, %v2085_v31  ;;  %v2095_v16 = vand.u32 2147483647, %v2085_v31  ;;  %v2076_v1 = vor.u32 1.1754944e-38, %v2075_v57 }
 0x731   :  { %3314 = vrcp.f32 %v2109_v30  ;;  %vm2074_vm0 = vcmp.eq.f32.partialorder %v2073_v43, 8.507059e+37  ;;  %vm2091_vm2 = vweird.f32 %v2085_v31  ;;  %vm2115_vm8 = vweird.f32 %v2109_v30 }
 0x732   :  { %3316 = vtanh.f32 %v2101_v41  ;;  %v2098_v35 = vor.u32 1.1754944e-38, %v2097_v3  ;;  %vm2096_vm6 = vcmp.eq.f32.partialorder %v2095_v16, 8.507059e+37 }
 0x734   :  { %v3311_v52 = vpop.eup %3310 }
 0x735   :  { %v2065_v33 = vmul.f32 %v3311_v52, %v2063_v38  ;;  %vm2070_vm12 = vweird.f32 %v3311_v52 }
 0x736   :  { %v3313_v60 = vpop.eup %3312  ;;  %vm2071_vm15 = vmor %vm2069_vm13, %vm2070_vm12 }
 0x737   :  { %v3315_v53 = vpop.eup %3314  ;;  %v2066_v59 = vsub.f32 1.0, %v2065_v33  ;;  %v2087_v19 = vmul.f32 %v3313_v60, %v2085_v31  ;;  %vm2092_vm14 = vweird.f32 %v3313_v60  ;;  %v2119_v31 = vand.u32 2147483647, %v2109_v30 }
 0x738   :  { %v2111_v7 = vmul.f32 %v3315_v53, %v2109_v30  ;;  %vm2093_vm3 = vmor %vm2091_vm2, %vm2092_vm14  ;;  %v3317_v14 = vpop.eup %3316  ;;  %vm2116_vm7 = vweird.f32 %v3315_v53 }
 0x739   :  { %v2067_v22 = vmul.f32 %v3311_v52, %v2066_v59  ;;  %v2088_v4 = vsub.f32 1.0, %v2087_v19  ;;  %v2121_v59 = vand.u32 2147483648, %v2109_v30  ;;  %vm2117_vm9 = vmor %vm2115_vm8, %vm2116_vm7  ;;  %vm2120_vm10 = vcmp.eq.f32.partialorder %v2119_v31, 8.507059e+37 }
 0x73a   :  { %v2112_v45 = vsub.f32 1.0, %v2111_v7 }
 0x73b   :  { %v2068_v17 = vadd.f32 %v3311_v52, %v2067_v22  ;;  %v2089_v61 = vmul.f32 %v3313_v60, %v2088_v4  ;;  %v2122_v19 = vor.u32 1.1754944e-38, %v2121_v59 }
 0x73c   :  { %v2113_v38 = vmul.f32 %v3315_v53, %v2112_v45  ;;  %v4523_v45 = vld [vmem:[#allocation13_spill] sm:$0xff] }
 0x73d   :  { %v2072_v34 = vsel %vm2071_vm15, %v3311_v52, %v2068_v17  ;;  %v2090_v9 = vadd.f32 %v3313_v60, %v2089_v61 }
 0x73e   :  { %v2077_v8 = vsel %vm2074_vm0, %v2076_v1, %v2072_v34  ;;  %v2114_v41 = vadd.f32 %v3315_v53, %v2113_v38  ;;  %v669_v34 = vrot.slane %v4523_v45, 2 }
 0x73f   :  { %v2094_v28 = vsel %vm2093_vm3, %v3313_v60, %v2090_v9  ;;  %v2126_v44 = vmul.f32 %v3317_v14, %v2077_v8 }
 0x740   :  { %v2099_v23 = vsel %vm2096_vm6, %v2098_v35, %v2094_v28  ;;  %v2118_v52 = vsel %vm2117_vm9, %v3315_v53, %v2114_v41 }
 0x741   :  { %v2125_v49 = vmul.f32 %v2099_v23, %v4315_v40  ;;  %v2123_v57 = vsel %vm2120_vm10, %v2122_v19, %v2118_v52 }
 0x743   :  { %v4355_v33 = vadd.f32 %v2126_v44, %v2125_v49 }
 0x745   :  { %3318 = vtanh.f32 %v4355_v33 }
 0x74b   :  { %v3319_v60 = vpop.eup %3318 }
 0x74c   :  { %v2129_v7 = vmul.f32 %v3319_v60, %v2123_v57 }
 0x74e   :  { %v2132_v22 = vpack.c.bf16 %v2129_v7, %v2129_v7 }
 0x750   :  { %2141 = vmatmul.bf16.vlgmr.msra.gmra.mxu1 %v2132_v22  ;;  %2154 = vmatmul.bf16.vlgmr.msra.gmra.mxu2 %v2132_v22 }
 0x751   :  { %2167 = vmatmul.bf16.vlgmr.msra.gmra.mxu3 %v2132_v22  ;;  %2180 = vmatmul.bf16.vlgmr.msrb.gmra.mxu0 %v2132_v22 }
 0x752   :  { %2407 = vmatpush.bf16.msra.mxu1 %v3753_v51  ;;  %2420 = vmatpush.bf16.msra.mxu2 %v3749_v46 }
 0x753   :  { %2433 = vmatpush.bf16.msra.mxu3 %v3751_v50  ;;  %2446 = vmatpush.bf16.msrb.mxu0 %v3756_v54 }
 0x756   :  { %2408 = vmatpush.bf16.msra.mxu1 %v3765_v63  ;;  %2421 = vmatpush.bf16.msra.mxu2 %v3761_v58 }
 0x757   :  { %2434 = vmatpush.bf16.msra.mxu3 %v3763_v62  ;;  %2447 = vmatpush.bf16.msrb.mxu0 %v3768_v2 }
 0x75a   :  { %2409 = vmatpush.bf16.msra.mxu1 %v3777_v11  ;;  %2422 = vmatpush.bf16.msra.mxu2 %v3773_v6 }
 0x75b   :  { %2435 = vmatpush.bf16.msra.mxu3 %v3775_v10  ;;  %2448 = vmatpush.bf16.msrb.mxu0 %v3780_v15 }
 0x75e   :  { %2410 = vmatpush.bf16.msra.mxu1 %v3789_v25  ;;  %2423 = vmatpush.bf16.msra.mxu2 %v3784_v20 }
 0x75f   :  { %2436 = vmatpush.bf16.msra.mxu3 %v3786_v21  ;;  %2449 = vmatpush.bf16.msrb.mxu0 %v3791_v27 }
 0x762   :  { %2411 = vmatpush.bf16.msra.mxu1 %v3806_v37  ;;  %2424 = vmatpush.bf16.msra.mxu2 %v3802_v32 }
 0x763   :  { %2437 = vmatpush.bf16.msra.mxu3 %v3804_v36  ;;  %2450 = vmatpush.bf16.msrb.mxu0 %v3810_v42 }
 0x766   :  { %2412 = vmatpush.bf16.msra.mxu1 %v3819_v56  ;;  %2425 = vmatpush.bf16.msra.mxu2 %v3814_v47 }
 0x767   :  { %2438 = vmatpush.bf16.msra.mxu3 %v3816_v48  ;;  %2451 = vmatpush.bf16.msrb.mxu0 %v3822_v0 }
 0x76a   :  { %2413 = vmatpush.bf16.msra.mxu1 %v3831_v13  ;;  %2426 = vmatpush.bf16.msra.mxu2 %v3825_v5 }
 0x76b   :  { %2439 = vmatpush.bf16.msra.mxu3 %v3829_v12  ;;  %2452 = vmatpush.bf16.msrb.mxu0 %v3834_v18 }
 0x76e   :  { %2414 = vmatpush.bf16.msra.mxu1 %v3843_v29  ;;  %2427 = vmatpush.bf16.msra.mxu2 %v3837_v24 }
 0x76f   :  { %2440 = vmatpush.bf16.msra.mxu3 %v3841_v26  ;;  %2453 = vmatpush.bf16.msrb.mxu0 %v3847_v39 }
 0x7cd   :  { %v2142_v40 = vpop.f32.mrf.mxu1 }
 0x7ce   :  { %v2181_v30 = vpop.f32.mrf.mxu0 }
 0x7cf   :  { %v2191_v3 = vrot.slane %v2181_v30, 2 }
 0x7d3   :  { %v2155_v53 = vpop.f32.mrf.mxu2 }
 0x7d4   :  { %v2189_v43 = vrot.slane %v2155_v53, 6  ;;  %v2168_v4 = vpop.f32.mrf.mxu3 }
 0x7d5   :  { %v2190_v17 = vrot.slane %v2168_v4, 4  ;;  %v2144_v61 = vpop.f32.mrf.mxu1 }
 0x7d6   :  { %v2192_v16 = vsel %vm627_vm4, %v2142_v40, %v2189_v43  ;;  %v2183_v1 = vpop.f32.mrf.mxu0 }
 0x7d7   :  { %v2193_v9 = vsel %vm629_vm1, %v2190_v17, %v2191_v3 }
 0x7d8   :  { %v2194_v8 = vsel %vm631_vm5, %v2192_v16, %v2193_v9 }
 0x7d9   :  { %v2196_v35 = vadd.f32 %v2194_v8, %v669_v34 }
 0x7db   :  { %v3074_v28 = vmul.f32 -1.442695, %v2196_v35  ;;  %v2217_v14 = vrot.slane %v2196_v35, 2  ;;  %v2241_v23 = vrot.slane %v2196_v35, 6  ;;  %v2157_v38 = vpop.f32.mrf.mxu2  ;;  %v2238_v30 = vrot.slane %v2196_v35, 4 }
 0x7dc   :  { %v2170_v49 = vpop.f32.mrf.mxu3 }
 0x7dd   :  { %3320 = vpow2.f32 %v3074_v28  ;;  %v3075_v44 = vmul.f32 -1.442695, %v2217_v14  ;;  %v3076_v41 = vmul.f32 -1.442695, %v2241_v23 }
 0x7df   :  { %3322 = vpow2.f32 %v3075_v44 }
 0x7e0   :  { %3324 = vpow2.f32 %v3076_v41 }
 0x7e3   :  { %v3321_v59 = vpop.eup %3320 }
 0x7e4   :  { %v2200_v31 = vadd.f32 1.0, %v3321_v59 }
 0x7e5   :  { %v3323_v52 = vpop.eup %3322 }
 0x7e6   :  { %v3325_v19 = vpop.eup %3324  ;;  %3326 = vrcp.f32 %v2200_v31  ;;  %v2222_v60 = vadd.f32 1.0, %v3323_v52  ;;  %v2212_v3 = vand.u32 2147483648, %v2200_v31  ;;  %v2210_v1 = vand.u32 2147483647, %v2200_v31 }
 0x7e7   :  { %v2246_v57 = vadd.f32 1.0, %v3325_v19  ;;  %vm2206_vm12 = vweird.f32 %v2200_v31 }
 0x7e8   :  { %3328 = vrcp.f32 %v2222_v60  ;;  %v2234_v45 = vand.u32 2147483648, %v2222_v60  ;;  %v2232_v8 = vand.u32 2147483647, %v2222_v60  ;;  %v2213_v28 = vor.u32 1.1754944e-38, %v2212_v3 }
 0x7e9   :  { %3330 = vrcp.f32 %v2246_v57  ;;  %vm2211_vm15 = vcmp.eq.f32.partialorder %v2210_v1, 8.507059e+37  ;;  %vm2228_vm0 = vweird.f32 %v2222_v60  ;;  %vm2252_vm7 = vweird.f32 %v2246_v57 }
 0x7ea   :  { %3332 = vtanh.f32 %v2238_v30  ;;  %v2235_v49 = vor.u32 1.1754944e-38, %v2234_v45  ;;  %vm2233_vm3 = vcmp.eq.f32.partialorder %v2232_v8, 8.507059e+37 }
 0x7ec   :  { %v3327_v7 = vpop.eup %3326 }
 0x7ed   :  { %v2202_v22 = vmul.f32 %v3327_v7, %v2200_v31  ;;  %vm2207_vm11 = vweird.f32 %v3327_v7 }
 0x7ee   :  { %v3329_v40 = vpop.eup %3328  ;;  %vm2208_vm14 = vmor %vm2206_vm12, %vm2207_vm11 }
 0x7ef   :  { %v3331_v53 = vpop.eup %3330  ;;  %v2203_v43 = vsub.f32 1.0, %v2202_v22  ;;  %v2224_v4 = vmul.f32 %v3329_v40, %v2222_v60  ;;  %vm2229_vm13 = vweird.f32 %v3329_v40  ;;  %v2256_v60 = vand.u32 2147483647, %v2246_v57 }
 0x7f0   :  { %v2248_v17 = vmul.f32 %v3331_v53, %v2246_v57  ;;  %vm2230_vm2 = vmor %vm2228_vm0, %vm2229_vm13  ;;  %v3333_v41 = vpop.eup %3332  ;;  %vm2253_vm6 = vweird.f32 %v3331_v53 }
 0x7f1   :  { %v2225_v61 = vsub.f32 1.0, %v2224_v4  ;;  %v2204_v16 = vmul.f32 %v3327_v7, %v2203_v43  ;;  %v2258_v43 = vand.u32 2147483648, %v2246_v57  ;;  %vm2254_vm8 = vmor %vm2252_vm7, %vm2253_vm6  ;;  %vm2257_vm9 = vcmp.eq.f32.partialorder %v2256_v60, 8.507059e+37 }
 0x7f2   :  { %v2249_v14 = vsub.f32 1.0, %v2248_v17 }
 0x7f3   :  { %v2205_v34 = vadd.f32 %v3327_v7, %v2204_v16  ;;  %v2226_v9 = vmul.f32 %v3329_v40, %v2225_v61  ;;  %v2259_v4 = vor.u32 1.1754944e-38, %v2258_v43 }
 0x7f4   :  { %v2250_v31 = vmul.f32 %v3331_v53, %v2249_v14 }
 0x7f5   :  { %v2209_v35 = vsel %vm2208_vm14, %v3327_v7, %v2205_v34  ;;  %v2227_v23 = vadd.f32 %v3329_v40, %v2226_v9 }
 0x7f6   :  { %v2214_v38 = vsel %vm2211_vm15, %v2213_v28, %v2209_v35  ;;  %v2251_v30 = vadd.f32 %v3331_v53, %v2250_v31 }
 0x7f7   :  { %v2231_v44 = vsel %vm2230_vm2, %v3329_v40, %v2227_v23  ;;  %v2263_v19 = vmul.f32 %v3333_v41, %v2214_v38 }
 0x7f8   :  { %v2236_v59 = vsel %vm2233_vm3, %v2235_v49, %v2231_v44  ;;  %v2255_v7 = vsel %vm2254_vm8, %v3331_v53, %v2251_v30 }
 0x7f9   :  { %v2262_v52 = vmul.f32 %v2236_v59, %v4355_v33  ;;  %v2260_v3 = vsel %vm2257_vm9, %v2259_v4, %v2255_v7 }
 0x7fb   :  { %v4395_v22 = vadd.f32 %v2263_v19, %v2262_v52 }
 0x7fd   :  { %3334 = vtanh.f32 %v4395_v22 }
 0x803   :  { %v3335_v40 = vpop.eup %3334 }
 0x804   :  { %v2266_v17 = vmul.f32 %v3335_v40, %v2260_v3 }
 0x806   :  { %v2269_v61 = vpack.c.bf16 %v2266_v17, %v2266_v17 }
 0x808   :  { %2278 = vmatmul.bf16.vlgmr.msrb.gmra.mxu1 %v2269_v61  ;;  %2291 = vmatmul.bf16.vlgmr.msrb.gmra.mxu2 %v2269_v61 }
 0x809   :  { %2304 = vmatmul.bf16.vlgmr.msrb.gmra.mxu3 %v2269_v61  ;;  %2317 = vmatmul.bf16.vlgmr.msra.gmra.mxu0 %v2269_v61 }
 0x80a   :  { %2544 = vmatpush.bf16.msrb.mxu1 %v3753_v51  ;;  %2557 = vmatpush.bf16.msrb.mxu2 %v3749_v46 }
 0x80b   :  { %2570 = vmatpush.bf16.msrb.mxu3 %v3751_v50  ;;  %2583 = vmatpush.bf16.msra.mxu0 %v3756_v54 }
 0x80e   :  { %2545 = vmatpush.bf16.msrb.mxu1 %v3765_v63  ;;  %2558 = vmatpush.bf16.msrb.mxu2 %v3761_v58 }
 0x80f   :  { %2571 = vmatpush.bf16.msrb.mxu3 %v3763_v62  ;;  %2584 = vmatpush.bf16.msra.mxu0 %v3768_v2 }
 0x812   :  { %2546 = vmatpush.bf16.msrb.mxu1 %v3777_v11  ;;  %2559 = vmatpush.bf16.msrb.mxu2 %v3773_v6  ;;  %v673_v11 = vrot.slane %v4011_v55, 4 }
 0x813   :  { %2572 = vmatpush.bf16.msrb.mxu3 %v3775_v10  ;;  %2585 = vmatpush.bf16.msra.mxu0 %v3780_v15 }
 0x816   :  { %2547 = vmatpush.bf16.msrb.mxu1 %v3789_v25  ;;  %2560 = vmatpush.bf16.msrb.mxu2 %v3784_v20 }
 0x817   :  { %2573 = vmatpush.bf16.msrb.mxu3 %v3786_v21  ;;  %2586 = vmatpush.bf16.msra.mxu0 %v3791_v27 }
 0x81a   :  { %2548 = vmatpush.bf16.msrb.mxu1 %v3806_v37  ;;  %2561 = vmatpush.bf16.msrb.mxu2 %v3802_v32 }
 0x81b   :  { %2574 = vmatpush.bf16.msrb.mxu3 %v3804_v36  ;;  %2587 = vmatpush.bf16.msra.mxu0 %v3810_v42 }
 0x81e   :  { %2549 = vmatpush.bf16.msrb.mxu1 %v3819_v56  ;;  %2562 = vmatpush.bf16.msrb.mxu2 %v3814_v47 }
 0x81f   :  { %2575 = vmatpush.bf16.msrb.mxu3 %v3816_v48  ;;  %2588 = vmatpush.bf16.msra.mxu0 %v3822_v0 }
 0x822   :  { %2550 = vmatpush.bf16.msrb.mxu1 %v3831_v13  ;;  %2563 = vmatpush.bf16.msrb.mxu2 %v3825_v5 }
 0x823   :  { %2576 = vmatpush.bf16.msrb.mxu3 %v3829_v12  ;;  %2589 = vmatpush.bf16.msra.mxu0 %v3834_v18 }
 0x826   :  { %2551 = vmatpush.bf16.msrb.mxu1 %v3843_v29  ;;  %2564 = vmatpush.bf16.msrb.mxu2 %v3837_v24 }
 0x827   :  { %2577 = vmatpush.bf16.msrb.mxu3 %v3841_v26  ;;  %2590 = vmatpush.bf16.msra.mxu0 %v3847_v39 }
 0x885   :  { %v2279_v46 = vpop.f32.mrf.mxu1 }
 0x886   :  { %v2318_v50 = vpop.f32.mrf.mxu0 }
 0x887   :  { %v2328_v62 = vrot.slane %v2318_v50, 2 }
 0x88b   :  { %v2292_v51 = vpop.f32.mrf.mxu2 }
 0x88c   :  { %v2326_v54 = vrot.slane %v2292_v51, 6  ;;  %v2305_v58 = vpop.f32.mrf.mxu3 }
 0x88d   :  { %v2327_v63 = vrot.slane %v2305_v58, 4  ;;  %v2281_v2 = vpop.f32.mrf.mxu1 }
 0x88e   :  { %v2329_v6 = vsel %vm627_vm4, %v2279_v46, %v2326_v54  ;;  %v2320_v10 = vpop.f32.mrf.mxu0 }
 0x88f   :  { %v2330_v15 = vsel %vm629_vm1, %v2327_v63, %v2328_v62 }
 0x890   :  { %v2331_v20 = vsel %vm631_vm5, %v2329_v6, %v2330_v15  ;;  %v4524_v15 = vld [vmem:[#allocation14_spill] sm:$0xff] }
 0x891   :  { %v2333_v21 = vadd.f32 %v2331_v20, %v673_v11  ;;  %v677_v20 = vrot.slane %v4524_v15, 6  ;;  %v2687_v15 = vld [vmem:[%s4511_s6 + $0x48] sm:$0xff] }
 0x893   :  { %v3077_v25 = vmul.f32 -1.442695, %v2333_v21  ;;  %v2354_v27 = vrot.slane %v2333_v21, 2  ;;  %v2378_v32 = vrot.slane %v2333_v21, 6  ;;  %v2294_v36 = vpop.f32.mrf.mxu2  ;;  %v2375_v29 = vrot.slane %v2333_v21, 4 }
 0x894   :  { %v2307_v37 = vpop.f32.mrf.mxu3 }
 0x895   :  { %3336 = vpow2.f32 %v3077_v25  ;;  %v3078_v42 = vmul.f32 -1.442695, %v2354_v27  ;;  %v3079_v47 = vmul.f32 -1.442695, %v2378_v32 }
 0x897   :  { %3338 = vpow2.f32 %v3078_v42 }
 0x898   :  { %3340 = vpow2.f32 %v3079_v47 }
 0x89b   :  { %v3337_v48 = vpop.eup %3336 }
 0x89c   :  { %v2337_v56 = vadd.f32 1.0, %v3337_v48 }
 0x89d   :  { %v3339_v0 = vpop.eup %3338 }
 0x89e   :  { %v3341_v5 = vpop.eup %3340  ;;  %3342 = vrcp.f32 %v2337_v56  ;;  %v2359_v12 = vadd.f32 1.0, %v3339_v0  ;;  %v2349_v57 = vand.u32 2147483648, %v2337_v56  ;;  %v2347_v45 = vand.u32 2147483647, %v2337_v56 }
 0x89f   :  { %v2383_v13 = vadd.f32 1.0, %v3341_v5  ;;  %vm2343_vm11 = vweird.f32 %v2337_v56 }
 0x8a0   :  { %3344 = vrcp.f32 %v2359_v12  ;;  %v2371_v34 = vand.u32 2147483648, %v2359_v12  ;;  %v2369_v28 = vand.u32 2147483647, %v2359_v12  ;;  %v2350_v14 = vor.u32 1.1754944e-38, %v2349_v57 }
 0x8a1   :  { %3346 = vrcp.f32 %v2383_v13  ;;  %vm2348_vm14 = vcmp.eq.f32.partialorder %v2347_v45, 8.507059e+37  ;;  %vm2365_vm15 = vweird.f32 %v2359_v12  ;;  %v2395_v7 = vand.u32 2147483648, %v2383_v13 }
 0x8a2   :  { %3348 = vtanh.f32 %v2375_v29  ;;  %v2372_v44 = vor.u32 1.1754944e-38, %v2371_v34  ;;  %vm2370_vm2 = vcmp.eq.f32.partialorder %v2369_v28, 8.507059e+37  ;;  %vm2389_vm6 = vweird.f32 %v2383_v13 }
 0x8a3   :  { %v2393_v4 = vand.u32 2147483647, %v2383_v13  ;;  %v2396_v3 = vor.u32 1.1754944e-38, %v2395_v7 }
 0x8a4   :  { %v3343_v18 = vpop.eup %3342 }
 0x8a5   :  { %v2339_v24 = vmul.f32 %v3343_v18, %v2337_v56  ;;  %vm2344_vm10 = vweird.f32 %v3343_v18  ;;  %vm2394_vm8 = vcmp.eq.f32.partialorder %v2393_v4, 8.507059e+37 }
 0x8a6   :  { %v3345_v26 = vpop.eup %3344  ;;  %vm2345_vm13 = vmor %vm2343_vm11, %vm2344_vm10 }
 0x8a7   :  { %v3347_v39 = vpop.eup %3346  ;;  %v2340_v55 = vsub.f32 1.0, %v2339_v24  ;;  %v2361_v33 = vmul.f32 %v3345_v26, %v2359_v12  ;;  %vm2366_vm12 = vweird.f32 %v3345_v26 }
 0x8a8   :  { %v2385_v53 = vmul.f32 %v3347_v39, %v2383_v13  ;;  %vm2367_vm0 = vmor %vm2365_vm15, %vm2366_vm12  ;;  %v3349_v59 = vpop.eup %3348  ;;  %vm2390_vm3 = vweird.f32 %v3347_v39 }
 0x8a9   :  { %v2362_v16 = vsub.f32 1.0, %v2361_v33  ;;  %v2341_v1 = vmul.f32 %v3343_v18, %v2340_v55  ;;  %vm2391_vm7 = vmor %vm2389_vm6, %vm2390_vm3 }
 0x8aa   :  { %v2386_v35 = vsub.f32 1.0, %v2385_v53 }
 0x8ab   :  { %v2342_v9 = vadd.f32 %v3343_v18, %v2341_v1  ;;  %v2363_v8 = vmul.f32 %v3345_v26, %v2362_v16 }
 0x8ac   :  { %v2387_v52 = vmul.f32 %v3347_v39, %v2386_v35 }
 0x8ad   :  { %v2346_v23 = vsel %vm2345_vm13, %v3343_v18, %v2342_v9  ;;  %v2364_v38 = vadd.f32 %v3345_v26, %v2363_v8 }
 0x8ae   :  { %v2351_v49 = vsel %vm2348_vm14, %v2350_v14, %v2346_v23  ;;  %v2388_v60 = vadd.f32 %v3347_v39, %v2387_v52 }
 0x8af   :  { %v2368_v41 = vsel %vm2367_vm0, %v3345_v26, %v2364_v38  ;;  %v2400_v30 = vmul.f32 %v3349_v59, %v2351_v49 }
 0x8b0   :  { %v2373_v31 = vsel %vm2370_vm2, %v2372_v44, %v2368_v41  ;;  %v2392_v40 = vsel %vm2391_vm7, %v3347_v39, %v2388_v60 }
 0x8b1   :  { %v2399_v19 = vmul.f32 %v2373_v31, %v4395_v22  ;;  %v2397_v61 = vsel %vm2394_vm8, %v2396_v3, %v2392_v40 }
 0x8b3   :  { %v4435_v43 = vadd.f32 %v2400_v30, %v2399_v19 }
 0x8b5   :  { %3350 = vtanh.f32 %v4435_v43 }
 0x8bb   :  { %v3351_v17 = vpop.eup %3350 }
 0x8bc   :  { %v2403_v46 = vmul.f32 %v3351_v17, %v2397_v61 }
 0x8be   :  { %v2406_v50 = vpack.c.bf16 %v2403_v46, %v2403_v46 }
 0x8c0   :  { %2415 = vmatmul.bf16.vlgmr.msra.gmra.mxu1 %v2406_v50  ;;  %2428 = vmatmul.bf16.vlgmr.msra.gmra.mxu2 %v2406_v50 }
 0x8c1   :  { %2441 = vmatmul.bf16.vlgmr.msra.gmra.mxu3 %v2406_v50  ;;  %2454 = vmatmul.bf16.vlgmr.msrb.gmra.mxu0 %v2406_v50 }
 0x93d   :  { %v2416_v22 = vpop.f32.mrf.mxu1 }
 0x93e   :  { %v2455_v51 = vpop.f32.mrf.mxu0 }
 0x93f   :  { %v2465_v63 = vrot.slane %v2455_v51, 2 }
 0x943   :  { %v2429_v54 = vpop.f32.mrf.mxu2 }
 0x944   :  { %v2463_v58 = vrot.slane %v2429_v54, 6  ;;  %v2442_v62 = vpop.f32.mrf.mxu3 }
 0x945   :  { %v2464_v2 = vrot.slane %v2442_v62, 4  ;;  %v2418_v6 = vpop.f32.mrf.mxu1  ;;  %v2691_v62 = vld [vmem:[%s4511_s6 + $0x68] sm:$0xff] }
 0x946   :  { %v2466_v10 = vsel %vm627_vm4, %v2416_v22, %v2463_v58  ;;  %v2457_v11 = vpop.f32.mrf.mxu0  ;;  %v2692_v58 = vld [vmem:[%s4511_s6 + $0x70] sm:$0xff] }
 0x947   :  { %v2467_v21 = vsel %vm629_vm1, %v2464_v2, %v2465_v63  ;;  %v2690_v2 = vld [vmem:[%s4511_s6 + $0x60] sm:$0xff]  ;;  %v2688_v11 = vld [vmem:[%s4511_s6 + $0x50] sm:$0xff] }
 0x948   :  { %v2468_v25 = vsel %vm631_vm5, %v2466_v10, %v2467_v21  ;;  %v2689_v10 = vld [vmem:[%s4511_s6 + $0x58] sm:$0xff]  ;;  %v2686_v21 = vld [vmem:[%s4511_s6 + $0x40] sm:$0xff] }
 0x949   :  { %v2470_v27 = vadd.f32 %v2468_v25, %v677_v20 }
 0x94b   :  { %v3080_v32 = vmul.f32 -1.442695, %v2470_v27  ;;  %v2491_v36 = vrot.slane %v2470_v27, 2  ;;  %v2515_v37 = vrot.slane %v2470_v27, 6  ;;  %v2431_v42 = vpop.f32.mrf.mxu2  ;;  %v2512_v55 = vrot.slane %v2470_v27, 4 }
 0x94c   :  { %v2444_v47 = vpop.f32.mrf.mxu3  ;;  %v2685_v42 = vld [vmem:[%s4511_s6 + $0x38] sm:$0xff] }
 0x94d   :  { %3352 = vpow2.f32 %v3080_v32  ;;  %v3081_v48 = vmul.f32 -1.442695, %v2491_v36  ;;  %v3082_v56 = vmul.f32 -1.442695, %v2515_v37 }
 0x94f   :  { %3354 = vpow2.f32 %v3081_v48 }
 0x950   :  { %3356 = vpow2.f32 %v3082_v56 }
 0x953   :  { %v3353_v0 = vpop.eup %3352 }
 0x954   :  { %v2474_v5 = vadd.f32 1.0, %v3353_v0  ;;  %v2684_v0 = vld [vmem:[%s4511_s6 + $0x30] sm:$0xff] }
 0x955   :  { %v3355_v12 = vpop.eup %3354 }
 0x956   :  { %v3357_v13 = vpop.eup %3356  ;;  %3358 = vrcp.f32 %v2474_v5  ;;  %v2496_v18 = vadd.f32 1.0, %v3355_v12  ;;  %v2486_v16 = vand.u32 2147483648, %v2474_v5  ;;  %v2484_v9 = vand.u32 2147483647, %v2474_v5  ;;  %v4525_v12 = vld [vmem:[#allocation15_spill] sm:$0xff] }
 0x957   :  { %v2520_v24 = vadd.f32 1.0, %v3357_v13  ;;  %vm2480_vm10 = vweird.f32 %v2474_v5 }
 0x958   :  { %3360 = vrcp.f32 %v2496_v18  ;;  %v2508_v8 = vand.u32 2147483648, %v2496_v18  ;;  %v2506_v35 = vand.u32 2147483647, %v2496_v18  ;;  %v2487_v23 = vor.u32 1.1754944e-38, %v2486_v16  ;;  %v2681_v16 = vld [vmem:[%s4511_s6 + $0x18] sm:$0xff] }
 0x959   :  { %3362 = vrcp.f32 %v2520_v24  ;;  %vm2485_vm13 = vcmp.eq.f32.partialorder %v2484_v9, 8.507059e+37  ;;  %vm2502_vm14 = vweird.f32 %v2496_v18  ;;  %v2532_v3 = vand.u32 2147483648, %v2520_v24  ;;  %v2678_v9 = vld [vmem:[%s4511_s6] sm:$0xff] }
 0x95a   :  { %3364 = vtanh.f32 %v2512_v55  ;;  %v2509_v59 = vor.u32 1.1754944e-38, %v2508_v8  ;;  %vm2507_vm0 = vcmp.eq.f32.partialorder %v2506_v35, 8.507059e+37  ;;  %vm2526_vm3 = vweird.f32 %v2520_v24  ;;  %v2682_v55 = vld [vmem:[%s4511_s6 + $0x20] sm:$0xff] }
 0x95b   :  { %v2530_v17 = vand.u32 2147483647, %v2520_v24  ;;  %v2533_v46 = vor.u32 1.1754944e-38, %v2532_v3 }
 0x95c   :  { %v3359_v26 = vpop.eup %3358 }
 0x95d   :  { %v2476_v29 = vmul.f32 %v3359_v26, %v2474_v5  ;;  %vm2481_vm9 = vweird.f32 %v3359_v26  ;;  %vm2531_vm7 = vcmp.eq.f32.partialorder %v2530_v17, 8.507059e+37 }
 0x95e   :  { %v3361_v39 = vpop.eup %3360  ;;  %vm2482_vm12 = vmor %vm2480_vm10, %vm2481_vm9 }
 0x95f   :  { %v3363_v33 = vpop.eup %3362  ;;  %v2477_v57 = vsub.f32 1.0, %v2476_v29  ;;  %v2498_v53 = vmul.f32 %v3361_v39, %v2496_v18  ;;  %vm2503_vm11 = vweird.f32 %v3361_v39  ;;  %v2683_v18 = vld [vmem:[%s4511_s6 + $0x28] sm:$0xff] }
 0x960   :  { %v2522_v1 = vmul.f32 %v3363_v33, %v2520_v24  ;;  %vm2504_vm15 = vmor %vm2502_vm14, %vm2503_vm11  ;;  %v3365_v52 = vpop.eup %3364  ;;  %vm2527_vm2 = vweird.f32 %v3363_v33 }
 0x961   :  { %v2499_v45 = vsub.f32 1.0, %v2498_v53  ;;  %v2478_v34 = vmul.f32 %v3359_v26, %v2477_v57  ;;  %vm2528_vm6 = vmor %vm2526_vm3, %vm2527_vm2 }
 0x962   :  { %v2523_v38 = vsub.f32 1.0, %v2522_v1  ;;  %v2680_v1 = vld [vmem:[%s4511_s6 + $0x10] sm:$0xff] }
 0x963   :  { %v2479_v28 = vadd.f32 %v3359_v26, %v2478_v34  ;;  %v2500_v14 = vmul.f32 %v3361_v39, %v2499_v45  ;;  %v2679_v45 = vld [vmem:[%s4511_s6 + $0x8] sm:$0xff] }
 0x964   :  { %v2524_v30 = vmul.f32 %v3363_v33, %v2523_v38 }
 0x965   :  { %v2483_v49 = vsel %vm2482_vm12, %v3359_v26, %v2479_v28  ;;  %v2501_v44 = vadd.f32 %v3361_v39, %v2500_v14 }
 0x966   :  { %v2488_v41 = vsel %vm2485_vm13, %v2487_v23, %v2483_v49  ;;  %v2525_v40 = vadd.f32 %v3363_v33, %v2524_v30 }
 0x967   :  { %v2505_v31 = vsel %vm2504_vm15, %v3361_v39, %v2501_v44  ;;  %v2537_v7 = vmul.f32 %v3365_v52, %v2488_v41 }
 0x968   :  { %v2510_v19 = vsel %vm2507_vm0, %v2509_v59, %v2505_v31  ;;  %v2529_v61 = vsel %vm2528_vm6, %v3363_v33, %v2525_v40 }
 0x969   :  { %v2536_v60 = vmul.f32 %v2510_v19, %v4435_v43  ;;  %v2534_v22 = vsel %vm2531_vm7, %v2533_v46, %v2529_v61  ;;  %v2693_v43 = vld [vmem:[%s4511_s6 + $0x78] sm:$0xff] }
 0x96a   :  { %2698 = vmatpush.msra.mxu1 %v2693_v43 }
 0x96b   :  { %v4443_v4 = vadd.f32 %v2537_v7, %v2536_v60 }
 0x96c   :  { %2699 = vmatpush.msra.mxu1 %v2692_v58 }
 0x96d   :  { %3366 = vtanh.f32 %v4443_v4 }
 0x96e   :  { %2700 = vmatpush.msra.mxu1 %v2691_v62 }
 0x970   :  { %2701 = vmatpush.msra.mxu1 %v2690_v2 }
 0x972   :  { %2702 = vmatpush.msra.mxu1 %v2689_v10 }
 0x973   :  { %v3367_v50 = vpop.eup %3366 }
 0x974   :  { %v2540_v51 = vmul.f32 %v3367_v50, %v2534_v22  ;;  %2703 = vmatpush.msra.mxu1 %v2688_v11 }
 0x976   :  { %v2543_v54 = vpack.c.bf16 %v2540_v51, %v2540_v51  ;;  %2704 = vmatpush.msra.mxu1 %v2687_v15 }
 0x978   :  { %2552 = vmatmul.bf16.vlgmr.msrb.gmra.mxu1 %v2543_v54  ;;  %2565 = vmatmul.bf16.vlgmr.msrb.gmra.mxu2 %v2543_v54 }
 0x979   :  { %2578 = vmatmul.bf16.vlgmr.msrb.gmra.mxu3 %v2543_v54  ;;  %2591 = vmatmul.bf16.vlgmr.msra.gmra.mxu0 %v2543_v54 }
 0x97a   :  { %2705 = vmatpush.msra.mxu1 %v2686_v21 }
 0x97c   :  { %2706 = vmatpush.msra.mxu1 %v2685_v42 }
 0x97e   :  { %2707 = vmatpush.msra.mxu1 %v2684_v0 }
 0x980   :  { %2708 = vmatpush.msra.mxu1 %v2683_v18 }
 0x982   :  { %2709 = vmatpush.msra.mxu1 %v2682_v55 }
 0x984   :  { %2710 = vmatpush.msra.mxu1 %v2681_v16 }
 0x986   :  { %2711 = vmatpush.msra.mxu1 %v2680_v1 }
 0x988   :  { %2712 = vmatpush.msra.mxu1 %v2679_v45 }
 0x98a   :  { %2713 = vmatpush.msra.mxu1 %v2678_v9 }
 0x9f5   :  { %v2553_v63 = vpop.f32.mrf.mxu1 }
 0x9f6   :  { %v2592_v6 = vpop.f32.mrf.mxu0 }
 0x9f7   :  { %v2602_v32 = vrot.slane %v2592_v6, 2 }
 0x9fb   :  { %v2566_v20 = vpop.f32.mrf.mxu2 }
 0x9fc   :  { %v2600_v25 = vrot.slane %v2566_v20, 6  ;;  %v2579_v27 = vpop.f32.mrf.mxu3 }
 0x9fd   :  { %v2601_v36 = vrot.slane %v2579_v27, 4  ;;  %v2555_v37 = vpop.f32.mrf.mxu1 }
 0x9fe   :  { %v2603_v47 = vsel %vm627_vm4, %v2553_v63, %v2600_v25  ;;  %v2594_v48 = vpop.f32.mrf.mxu0 }
 0x9ff   :  { %v2604_v56 = vsel %vm629_vm1, %v2601_v36, %v2602_v32 }
 0xa00   :  { %v2605_v5 = vsel %vm631_vm5, %v2603_v47, %v2604_v56 }
 0xa01   :  { %v2607_v13 = vadd.f32 %v2605_v5, %v4525_v12 }
 0xa03   :  { %v3083_v24 = vmul.f32 -1.442695, %v2607_v13  ;;  %v2628_v26 = vrot.slane %v2607_v13, 2  ;;  %v2652_v29 = vrot.slane %v2607_v13, 6  ;;  %v2568_v39 = vpop.f32.mrf.mxu2  ;;  %v2649_v41 = vrot.slane %v2607_v13, 4 }
 0xa04   :  { %v2581_v33 = vpop.f32.mrf.mxu3 }
 0xa05   :  { %3368 = vpow2.f32 %v3083_v24  ;;  %v3084_v57 = vmul.f32 -1.442695, %v2628_v26  ;;  %v3085_v53 = vmul.f32 -1.442695, %v2652_v29 }
 0xa07   :  { %3370 = vpow2.f32 %v3084_v57 }
 0xa08   :  { %3372 = vpow2.f32 %v3085_v53 }
 0xa0b   :  { %v3369_v34 = vpop.eup %3368 }
 0xa0c   :  { %v2611_v8 = vadd.f32 1.0, %v3369_v34 }
 0xa0d   :  { %v3371_v28 = vpop.eup %3370 }
 0xa0e   :  { %v3373_v14 = vpop.eup %3372  ;;  %3374 = vrcp.f32 %v2611_v8  ;;  %v2633_v35 = vadd.f32 1.0, %v3371_v28  ;;  %v2623_v19 = vand.u32 2147483648, %v2611_v8  ;;  %v2621_v40 = vand.u32 2147483647, %v2611_v8 }
 0xa0f   :  { %v2657_v23 = vadd.f32 1.0, %v3373_v14  ;;  %vm2617_vm4 = vweird.f32 %v2611_v8 }
 0xa10   :  { %3376 = vrcp.f32 %v2633_v35  ;;  %v2645_v3 = vand.u32 2147483648, %v2633_v35  ;;  %v2643_v46 = vand.u32 2147483647, %v2633_v35  ;;  %v2624_v50 = vor.u32 1.1754944e-38, %v2623_v19 }
 0xa11   :  { %3378 = vrcp.f32 %v2657_v23  ;;  %vm2622_vm9 = vcmp.eq.f32.partialorder %v2621_v40, 8.507059e+37  ;;  %vm2639_vm10 = vweird.f32 %v2633_v35  ;;  %v2669_v21 = vand.u32 2147483648, %v2657_v23 }
 0xa12   :  { %3380 = vtanh.f32 %v2649_v41  ;;  %v2646_v58 = vor.u32 1.1754944e-38, %v2645_v3  ;;  %vm2644_vm12 = vcmp.eq.f32.partialorder %v2643_v46, 8.507059e+37  ;;  %vm2663_vm14 = vweird.f32 %v2657_v23 }
 0xa13   :  { %v2667_v25 = vand.u32 2147483647, %v2657_v23  ;;  %v2670_v32 = vor.u32 1.1754944e-38, %v2669_v21 }
 0xa14   :  { %v3375_v38 = vpop.eup %3374 }
 0xa15   :  { %v2613_v49 = vmul.f32 %v3375_v38, %v2611_v8  ;;  %vm2618_vm1 = vweird.f32 %v3375_v38  ;;  %vm2668_vm0 = vcmp.eq.f32.partialorder %v2667_v25, 8.507059e+37 }
 0xa16   :  { %v3377_v44 = vpop.eup %3376  ;;  %vm2619_vm8 = vmor %vm2617_vm4, %vm2618_vm1 }
 0xa17   :  { %v3379_v59 = vpop.eup %3378  ;;  %v2614_v31 = vsub.f32 1.0, %v2613_v49  ;;  %v2635_v52 = vmul.f32 %v3377_v44, %v2633_v35  ;;  %vm2640_vm5 = vweird.f32 %v3377_v44 }
 0xa18   :  { %v2659_v30 = vmul.f32 %v3379_v59, %v2657_v23  ;;  %vm2641_vm11 = vmor %vm2639_vm10, %vm2640_vm5  ;;  %v3381_v63 = vpop.eup %3380  ;;  %vm2664_vm13 = vweird.f32 %v3379_v59 }
 0xa19   :  { %v2636_v60 = vsub.f32 1.0, %v2635_v52  ;;  %v2615_v7 = vmul.f32 %v3375_v38, %v2614_v31  ;;  %vm2665_vm15 = vmor %vm2663_vm14, %vm2664_vm13 }
 0xa1a   :  { %v2660_v22 = vsub.f32 1.0, %v2659_v30 }
 0xa1b   :  { %v2616_v17 = vadd.f32 %v3375_v38, %v2615_v7  ;;  %v2637_v61 = vmul.f32 %v3377_v44, %v2636_v60 }
 0xa1c   :  { %v2661_v6 = vmul.f32 %v3379_v59, %v2660_v22 }
 0xa1d   :  { %v2620_v51 = vsel %vm2619_vm8, %v3375_v38, %v2616_v17  ;;  %v2638_v54 = vadd.f32 %v3377_v44, %v2637_v61 }
 0xa1e   :  { %v2625_v43 = vsel %vm2622_vm9, %v2624_v50, %v2620_v51  ;;  %v2662_v20 = vadd.f32 %v3379_v59, %v2661_v6 }
 0xa1f   :  { %v2642_v62 = vsel %vm2641_vm11, %v3377_v44, %v2638_v54  ;;  %v2674_v11 = vmul.f32 %v3381_v63, %v2625_v43 }
 0xa20   :  { %v2647_v2 = vsel %vm2644_vm12, %v2646_v58, %v2642_v62  ;;  %v2666_v27 = vsel %vm2665_vm15, %v3379_v59, %v2662_v20 }
 0xa21   :  { %v2673_v10 = vmul.f32 %v2647_v2, %v4443_v4  ;;  %v2671_v37 = vsel %vm2668_vm0, %v2670_v32, %v2666_v27  ;;  %v3167_v4 = vld [vmem:[%s4512_s7] ss:$0 sm:$0xff]  ;;  %s2745_s7 = sshll.u32 %s4513_s8, 4  ;;  %s2746_s7 = int_to_ptr.hbm [resolvable:$true] %s2745_s7 }
 0xa23   :  { %v2675_v15 = vadd.f32 %v2674_v11, %v2673_v10 }
 0xa25   :  { %3382 = vtanh.f32 %v2675_v15 }
 0xa2b   :  { %v3383_v36 = vpop.eup %3382 }
 0xa2c   :  { %v2677_v42 = vmul.f32 %v3383_v36, %v2671_v37 }
 0xa2e   :  { %2714 = vmatmul.f32.vlgmr.msra.gmra.mxu1 %v2677_v42 }
 0xaab   :  { %v2715_v47 = vpop.f32.mrf.mxu1 }
 0xaac   :  { %v2716_v48 = vadd.f32 %v3167_v4, %v2715_v47 }
 0xaae   :  { %v3086_v56 = vmul.f32 -1.442695, %v2716_v48 }
 0xab0   :  { %3384 = vpow2.f32 %v3086_v56 }
 0xab6   :  { %v3385_v0 = vpop.eup %3384 }
 0xab7   :  { %v2721_v5 = vadd.f32 1.0, %v3385_v0 }
 0xab9   :  { %3386 = vrcp.f32 %v2721_v5  ;;  %v2733_v24 = vand.u32 2147483648, %v2721_v5  ;;  %v2731_v29 = vand.u32 2147483647, %v2721_v5  ;;  %vm2727_vm3 = vweird.f32 %v2721_v5 }
 0xabb   :  { %v2734_v55 = vor.u32 1.1754944e-38, %v2733_v24  ;;  %vm2732_vm7 = vcmp.eq.f32.partialorder %v2731_v29, 8.507059e+37 }
 0xabf   :  { %v3387_v12 = vpop.eup %3386 }
 0xac0   :  { %v2723_v13 = vmul.f32 %v3387_v12, %v2721_v5  ;;  %vm2728_vm2 = vweird.f32 %v3387_v12 }
 0xac1   :  { %vm2729_vm6 = vmor %vm2727_vm3, %vm2728_vm2 }
 0xac2   :  { %v2724_v18 = vsub.f32 1.0, %v2723_v13 }
 0xac4   :  { %v2725_v26 = vmul.f32 %v3387_v12, %v2724_v18 }
 0xac6   :  { %v2726_v39 = vadd.f32 %v3387_v12, %v2725_v26 }
 0xac8   :  { %v2730_v33 = vsel %vm2729_vm6, %v3387_v12, %v2726_v39 }
 0xac9   :  { %v2735_v57 = vsel %vm2732_vm7, %v2734_v55, %v2730_v33 }
 0xaca   :  { %2737 = vst [vmem:[#allocation7] sm:$0x3] %v2735_v57 }
 0xacb   :  { %2748 = dma.vmem_to_hbm [thread:$0]  %s2744_s21, 32, %s2746_s7, [#allocation6]  }
 0xacc   :  { %3438 = dma.done.wait [#allocation6], 32  }
 0xacd   :  { %3439 = vsyncadd [#allocation6], 4294967264 }
 0xace   :  { %2753 = vsyncpa [#allocation5], 1 }
 0xacf   :  { %2754 = vsyncpa [#allocation6], 1 }

</bundles_post_ra>
